<compile_context>
chip_gen: v7x
topology: tpu7x:2x2x1
jax: 0.10.0
libtpu: 0.0.40
codegen_flags: <defaults>
</compile_context>

<pallas_src>
import functools
import numpy as np
import jax
import jax.numpy as jnp
from jax import lax
from jax.experimental import pallas as pl
from jax.experimental.pallas import tpu as pltpu

BN_EPS = 1e-5
MXU_DTYPE = jnp.bfloat16   # conv matmul operands only; accumulation + elementwise stay f32


# ----------------------------- in-kernel helpers ------------------------------

def _sel_matrix(n_rows, n_cols, stride, offset):
    """(n_rows, n_cols) 0/1 f32 matrix S with S[t, t*stride + offset] = 1.

    Rows whose target column falls outside [0, n_cols) are all-zero, i.e. they
    contribute exactly 0 -- which is precisely the contribution of a zero
    SAME-padding position.  One f32 matmul therefore implements row shift +
    stride subsampling + zero padding at once (exact, since rows are one-hot).
    """
    r = lax.broadcasted_iota(jnp.int32, (n_rows, n_cols), 0)
    c = lax.broadcasted_iota(jnp.int32, (n_rows, n_cols), 1)
    return jnp.where(c == r * stride + offset, 1.0, 0.0).astype(jnp.float32)


def _chan_pad_matrix(c_in, c_out, ch1):
    """(c_in, c_out) 0/1 f32 matrix P with P[c, c + ch1] = 1 (zero channel pad)."""
    r = lax.broadcasted_iota(jnp.int32, (c_in, c_out), 0)
    c = lax.broadcasted_iota(jnp.int32, (c_in, c_out), 1)
    return jnp.where(c == r + ch1, 1.0, 0.0).astype(jnp.float32)


# ----------------------------- the fused kernel --------------------------------

def _resnet_fused_kernel(*refs, program):
    """Whole ResNet1D forward for ONE sample (one grid step).

    refs = (x_ref, *const_refs, o_ref).  `program` is a static tuple of op
    descriptors produced by the wrapper; const_refs are consumed in order.
    """
    x_ref, o_ref = refs[0], refs[-1]
    cit = iter(refs[1:-1])

    act = x_ref[0].astype(jnp.float32)     # (L, C_in), channels-last activation
    identity = None

    for op, cfg in program:
        if op == "save_identity":
            identity = act

        elif op == "conv":
            # [optional bn1+relu1 prologue] -> SAME conv (post-BN folded into w/b)
            # -> [optional ReLU] -> [optional residual add]
            a = act
            if cfg["prologue"]:
                s_ref, t_ref = next(cit), next(cit)
                a = jnp.maximum(a * s_ref[...] + t_ref[...], 0.0)
            w_ref, b_ref = next(cit), next(cit)          # (K, c_in, c_out) bf16 / (1, c_out) f32
            ab = a.astype(MXU_DTYPE)
            acc = None
            for k in range(cfg["K"]):
                z = jnp.dot(ab, w_ref[k], preferred_element_type=jnp.float32)  # (l_in, c_out)
                d = k - cfg["pad_l"]
                if cfg["stride"] == 1 and d == 0:
                    contrib = z                          # identity shift: skip the select
                else:
                    sel = _sel_matrix(cfg["l_out"], cfg["l_in"], cfg["stride"], d)
                    contrib = jnp.dot(sel, z, preferred_element_type=jnp.float32)
                acc = contrib if acc is None else acc + contrib
            acc = acc + b_ref[...]
            if cfg["relu"]:
                acc = jnp.maximum(acc, 0.0)
            if cfg["add_identity"]:
                acc = acc + identity
            act = acc

        elif op == "pool_identity":
            # MyMaxPool1dPadSame(kernel_size=k): zero-pad then max over k-windows
            # with window stride k (floor mode) -- k one-hot selections + max.
            pooled = None
            for j in range(cfg["k"]):
                sel = _sel_matrix(cfg["l_out"], cfg["l_in"], cfg["k"], j - cfg["pad_l"])
                v = jnp.dot(sel, identity, preferred_element_type=jnp.float32)
                pooled = v if pooled is None else jnp.maximum(pooled, v)
            identity = pooled

        elif op == "pad_identity":
            pmat = _chan_pad_matrix(cfg["c_in"], cfg["c_out"], cfg["ch1"])
            identity = jnp.dot(identity, pmat, preferred_element_type=jnp.float32)

        elif op == "head":
            # final_bn (eval affine) + ReLU + mean over length + nn.Linear
            s_ref, t_ref = next(cit), next(cit)
            wd_ref, bd_ref = next(cit), next(cit)
            a = jnp.maximum(act * s_ref[...] + t_ref[...], 0.0)
            m = jnp.sum(a, axis=0, keepdims=True) * (1.0 / cfg["l"])       # (1, C)
            logits = (jnp.dot(m, wd_ref[...], preferred_element_type=jnp.float32)
                      + bd_ref[...])
            o_ref[0] = logits.astype(o_ref.dtype)


# ----------------------------- parameter folding -------------------------------

def _bn_affine(bn):
    gamma, beta, mean, var = bn
    scale = gamma / jnp.sqrt(var + BN_EPS)
    shift = beta - mean * scale
    return scale, shift


def fold_bn_into_conv(w, b, bn):
    # conv -> BN(eval)  ==  conv with per-out-channel scaled weights / shifted bias
    scale, shift = _bn_affine(bn)
    return w * scale[:, None, None], scale * b + shift


def _const_spec(shape):
    nd = len(shape)
    return pl.BlockSpec(shape, lambda n, _nd=nd: (0,) * _nd)


# ----------------------------- forward pass ------------------------------------

def resnet1d_forward(params, x_ncl):
    # x_ncl: (n_samples, n_channel, n_length) -- PyTorch layout.
    x = jnp.transpose(x_ncl, (0, 2, 1)).astype(jnp.float32)     # -> (N, L, C_in)
    N, L0, c0 = x.shape

    program = []     # static op descriptors (drive the kernel trace)
    consts = []      # flat list of weight / bias / BN-affine arrays

    def push_conv(w, b, *, stride, l_in, prologue=None, relu=False,
                  add_identity=False):
        c_out, c_in, K = w.shape
        l_out = (l_in + stride - 1) // stride
        p = max(0, (l_out - 1) * stride + K - l_in)
        pad_l = p // 2
        if prologue is not None:
            s, t = _bn_affine(prologue)
            consts.append(s.reshape(1, c_in).astype(jnp.float32))
            consts.append(t.reshape(1, c_in).astype(jnp.float32))
        consts.append(jnp.transpose(w, (2, 1, 0)).astype(MXU_DTYPE))   # (K, c_in, c_out)
        consts.append(b.reshape(1, c_out).astype(jnp.float32))
        program.append(("conv", dict(
            K=K, stride=stride, pad_l=pad_l, l_in=l_in, l_out=l_out,
            c_in=c_in, c_out=c_out, prologue=prologue is not None,
            relu=relu, add_identity=add_identity)))
        return l_out, c_out

    # first_block_conv (+ folded first_block_bn) + ReLU
    wf, bf = fold_bn_into_conv(*params["first_conv"], params["first_bn"])
    L, C = push_conv(wf, bf, stride=1, l_in=L0, relu=True)

    for blk in params["blocks"]:
        program.append(("save_identity", None))
        # [bn1+relu1 prologue (dropout = identity)] -> conv1 (bn2 folded) -> relu2
        w1, b1 = fold_bn_into_conv(*blk["conv1"], blk["bn2"])
        Lh, _ = push_conv(w1, b1, stride=blk["stride"], l_in=L,
                          prologue=None if blk["is_first"] else blk["bn1"],
                          relu=True)
        # identity path (fused in-kernel)
        if blk["downsample"]:
            k = blk["stride"]
            p = k - 1
            l_pool = (L + p - k) // k + 1
            program.append(("pool_identity", dict(k=k, pad_l=p // 2,
                                                  l_in=L, l_out=l_pool)))
        if blk["out_c"] != blk["in_c"]:
            ch1 = (blk["out_c"] - blk["in_c"]) // 2
            program.append(("pad_identity", dict(c_in=blk["in_c"],
                                                 c_out=blk["out_c"], ch1=ch1)))
        # conv2 + residual add
        w2, b2 = blk["conv2"]
        L, C = push_conv(w2, b2, stride=1, l_in=Lh, add_identity=True)

    # head: final_bn + final_relu + mean(-1) + dense
    s, t = _bn_affine(params["final_bn"])
    wd, bd = params["dense"]
    n_classes = wd.shape[0]
    consts += [s.reshape(1, C).astype(jnp.float32),
               t.reshape(1, C).astype(jnp.float32),
               wd.T.astype(jnp.float32),
               bd.reshape(1, n_classes).astype(jnp.float32)]
    program.append(("head", dict(l=L, c=C, n_classes=n_classes)))

    in_specs = [pl.BlockSpec((1, L0, c0), lambda n: (n, 0, 0))]
    in_specs += [_const_spec(a.shape) for a in consts]

    out = pl.pallas_call(
        functools.partial(_resnet_fused_kernel, program=tuple(program)),
        out_shape=jax.ShapeDtypeStruct((N, 1, n_classes), jnp.float32),
        grid=(N,),
        in_specs=in_specs,
        out_specs=pl.BlockSpec((1, 1, n_classes), lambda n: (n, 0, 0)),
        compiler_params=pltpu.CompilerParams(dimension_semantics=("parallel",)),
    )(x, *consts)
    return out.reshape(N, n_classes)


# ----------------------------- parameters --------------------------------------

def init_conv(key, c_in, c_out, k):
    k1, k2 = jax.random.split(key)
    bound = 1.0 / np.sqrt(c_in * k)
    w = jax.random.uniform(k1, (c_out, c_in, k), jnp.float32, -bound, bound)
    b = jax.random.uniform(k2, (c_out,), jnp.float32, -bound, bound)
    return w, b


def init_bn(key, c):
    k1, k2, k3, k4 = jax.random.split(key, 4)
    gamma = 1.0 + 0.1 * jax.random.normal(k1, (c,), jnp.float32)
    beta = 0.1 * jax.random.normal(k2, (c,), jnp.float32)
    mean = 0.1 * jax.random.normal(k3, (c,), jnp.float32)
    var = 1.0 + 0.1 * jax.random.uniform(k4, (c,), jnp.float32)
    return gamma, beta, mean, var


def init_resnet1d(key, in_channels, base_filters, kernel_size, stride, n_block,
                  n_classes, downsample_gap=2, increasefilter_gap=4):
    keys = iter(jax.random.split(key, 4 * n_block + 8))
    params = {
        "first_conv": init_conv(next(keys), in_channels, base_filters, kernel_size),
        "first_bn": init_bn(next(keys), base_filters),
        "blocks": [],
    }
    out_channels = base_filters
    for i_block in range(n_block):
        is_first = (i_block == 0)
        downsample = (i_block % downsample_gap) == 1
        if is_first:
            in_c = base_filters
            out_c = in_c
        else:
            in_c = int(base_filters * 2 ** ((i_block - 1) // increasefilter_gap))
            if i_block % increasefilter_gap == 0 and i_block != 0:
                out_c = in_c * 2
            else:
                out_c = in_c
        out_channels = out_c
        params["blocks"].append({
            "is_first": is_first,
            "downsample": downsample,
            "stride": stride if downsample else 1,
            "in_c": in_c,
            "out_c": out_c,
            "bn1": init_bn(next(keys), in_c),
            "conv1": init_conv(next(keys), in_c, out_c, kernel_size),
            "bn2": init_bn(next(keys), out_c),
            "conv2": init_conv(next(keys), out_c, out_c, kernel_size),
        })
    params["final_bn"] = init_bn(next(keys), out_channels)
    kd1, kd2 = jax.random.split(next(keys))
    bound = 1.0 / np.sqrt(out_channels)
    params["dense"] = (
        jax.random.uniform(kd1, (n_classes, out_channels), jnp.float32, -bound, bound),
        jax.random.uniform(kd2, (n_classes,), jnp.float32, -bound, bound),
    )
    return params


# ----------------------------- main ---------------------------------------------

if __name__ == "__main__":
    key = jax.random.PRNGKey(0)
    kx, kp = jax.random.split(key)

    N, C_IN, L = 2, 4, 64
    cfg = dict(in_channels=C_IN, base_filters=16, kernel_size=3, stride=2,
               n_block=5, n_classes=3)

    x = jax.random.normal(kx, (N, C_IN, L), jnp.float32)
    params = init_resnet1d(kp, **cfg)

    fwd = jax.jit(functools.partial(resnet1d_forward, params))
    out = jax.block_until_ready(fwd(x))

    assert out.shape == (N, cfg["n_classes"]), out.shape
    assert bool(jnp.all(jnp.isfinite(out)))
    print("KERNEL_OK")
</pallas_src>

<mosaic_0001>
module attributes {stable_mosaic.version = 11 : i64} {
  func.func @_resnet_fused_kernel(%arg0: i32, %arg1: memref<1x64x4xf32, #tpu.memory_space<vmem>>, %arg2: memref<3x4x16xbf16, #tpu.memory_space<vmem>>, %arg3: memref<1x16xf32, #tpu.memory_space<vmem>>, %arg4: memref<3x16x16xbf16, #tpu.memory_space<vmem>>, %arg5: memref<1x16xf32, #tpu.memory_space<vmem>>, %arg6: memref<3x16x16xbf16, #tpu.memory_space<vmem>>, %arg7: memref<1x16xf32, #tpu.memory_space<vmem>>, %arg8: memref<1x16xf32, #tpu.memory_space<vmem>>, %arg9: memref<1x16xf32, #tpu.memory_space<vmem>>, %arg10: memref<3x16x16xbf16, #tpu.memory_space<vmem>>, %arg11: memref<1x16xf32, #tpu.memory_space<vmem>>, %arg12: memref<3x16x16xbf16, #tpu.memory_space<vmem>>, %arg13: memref<1x16xf32, #tpu.memory_space<vmem>>, %arg14: memref<1x16xf32, #tpu.memory_space<vmem>>, %arg15: memref<1x16xf32, #tpu.memory_space<vmem>>, %arg16: memref<3x16x16xbf16, #tpu.memory_space<vmem>>, %arg17: memref<1x16xf32, #tpu.memory_space<vmem>>, %arg18: memref<3x16x16xbf16, #tpu.memory_space<vmem>>, %arg19: memref<1x16xf32, #tpu.memory_space<vmem>>, %arg20: memref<1x16xf32, #tpu.memory_space<vmem>>, %arg21: memref<1x16xf32, #tpu.memory_space<vmem>>, %arg22: memref<3x16x16xbf16, #tpu.memory_space<vmem>>, %arg23: memref<1x16xf32, #tpu.memory_space<vmem>>, %arg24: memref<3x16x16xbf16, #tpu.memory_space<vmem>>, %arg25: memref<1x16xf32, #tpu.memory_space<vmem>>, %arg26: memref<1x16xf32, #tpu.memory_space<vmem>>, %arg27: memref<1x16xf32, #tpu.memory_space<vmem>>, %arg28: memref<3x16x32xbf16, #tpu.memory_space<vmem>>, %arg29: memref<1x32xf32, #tpu.memory_space<vmem>>, %arg30: memref<3x32x32xbf16, #tpu.memory_space<vmem>>, %arg31: memref<1x32xf32, #tpu.memory_space<vmem>>, %arg32: memref<1x32xf32, #tpu.memory_space<vmem>>, %arg33: memref<1x32xf32, #tpu.memory_space<vmem>>, %arg34: memref<32x3xf32, #tpu.memory_space<vmem>>, %arg35: memref<1x3xf32, #tpu.memory_space<vmem>>, %arg36: memref<1x1x3xf32, #tpu.memory_space<vmem>>) attributes {dimension_semantics = [#tpu.dimension_semantics<parallel>], iteration_bounds = array<i64: 2>, scalar_prefetch = 0 : i64, scratch_operands = 0 : i64, tpu.core_type = #tpu.core_type<tc>, window_params = [{transform_indices = @transform_0, window_bounds = array<i64: 1, 64, 4>}, {pipeline_mode = #tpu.pipeline_mode<synchronous>, transform_indices = @transform_1, window_bounds = array<i64: 3, 4, 16>}, {pipeline_mode = #tpu.pipeline_mode<synchronous>, transform_indices = @transform_2, window_bounds = array<i64: 1, 16>}, {pipeline_mode = #tpu.pipeline_mode<synchronous>, transform_indices = @transform_3, window_bounds = array<i64: 3, 16, 16>}, {pipeline_mode = #tpu.pipeline_mode<synchronous>, transform_indices = @transform_4, window_bounds = array<i64: 1, 16>}, {pipeline_mode = #tpu.pipeline_mode<synchronous>, transform_indices = @transform_5, window_bounds = array<i64: 3, 16, 16>}, {pipeline_mode = #tpu.pipeline_mode<synchronous>, transform_indices = @transform_6, window_bounds = array<i64: 1, 16>}, {pipeline_mode = #tpu.pipeline_mode<synchronous>, transform_indices = @transform_7, window_bounds = array<i64: 1, 16>}, {pipeline_mode = #tpu.pipeline_mode<synchronous>, transform_indices = @transform_8, window_bounds = array<i64: 1, 16>}, {pipeline_mode = #tpu.pipeline_mode<synchronous>, transform_indices = @transform_9, window_bounds = array<i64: 3, 16, 16>}, {pipeline_mode = #tpu.pipeline_mode<synchronous>, transform_indices = @transform_10, window_bounds = array<i64: 1, 16>}, {pipeline_mode = #tpu.pipeline_mode<synchronous>, transform_indices = @transform_11, window_bounds = array<i64: 3, 16, 16>}, {pipeline_mode = #tpu.pipeline_mode<synchronous>, transform_indices = @transform_12, window_bounds = array<i64: 1, 16>}, {pipeline_mode = #tpu.pipeline_mode<synchronous>, transform_indices = @transform_13, window_bounds = array<i64: 1, 16>}, {pipeline_mode = #tpu.pipeline_mode<synchronous>, transform_indices = @transform_14, window_bounds = array<i64: 1, 16>}, {pipeline_mode = #tpu.pipeline_mode<synchronous>, transform_indices = @transform_15, window_bounds = array<i64: 3, 16, 16>}, {pipeline_mode = #tpu.pipeline_mode<synchronous>, transform_indices = @transform_16, window_bounds = array<i64: 1, 16>}, {pipeline_mode = #tpu.pipeline_mode<synchronous>, transform_indices = @transform_17, window_bounds = array<i64: 3, 16, 16>}, {pipeline_mode = #tpu.pipeline_mode<synchronous>, transform_indices = @transform_18, window_bounds = array<i64: 1, 16>}, {pipeline_mode = #tpu.pipeline_mode<synchronous>, transform_indices = @transform_19, window_bounds = array<i64: 1, 16>}, {pipeline_mode = #tpu.pipeline_mode<synchronous>, transform_indices = @transform_20, window_bounds = array<i64: 1, 16>}, {pipeline_mode = #tpu.pipeline_mode<synchronous>, transform_indices = @transform_21, window_bounds = array<i64: 3, 16, 16>}, {pipeline_mode = #tpu.pipeline_mode<synchronous>, transform_indices = @transform_22, window_bounds = array<i64: 1, 16>}, {pipeline_mode = #tpu.pipeline_mode<synchronous>, transform_indices = @transform_23, window_bounds = array<i64: 3, 16, 16>}, {pipeline_mode = #tpu.pipeline_mode<synchronous>, transform_indices = @transform_24, window_bounds = array<i64: 1, 16>}, {pipeline_mode = #tpu.pipeline_mode<synchronous>, transform_indices = @transform_25, window_bounds = array<i64: 1, 16>}, {pipeline_mode = #tpu.pipeline_mode<synchronous>, transform_indices = @transform_26, window_bounds = array<i64: 1, 16>}, {pipeline_mode = #tpu.pipeline_mode<synchronous>, transform_indices = @transform_27, window_bounds = array<i64: 3, 16, 32>}, {pipeline_mode = #tpu.pipeline_mode<synchronous>, transform_indices = @transform_28, window_bounds = array<i64: 1, 32>}, {pipeline_mode = #tpu.pipeline_mode<synchronous>, transform_indices = @transform_29, window_bounds = array<i64: 3, 32, 32>}, {pipeline_mode = #tpu.pipeline_mode<synchronous>, transform_indices = @transform_30, window_bounds = array<i64: 1, 32>}, {pipeline_mode = #tpu.pipeline_mode<synchronous>, transform_indices = @transform_31, window_bounds = array<i64: 1, 32>}, {pipeline_mode = #tpu.pipeline_mode<synchronous>, transform_indices = @transform_32, window_bounds = array<i64: 1, 32>}, {pipeline_mode = #tpu.pipeline_mode<synchronous>, transform_indices = @transform_33, window_bounds = array<i64: 32, 3>}, {pipeline_mode = #tpu.pipeline_mode<synchronous>, transform_indices = @transform_34, window_bounds = array<i64: 1, 3>}, {transform_indices = @transform_35, window_bounds = array<i64: 1, 1, 3>}]} {
    %c0 = arith.constant 0 : index
    %c0_0 = arith.constant 0 : index
    %c0_1 = arith.constant 0 : index
    %0 = vector.load %arg1[%c0, %c0_0, %c0_1] : memref<1x64x4xf32, #tpu.memory_space<vmem>>, vector<1x64x4xf32>
    %1 = vector.shape_cast %0 : vector<1x64x4xf32> to vector<64x4xf32>
    %2 = arith.truncf %1 : vector<64x4xf32> to vector<64x4xbf16>
    %c0_2 = arith.constant 0 : index
    %c0_3 = arith.constant 0 : index
    %c0_4 = arith.constant 0 : index
    %3 = vector.load %arg2[%c0_2, %c0_3, %c0_4] : memref<3x4x16xbf16, #tpu.memory_space<vmem>>, vector<1x4x16xbf16>
    %4 = vector.shape_cast %3 : vector<1x4x16xbf16> to vector<4x16xbf16>
    %cst = arith.constant dense<0.000000e+00> : vector<64x16xf32>
    %5 = tpu.matmul %2, %4, %cst {dimension_numbers = #tpu.dot_dimension_numbers<[1], [0], [0], [1], [0, 0, 1, 1], [], []>} : vector<64x4xbf16>, vector<4x16xbf16>, vector<64x16xf32> -> vector<64x16xf32>
    %6 = tpu.iota {dimensions = array<i32: 0>} : vector<64x64xi32>
    %7 = tpu.iota {dimensions = array<i32: 1>} : vector<64x64xi32>
    %c1_i32 = arith.constant 1 : i32
    %8 = vector.broadcast %c1_i32 : i32 to vector<64x64xi32>
    %9 = arith.muli %6, %8 : vector<64x64xi32>
    %c-1_i32 = arith.constant -1 : i32
    %10 = vector.broadcast %c-1_i32 : i32 to vector<64x64xi32>
    %11 = arith.addi %9, %10 : vector<64x64xi32>
    %12 = arith.cmpi eq, %7, %11 : vector<64x64xi32>
    %cst_5 = arith.constant 1.000000e+00 : f32
    %cst_6 = arith.constant 0.000000e+00 : f32
    %13 = vector.broadcast %cst_5 : f32 to vector<64x64xf32>
    %14 = vector.broadcast %cst_6 : f32 to vector<64x64xf32>
    %15 = arith.select %12, %13, %14 : vector<64x64xi1>, vector<64x64xf32>
    %cst_7 = arith.constant dense<0.000000e+00> : vector<64x16xf32>
    %16 = tpu.matmul %15, %5, %cst_7 {dimension_numbers = #tpu.dot_dimension_numbers<[1], [0], [0], [1], [0, 0, 1, 1], [], []>} : vector<64x64xf32>, vector<64x16xf32>, vector<64x16xf32> -> vector<64x16xf32>
    %c1 = arith.constant 1 : index
    %c0_8 = arith.constant 0 : index
    %c0_9 = arith.constant 0 : index
    %17 = vector.load %arg2[%c1, %c0_8, %c0_9] : memref<3x4x16xbf16, #tpu.memory_space<vmem>>, vector<1x4x16xbf16>
    %18 = vector.shape_cast %17 : vector<1x4x16xbf16> to vector<4x16xbf16>
    %cst_10 = arith.constant dense<0.000000e+00> : vector<64x16xf32>
    %19 = tpu.matmul %2, %18, %cst_10 {dimension_numbers = #tpu.dot_dimension_numbers<[1], [0], [0], [1], [0, 0, 1, 1], [], []>} : vector<64x4xbf16>, vector<4x16xbf16>, vector<64x16xf32> -> vector<64x16xf32>
    %20 = arith.addf %16, %19 : vector<64x16xf32>
    %c2 = arith.constant 2 : index
    %c0_11 = arith.constant 0 : index
    %c0_12 = arith.constant 0 : index
    %21 = vector.load %arg2[%c2, %c0_11, %c0_12] : memref<3x4x16xbf16, #tpu.memory_space<vmem>>, vector<1x4x16xbf16>
    %22 = vector.shape_cast %21 : vector<1x4x16xbf16> to vector<4x16xbf16>
    %cst_13 = arith.constant dense<0.000000e+00> : vector<64x16xf32>
    %23 = tpu.matmul %2, %22, %cst_13 {dimension_numbers = #tpu.dot_dimension_numbers<[1], [0], [0], [1], [0, 0, 1, 1], [], []>} : vector<64x4xbf16>, vector<4x16xbf16>, vector<64x16xf32> -> vector<64x16xf32>
    %24 = tpu.iota {dimensions = array<i32: 0>} : vector<64x64xi32>
    %25 = tpu.iota {dimensions = array<i32: 1>} : vector<64x64xi32>
    %c1_i32_14 = arith.constant 1 : i32
    %26 = vector.broadcast %c1_i32_14 : i32 to vector<64x64xi32>
    %27 = arith.muli %24, %26 : vector<64x64xi32>
    %c1_i32_15 = arith.constant 1 : i32
    %28 = vector.broadcast %c1_i32_15 : i32 to vector<64x64xi32>
    %29 = arith.addi %27, %28 : vector<64x64xi32>
    %30 = arith.cmpi eq, %25, %29 : vector<64x64xi32>
    %cst_16 = arith.constant 1.000000e+00 : f32
    %cst_17 = arith.constant 0.000000e+00 : f32
    %31 = vector.broadcast %cst_16 : f32 to vector<64x64xf32>
    %32 = vector.broadcast %cst_17 : f32 to vector<64x64xf32>
    %33 = arith.select %30, %31, %32 : vector<64x64xi1>, vector<64x64xf32>
    %cst_18 = arith.constant dense<0.000000e+00> : vector<64x16xf32>
    %34 = tpu.matmul %33, %23, %cst_18 {dimension_numbers = #tpu.dot_dimension_numbers<[1], [0], [0], [1], [0, 0, 1, 1], [], []>} : vector<64x64xf32>, vector<64x16xf32>, vector<64x16xf32> -> vector<64x16xf32>
    %35 = arith.addf %20, %34 : vector<64x16xf32>
    %c0_19 = arith.constant 0 : index
    %c0_20 = arith.constant 0 : index
    %36 = vector.load %arg3[%c0_19, %c0_20] : memref<1x16xf32, #tpu.memory_space<vmem>>, vector<1x16xf32>
    %37 = vector.broadcast %36 : vector<1x16xf32> to vector<64x16xf32>
    %38 = arith.addf %35, %37 : vector<64x16xf32>
    %cst_21 = arith.constant 0.000000e+00 : f32
    %39 = vector.broadcast %cst_21 : f32 to vector<64x16xf32>
    %40 = arith.maximumf %38, %39 : vector<64x16xf32>
    %41 = arith.truncf %40 : vector<64x16xf32> to vector<64x16xbf16>
    %c0_22 = arith.constant 0 : index
    %c0_23 = arith.constant 0 : index
    %c0_24 = arith.constant 0 : index
    %42 = vector.load %arg4[%c0_22, %c0_23, %c0_24] : memref<3x16x16xbf16, #tpu.memory_space<vmem>>, vector<1x16x16xbf16>
    %43 = vector.shape_cast %42 : vector<1x16x16xbf16> to vector<16x16xbf16>
    %cst_25 = arith.constant dense<0.000000e+00> : vector<64x16xf32>
    %44 = tpu.matmul %41, %43, %cst_25 {dimension_numbers = #tpu.dot_dimension_numbers<[1], [0], [0], [1], [0, 0, 1, 1], [], []>} : vector<64x16xbf16>, vector<16x16xbf16>, vector<64x16xf32> -> vector<64x16xf32>
    %45 = tpu.iota {dimensions = array<i32: 0>} : vector<64x64xi32>
    %46 = tpu.iota {dimensions = array<i32: 1>} : vector<64x64xi32>
    %c1_i32_26 = arith.constant 1 : i32
    %47 = vector.broadcast %c1_i32_26 : i32 to vector<64x64xi32>
    %48 = arith.muli %45, %47 : vector<64x64xi32>
    %c-1_i32_27 = arith.constant -1 : i32
    %49 = vector.broadcast %c-1_i32_27 : i32 to vector<64x64xi32>
    %50 = arith.addi %48, %49 : vector<64x64xi32>
    %51 = arith.cmpi eq, %46, %50 : vector<64x64xi32>
    %cst_28 = arith.constant 1.000000e+00 : f32
    %cst_29 = arith.constant 0.000000e+00 : f32
    %52 = vector.broadcast %cst_28 : f32 to vector<64x64xf32>
    %53 = vector.broadcast %cst_29 : f32 to vector<64x64xf32>
    %54 = arith.select %51, %52, %53 : vector<64x64xi1>, vector<64x64xf32>
    %cst_30 = arith.constant dense<0.000000e+00> : vector<64x16xf32>
    %55 = tpu.matmul %54, %44, %cst_30 {dimension_numbers = #tpu.dot_dimension_numbers<[1], [0], [0], [1], [0, 0, 1, 1], [], []>} : vector<64x64xf32>, vector<64x16xf32>, vector<64x16xf32> -> vector<64x16xf32>
    %c1_31 = arith.constant 1 : index
    %c0_32 = arith.constant 0 : index
    %c0_33 = arith.constant 0 : index
    %56 = vector.load %arg4[%c1_31, %c0_32, %c0_33] : memref<3x16x16xbf16, #tpu.memory_space<vmem>>, vector<1x16x16xbf16>
    %57 = vector.shape_cast %56 : vector<1x16x16xbf16> to vector<16x16xbf16>
    %cst_34 = arith.constant dense<0.000000e+00> : vector<64x16xf32>
    %58 = tpu.matmul %41, %57, %cst_34 {dimension_numbers = #tpu.dot_dimension_numbers<[1], [0], [0], [1], [0, 0, 1, 1], [], []>} : vector<64x16xbf16>, vector<16x16xbf16>, vector<64x16xf32> -> vector<64x16xf32>
    %59 = arith.addf %55, %58 : vector<64x16xf32>
    %c2_35 = arith.constant 2 : index
    %c0_36 = arith.constant 0 : index
    %c0_37 = arith.constant 0 : index
    %60 = vector.load %arg4[%c2_35, %c0_36, %c0_37] : memref<3x16x16xbf16, #tpu.memory_space<vmem>>, vector<1x16x16xbf16>
    %61 = vector.shape_cast %60 : vector<1x16x16xbf16> to vector<16x16xbf16>
    %cst_38 = arith.constant dense<0.000000e+00> : vector<64x16xf32>
    %62 = tpu.matmul %41, %61, %cst_38 {dimension_numbers = #tpu.dot_dimension_numbers<[1], [0], [0], [1], [0, 0, 1, 1], [], []>} : vector<64x16xbf16>, vector<16x16xbf16>, vector<64x16xf32> -> vector<64x16xf32>
    %63 = tpu.iota {dimensions = array<i32: 0>} : vector<64x64xi32>
    %64 = tpu.iota {dimensions = array<i32: 1>} : vector<64x64xi32>
    %c1_i32_39 = arith.constant 1 : i32
    %65 = vector.broadcast %c1_i32_39 : i32 to vector<64x64xi32>
    %66 = arith.muli %63, %65 : vector<64x64xi32>
    %c1_i32_40 = arith.constant 1 : i32
    %67 = vector.broadcast %c1_i32_40 : i32 to vector<64x64xi32>
    %68 = arith.addi %66, %67 : vector<64x64xi32>
    %69 = arith.cmpi eq, %64, %68 : vector<64x64xi32>
    %cst_41 = arith.constant 1.000000e+00 : f32
    %cst_42 = arith.constant 0.000000e+00 : f32
    %70 = vector.broadcast %cst_41 : f32 to vector<64x64xf32>
    %71 = vector.broadcast %cst_42 : f32 to vector<64x64xf32>
    %72 = arith.select %69, %70, %71 : vector<64x64xi1>, vector<64x64xf32>
    %cst_43 = arith.constant dense<0.000000e+00> : vector<64x16xf32>
    %73 = tpu.matmul %72, %62, %cst_43 {dimension_numbers = #tpu.dot_dimension_numbers<[1], [0], [0], [1], [0, 0, 1, 1], [], []>} : vector<64x64xf32>, vector<64x16xf32>, vector<64x16xf32> -> vector<64x16xf32>
    %74 = arith.addf %59, %73 : vector<64x16xf32>
    %c0_44 = arith.constant 0 : index
    %c0_45 = arith.constant 0 : index
    %75 = vector.load %arg5[%c0_44, %c0_45] : memref<1x16xf32, #tpu.memory_space<vmem>>, vector<1x16xf32>
    %76 = vector.broadcast %75 : vector<1x16xf32> to vector<64x16xf32>
    %77 = arith.addf %74, %76 : vector<64x16xf32>
    %cst_46 = arith.constant 0.000000e+00 : f32
    %78 = vector.broadcast %cst_46 : f32 to vector<64x16xf32>
    %79 = arith.maximumf %77, %78 : vector<64x16xf32>
    %80 = arith.truncf %79 : vector<64x16xf32> to vector<64x16xbf16>
    %c0_47 = arith.constant 0 : index
    %c0_48 = arith.constant 0 : index
    %c0_49 = arith.constant 0 : index
    %81 = vector.load %arg6[%c0_47, %c0_48, %c0_49] : memref<3x16x16xbf16, #tpu.memory_space<vmem>>, vector<1x16x16xbf16>
    %82 = vector.shape_cast %81 : vector<1x16x16xbf16> to vector<16x16xbf16>
    %cst_50 = arith.constant dense<0.000000e+00> : vector<64x16xf32>
    %83 = tpu.matmul %80, %82, %cst_50 {dimension_numbers = #tpu.dot_dimension_numbers<[1], [0], [0], [1], [0, 0, 1, 1], [], []>} : vector<64x16xbf16>, vector<16x16xbf16>, vector<64x16xf32> -> vector<64x16xf32>
    %84 = tpu.iota {dimensions = array<i32: 0>} : vector<64x64xi32>
    %85 = tpu.iota {dimensions = array<i32: 1>} : vector<64x64xi32>
    %c1_i32_51 = arith.constant 1 : i32
    %86 = vector.broadcast %c1_i32_51 : i32 to vector<64x64xi32>
    %87 = arith.muli %84, %86 : vector<64x64xi32>
    %c-1_i32_52 = arith.constant -1 : i32
    %88 = vector.broadcast %c-1_i32_52 : i32 to vector<64x64xi32>
    %89 = arith.addi %87, %88 : vector<64x64xi32>
    %90 = arith.cmpi eq, %85, %89 : vector<64x64xi32>
    %cst_53 = arith.constant 1.000000e+00 : f32
    %cst_54 = arith.constant 0.000000e+00 : f32
    %91 = vector.broadcast %cst_53 : f32 to vector<64x64xf32>
    %92 = vector.broadcast %cst_54 : f32 to vector<64x64xf32>
    %93 = arith.select %90, %91, %92 : vector<64x64xi1>, vector<64x64xf32>
    %cst_55 = arith.constant dense<0.000000e+00> : vector<64x16xf32>
    %94 = tpu.matmul %93, %83, %cst_55 {dimension_numbers = #tpu.dot_dimension_numbers<[1], [0], [0], [1], [0, 0, 1, 1], [], []>} : vector<64x64xf32>, vector<64x16xf32>, vector<64x16xf32> -> vector<64x16xf32>
    %c1_56 = arith.constant 1 : index
    %c0_57 = arith.constant 0 : index
    %c0_58 = arith.constant 0 : index
    %95 = vector.load %arg6[%c1_56, %c0_57, %c0_58] : memref<3x16x16xbf16, #tpu.memory_space<vmem>>, vector<1x16x16xbf16>
    %96 = vector.shape_cast %95 : vector<1x16x16xbf16> to vector<16x16xbf16>
    %cst_59 = arith.constant dense<0.000000e+00> : vector<64x16xf32>
    %97 = tpu.matmul %80, %96, %cst_59 {dimension_numbers = #tpu.dot_dimension_numbers<[1], [0], [0], [1], [0, 0, 1, 1], [], []>} : vector<64x16xbf16>, vector<16x16xbf16>, vector<64x16xf32> -> vector<64x16xf32>
    %98 = arith.addf %94, %97 : vector<64x16xf32>
    %c2_60 = arith.constant 2 : index
    %c0_61 = arith.constant 0 : index
    %c0_62 = arith.constant 0 : index
    %99 = vector.load %arg6[%c2_60, %c0_61, %c0_62] : memref<3x16x16xbf16, #tpu.memory_space<vmem>>, vector<1x16x16xbf16>
    %100 = vector.shape_cast %99 : vector<1x16x16xbf16> to vector<16x16xbf16>
    %cst_63 = arith.constant dense<0.000000e+00> : vector<64x16xf32>
    %101 = tpu.matmul %80, %100, %cst_63 {dimension_numbers = #tpu.dot_dimension_numbers<[1], [0], [0], [1], [0, 0, 1, 1], [], []>} : vector<64x16xbf16>, vector<16x16xbf16>, vector<64x16xf32> -> vector<64x16xf32>
    %102 = tpu.iota {dimensions = array<i32: 0>} : vector<64x64xi32>
    %103 = tpu.iota {dimensions = array<i32: 1>} : vector<64x64xi32>
    %c1_i32_64 = arith.constant 1 : i32
    %104 = vector.broadcast %c1_i32_64 : i32 to vector<64x64xi32>
    %105 = arith.muli %102, %104 : vector<64x64xi32>
    %c1_i32_65 = arith.constant 1 : i32
    %106 = vector.broadcast %c1_i32_65 : i32 to vector<64x64xi32>
    %107 = arith.addi %105, %106 : vector<64x64xi32>
    %108 = arith.cmpi eq, %103, %107 : vector<64x64xi32>
    %cst_66 = arith.constant 1.000000e+00 : f32
    %cst_67 = arith.constant 0.000000e+00 : f32
    %109 = vector.broadcast %cst_66 : f32 to vector<64x64xf32>
    %110 = vector.broadcast %cst_67 : f32 to vector<64x64xf32>
    %111 = arith.select %108, %109, %110 : vector<64x64xi1>, vector<64x64xf32>
    %cst_68 = arith.constant dense<0.000000e+00> : vector<64x16xf32>
    %112 = tpu.matmul %111, %101, %cst_68 {dimension_numbers = #tpu.dot_dimension_numbers<[1], [0], [0], [1], [0, 0, 1, 1], [], []>} : vector<64x64xf32>, vector<64x16xf32>, vector<64x16xf32> -> vector<64x16xf32>
    %113 = arith.addf %98, %112 : vector<64x16xf32>
    %c0_69 = arith.constant 0 : index
    %c0_70 = arith.constant 0 : index
    %114 = vector.load %arg7[%c0_69, %c0_70] : memref<1x16xf32, #tpu.memory_space<vmem>>, vector<1x16xf32>
    %115 = vector.broadcast %114 : vector<1x16xf32> to vector<64x16xf32>
    %116 = arith.addf %113, %115 : vector<64x16xf32>
    %117 = arith.addf %116, %40 : vector<64x16xf32>
    %c0_71 = arith.constant 0 : index
    %c0_72 = arith.constant 0 : index
    %118 = vector.load %arg8[%c0_71, %c0_72] : memref<1x16xf32, #tpu.memory_space<vmem>>, vector<1x16xf32>
    %119 = vector.broadcast %118 : vector<1x16xf32> to vector<64x16xf32>
    %120 = arith.mulf %117, %119 : vector<64x16xf32>
    %c0_73 = arith.constant 0 : index
    %c0_74 = arith.constant 0 : index
    %121 = vector.load %arg9[%c0_73, %c0_74] : memref<1x16xf32, #tpu.memory_space<vmem>>, vector<1x16xf32>
    %122 = vector.broadcast %121 : vector<1x16xf32> to vector<64x16xf32>
    %123 = arith.addf %120, %122 : vector<64x16xf32>
    %cst_75 = arith.constant 0.000000e+00 : f32
    %124 = vector.broadcast %cst_75 : f32 to vector<64x16xf32>
    %125 = arith.maximumf %123, %124 : vector<64x16xf32>
    %126 = arith.truncf %125 : vector<64x16xf32> to vector<64x16xbf16>
    %c0_76 = arith.constant 0 : index
    %c0_77 = arith.constant 0 : index
    %c0_78 = arith.constant 0 : index
    %127 = vector.load %arg10[%c0_76, %c0_77, %c0_78] : memref<3x16x16xbf16, #tpu.memory_space<vmem>>, vector<1x16x16xbf16>
    %128 = vector.shape_cast %127 : vector<1x16x16xbf16> to vector<16x16xbf16>
    %cst_79 = arith.constant dense<0.000000e+00> : vector<64x16xf32>
    %129 = tpu.matmul %126, %128, %cst_79 {dimension_numbers = #tpu.dot_dimension_numbers<[1], [0], [0], [1], [0, 0, 1, 1], [], []>} : vector<64x16xbf16>, vector<16x16xbf16>, vector<64x16xf32> -> vector<64x16xf32>
    %130 = tpu.iota {dimensions = array<i32: 0>} : vector<32x64xi32>
    %131 = tpu.iota {dimensions = array<i32: 1>} : vector<32x64xi32>
    %c2_i32 = arith.constant 2 : i32
    %132 = vector.broadcast %c2_i32 : i32 to vector<32x64xi32>
    %133 = arith.muli %130, %132 : vector<32x64xi32>
    %c0_i32 = arith.constant 0 : i32
    %134 = vector.broadcast %c0_i32 : i32 to vector<32x64xi32>
    %135 = arith.addi %133, %134 : vector<32x64xi32>
    %136 = arith.cmpi eq, %131, %135 : vector<32x64xi32>
    %cst_80 = arith.constant 1.000000e+00 : f32
    %cst_81 = arith.constant 0.000000e+00 : f32
    %137 = vector.broadcast %cst_80 : f32 to vector<32x64xf32>
    %138 = vector.broadcast %cst_81 : f32 to vector<32x64xf32>
    %139 = arith.select %136, %137, %138 : vector<32x64xi1>, vector<32x64xf32>
    %cst_82 = arith.constant dense<0.000000e+00> : vector<32x16xf32>
    %140 = tpu.matmul %139, %129, %cst_82 {dimension_numbers = #tpu.dot_dimension_numbers<[1], [0], [0], [1], [0, 0, 1, 1], [], []>} : vector<32x64xf32>, vector<64x16xf32>, vector<32x16xf32> -> vector<32x16xf32>
    %c1_83 = arith.constant 1 : index
    %c0_84 = arith.constant 0 : index
    %c0_85 = arith.constant 0 : index
    %141 = vector.load %arg10[%c1_83, %c0_84, %c0_85] : memref<3x16x16xbf16, #tpu.memory_space<vmem>>, vector<1x16x16xbf16>
    %142 = vector.shape_cast %141 : vector<1x16x16xbf16> to vector<16x16xbf16>
    %cst_86 = arith.constant dense<0.000000e+00> : vector<64x16xf32>
    %143 = tpu.matmul %126, %142, %cst_86 {dimension_numbers = #tpu.dot_dimension_numbers<[1], [0], [0], [1], [0, 0, 1, 1], [], []>} : vector<64x16xbf16>, vector<16x16xbf16>, vector<64x16xf32> -> vector<64x16xf32>
    %144 = tpu.iota {dimensions = array<i32: 0>} : vector<32x64xi32>
    %145 = tpu.iota {dimensions = array<i32: 1>} : vector<32x64xi32>
    %c2_i32_87 = arith.constant 2 : i32
    %146 = vector.broadcast %c2_i32_87 : i32 to vector<32x64xi32>
    %147 = arith.muli %144, %146 : vector<32x64xi32>
    %c1_i32_88 = arith.constant 1 : i32
    %148 = vector.broadcast %c1_i32_88 : i32 to vector<32x64xi32>
    %149 = arith.addi %147, %148 : vector<32x64xi32>
    %150 = arith.cmpi eq, %145, %149 : vector<32x64xi32>
    %cst_89 = arith.constant 1.000000e+00 : f32
    %cst_90 = arith.constant 0.000000e+00 : f32
    %151 = vector.broadcast %cst_89 : f32 to vector<32x64xf32>
    %152 = vector.broadcast %cst_90 : f32 to vector<32x64xf32>
    %153 = arith.select %150, %151, %152 : vector<32x64xi1>, vector<32x64xf32>
    %cst_91 = arith.constant dense<0.000000e+00> : vector<32x16xf32>
    %154 = tpu.matmul %153, %143, %cst_91 {dimension_numbers = #tpu.dot_dimension_numbers<[1], [0], [0], [1], [0, 0, 1, 1], [], []>} : vector<32x64xf32>, vector<64x16xf32>, vector<32x16xf32> -> vector<32x16xf32>
    %155 = arith.addf %140, %154 : vector<32x16xf32>
    %c2_92 = arith.constant 2 : index
    %c0_93 = arith.constant 0 : index
    %c0_94 = arith.constant 0 : index
    %156 = vector.load %arg10[%c2_92, %c0_93, %c0_94] : memref<3x16x16xbf16, #tpu.memory_space<vmem>>, vector<1x16x16xbf16>
    %157 = vector.shape_cast %156 : vector<1x16x16xbf16> to vector<16x16xbf16>
    %cst_95 = arith.constant dense<0.000000e+00> : vector<64x16xf32>
    %158 = tpu.matmul %126, %157, %cst_95 {dimension_numbers = #tpu.dot_dimension_numbers<[1], [0], [0], [1], [0, 0, 1, 1], [], []>} : vector<64x16xbf16>, vector<16x16xbf16>, vector<64x16xf32> -> vector<64x16xf32>
    %159 = tpu.iota {dimensions = array<i32: 0>} : vector<32x64xi32>
    %160 = tpu.iota {dimensions = array<i32: 1>} : vector<32x64xi32>
    %c2_i32_96 = arith.constant 2 : i32
    %161 = vector.broadcast %c2_i32_96 : i32 to vector<32x64xi32>
    %162 = arith.muli %159, %161 : vector<32x64xi32>
    %c2_i32_97 = arith.constant 2 : i32
    %163 = vector.broadcast %c2_i32_97 : i32 to vector<32x64xi32>
    %164 = arith.addi %162, %163 : vector<32x64xi32>
    %165 = arith.cmpi eq, %160, %164 : vector<32x64xi32>
    %cst_98 = arith.constant 1.000000e+00 : f32
    %cst_99 = arith.constant 0.000000e+00 : f32
    %166 = vector.broadcast %cst_98 : f32 to vector<32x64xf32>
    %167 = vector.broadcast %cst_99 : f32 to vector<32x64xf32>
    %168 = arith.select %165, %166, %167 : vector<32x64xi1>, vector<32x64xf32>
    %cst_100 = arith.constant dense<0.000000e+00> : vector<32x16xf32>
    %169 = tpu.matmul %168, %158, %cst_100 {dimension_numbers = #tpu.dot_dimension_numbers<[1], [0], [0], [1], [0, 0, 1, 1], [], []>} : vector<32x64xf32>, vector<64x16xf32>, vector<32x16xf32> -> vector<32x16xf32>
    %170 = arith.addf %155, %169 : vector<32x16xf32>
    %c0_101 = arith.constant 0 : index
    %c0_102 = arith.constant 0 : index
    %171 = vector.load %arg11[%c0_101, %c0_102] : memref<1x16xf32, #tpu.memory_space<vmem>>, vector<1x16xf32>
    %172 = vector.broadcast %171 : vector<1x16xf32> to vector<32x16xf32>
    %173 = arith.addf %170, %172 : vector<32x16xf32>
    %cst_103 = arith.constant 0.000000e+00 : f32
    %174 = vector.broadcast %cst_103 : f32 to vector<32x16xf32>
    %175 = arith.maximumf %173, %174 : vector<32x16xf32>
    %176 = tpu.iota {dimensions = array<i32: 0>} : vector<32x64xi32>
    %177 = tpu.iota {dimensions = array<i32: 1>} : vector<32x64xi32>
    %c2_i32_104 = arith.constant 2 : i32
    %178 = vector.broadcast %c2_i32_104 : i32 to vector<32x64xi32>
    %179 = arith.muli %176, %178 : vector<32x64xi32>
    %c0_i32_105 = arith.constant 0 : i32
    %180 = vector.broadcast %c0_i32_105 : i32 to vector<32x64xi32>
    %181 = arith.addi %179, %180 : vector<32x64xi32>
    %182 = arith.cmpi eq, %177, %181 : vector<32x64xi32>
    %cst_106 = arith.constant 1.000000e+00 : f32
    %cst_107 = arith.constant 0.000000e+00 : f32
    %183 = vector.broadcast %cst_106 : f32 to vector<32x64xf32>
    %184 = vector.broadcast %cst_107 : f32 to vector<32x64xf32>
    %185 = arith.select %182, %183, %184 : vector<32x64xi1>, vector<32x64xf32>
    %cst_108 = arith.constant dense<0.000000e+00> : vector<32x16xf32>
    %186 = tpu.matmul %185, %117, %cst_108 {dimension_numbers = #tpu.dot_dimension_numbers<[1], [0], [0], [1], [0, 0, 1, 1], [], []>} : vector<32x64xf32>, vector<64x16xf32>, vector<32x16xf32> -> vector<32x16xf32>
    %187 = tpu.iota {dimensions = array<i32: 0>} : vector<32x64xi32>
    %188 = tpu.iota {dimensions = array<i32: 1>} : vector<32x64xi32>
    %c2_i32_109 = arith.constant 2 : i32
    %189 = vector.broadcast %c2_i32_109 : i32 to vector<32x64xi32>
    %190 = arith.muli %187, %189 : vector<32x64xi32>
    %c1_i32_110 = arith.constant 1 : i32
    %191 = vector.broadcast %c1_i32_110 : i32 to vector<32x64xi32>
    %192 = arith.addi %190, %191 : vector<32x64xi32>
    %193 = arith.cmpi eq, %188, %192 : vector<32x64xi32>
    %cst_111 = arith.constant 1.000000e+00 : f32
    %cst_112 = arith.constant 0.000000e+00 : f32
    %194 = vector.broadcast %cst_111 : f32 to vector<32x64xf32>
    %195 = vector.broadcast %cst_112 : f32 to vector<32x64xf32>
    %196 = arith.select %193, %194, %195 : vector<32x64xi1>, vector<32x64xf32>
    %cst_113 = arith.constant dense<0.000000e+00> : vector<32x16xf32>
    %197 = tpu.matmul %196, %117, %cst_113 {dimension_numbers = #tpu.dot_dimension_numbers<[1], [0], [0], [1], [0, 0, 1, 1], [], []>} : vector<32x64xf32>, vector<64x16xf32>, vector<32x16xf32> -> vector<32x16xf32>
    %198 = arith.maximumf %186, %197 : vector<32x16xf32>
    %199 = arith.truncf %175 : vector<32x16xf32> to vector<32x16xbf16>
    %c0_114 = arith.constant 0 : index
    %c0_115 = arith.constant 0 : index
    %c0_116 = arith.constant 0 : index
    %200 = vector.load %arg12[%c0_114, %c0_115, %c0_116] : memref<3x16x16xbf16, #tpu.memory_space<vmem>>, vector<1x16x16xbf16>
    %201 = vector.shape_cast %200 : vector<1x16x16xbf16> to vector<16x16xbf16>
    %cst_117 = arith.constant dense<0.000000e+00> : vector<32x16xf32>
    %202 = tpu.matmul %199, %201, %cst_117 {dimension_numbers = #tpu.dot_dimension_numbers<[1], [0], [0], [1], [0, 0, 1, 1], [], []>} : vector<32x16xbf16>, vector<16x16xbf16>, vector<32x16xf32> -> vector<32x16xf32>
    %203 = tpu.iota {dimensions = array<i32: 0>} : vector<32x32xi32>
    %204 = tpu.iota {dimensions = array<i32: 1>} : vector<32x32xi32>
    %c1_i32_118 = arith.constant 1 : i32
    %205 = vector.broadcast %c1_i32_118 : i32 to vector<32x32xi32>
    %206 = arith.muli %203, %205 : vector<32x32xi32>
    %c-1_i32_119 = arith.constant -1 : i32
    %207 = vector.broadcast %c-1_i32_119 : i32 to vector<32x32xi32>
    %208 = arith.addi %206, %207 : vector<32x32xi32>
    %209 = arith.cmpi eq, %204, %208 : vector<32x32xi32>
    %cst_120 = arith.constant 1.000000e+00 : f32
    %cst_121 = arith.constant 0.000000e+00 : f32
    %210 = vector.broadcast %cst_120 : f32 to vector<32x32xf32>
    %211 = vector.broadcast %cst_121 : f32 to vector<32x32xf32>
    %212 = arith.select %209, %210, %211 : vector<32x32xi1>, vector<32x32xf32>
    %cst_122 = arith.constant dense<0.000000e+00> : vector<32x16xf32>
    %213 = tpu.matmul %212, %202, %cst_122 {dimension_numbers = #tpu.dot_dimension_numbers<[1], [0], [0], [1], [0, 0, 1, 1], [], []>} : vector<32x32xf32>, vector<32x16xf32>, vector<32x16xf32> -> vector<32x16xf32>
    %c1_123 = arith.constant 1 : index
    %c0_124 = arith.constant 0 : index
    %c0_125 = arith.constant 0 : index
    %214 = vector.load %arg12[%c1_123, %c0_124, %c0_125] : memref<3x16x16xbf16, #tpu.memory_space<vmem>>, vector<1x16x16xbf16>
    %215 = vector.shape_cast %214 : vector<1x16x16xbf16> to vector<16x16xbf16>
    %cst_126 = arith.constant dense<0.000000e+00> : vector<32x16xf32>
    %216 = tpu.matmul %199, %215, %cst_126 {dimension_numbers = #tpu.dot_dimension_numbers<[1], [0], [0], [1], [0, 0, 1, 1], [], []>} : vector<32x16xbf16>, vector<16x16xbf16>, vector<32x16xf32> -> vector<32x16xf32>
    %217 = arith.addf %213, %216 : vector<32x16xf32>
    %c2_127 = arith.constant 2 : index
    %c0_128 = arith.constant 0 : index
    %c0_129 = arith.constant 0 : index
    %218 = vector.load %arg12[%c2_127, %c0_128, %c0_129] : memref<3x16x16xbf16, #tpu.memory_space<vmem>>, vector<1x16x16xbf16>
    %219 = vector.shape_cast %218 : vector<1x16x16xbf16> to vector<16x16xbf16>
    %cst_130 = arith.constant dense<0.000000e+00> : vector<32x16xf32>
    %220 = tpu.matmul %199, %219, %cst_130 {dimension_numbers = #tpu.dot_dimension_numbers<[1], [0], [0], [1], [0, 0, 1, 1], [], []>} : vector<32x16xbf16>, vector<16x16xbf16>, vector<32x16xf32> -> vector<32x16xf32>
    %221 = tpu.iota {dimensions = array<i32: 0>} : vector<32x32xi32>
    %222 = tpu.iota {dimensions = array<i32: 1>} : vector<32x32xi32>
    %c1_i32_131 = arith.constant 1 : i32
    %223 = vector.broadcast %c1_i32_131 : i32 to vector<32x32xi32>
    %224 = arith.muli %221, %223 : vector<32x32xi32>
    %c1_i32_132 = arith.constant 1 : i32
    %225 = vector.broadcast %c1_i32_132 : i32 to vector<32x32xi32>
    %226 = arith.addi %224, %225 : vector<32x32xi32>
    %227 = arith.cmpi eq, %222, %226 : vector<32x32xi32>
    %cst_133 = arith.constant 1.000000e+00 : f32
    %cst_134 = arith.constant 0.000000e+00 : f32
    %228 = vector.broadcast %cst_133 : f32 to vector<32x32xf32>
    %229 = vector.broadcast %cst_134 : f32 to vector<32x32xf32>
    %230 = arith.select %227, %228, %229 : vector<32x32xi1>, vector<32x32xf32>
    %cst_135 = arith.constant dense<0.000000e+00> : vector<32x16xf32>
    %231 = tpu.matmul %230, %220, %cst_135 {dimension_numbers = #tpu.dot_dimension_numbers<[1], [0], [0], [1], [0, 0, 1, 1], [], []>} : vector<32x32xf32>, vector<32x16xf32>, vector<32x16xf32> -> vector<32x16xf32>
    %232 = arith.addf %217, %231 : vector<32x16xf32>
    %c0_136 = arith.constant 0 : index
    %c0_137 = arith.constant 0 : index
    %233 = vector.load %arg13[%c0_136, %c0_137] : memref<1x16xf32, #tpu.memory_space<vmem>>, vector<1x16xf32>
    %234 = vector.broadcast %233 : vector<1x16xf32> to vector<32x16xf32>
    %235 = arith.addf %232, %234 : vector<32x16xf32>
    %236 = arith.addf %235, %198 : vector<32x16xf32>
    %c0_138 = arith.constant 0 : index
    %c0_139 = arith.constant 0 : index
    %237 = vector.load %arg14[%c0_138, %c0_139] : memref<1x16xf32, #tpu.memory_space<vmem>>, vector<1x16xf32>
    %238 = vector.broadcast %237 : vector<1x16xf32> to vector<32x16xf32>
    %239 = arith.mulf %236, %238 : vector<32x16xf32>
    %c0_140 = arith.constant 0 : index
    %c0_141 = arith.constant 0 : index
    %240 = vector.load %arg15[%c0_140, %c0_141] : memref<1x16xf32, #tpu.memory_space<vmem>>, vector<1x16xf32>
    %241 = vector.broadcast %240 : vector<1x16xf32> to vector<32x16xf32>
    %242 = arith.addf %239, %241 : vector<32x16xf32>
    %cst_142 = arith.constant 0.000000e+00 : f32
    %243 = vector.broadcast %cst_142 : f32 to vector<32x16xf32>
    %244 = arith.maximumf %242, %243 : vector<32x16xf32>
    %245 = arith.truncf %244 : vector<32x16xf32> to vector<32x16xbf16>
    %c0_143 = arith.constant 0 : index
    %c0_144 = arith.constant 0 : index
    %c0_145 = arith.constant 0 : index
    %246 = vector.load %arg16[%c0_143, %c0_144, %c0_145] : memref<3x16x16xbf16, #tpu.memory_space<vmem>>, vector<1x16x16xbf16>
    %247 = vector.shape_cast %246 : vector<1x16x16xbf16> to vector<16x16xbf16>
    %cst_146 = arith.constant dense<0.000000e+00> : vector<32x16xf32>
    %248 = tpu.matmul %245, %247, %cst_146 {dimension_numbers = #tpu.dot_dimension_numbers<[1], [0], [0], [1], [0, 0, 1, 1], [], []>} : vector<32x16xbf16>, vector<16x16xbf16>, vector<32x16xf32> -> vector<32x16xf32>
    %249 = tpu.iota {dimensions = array<i32: 0>} : vector<32x32xi32>
    %250 = tpu.iota {dimensions = array<i32: 1>} : vector<32x32xi32>
    %c1_i32_147 = arith.constant 1 : i32
    %251 = vector.broadcast %c1_i32_147 : i32 to vector<32x32xi32>
    %252 = arith.muli %249, %251 : vector<32x32xi32>
    %c-1_i32_148 = arith.constant -1 : i32
    %253 = vector.broadcast %c-1_i32_148 : i32 to vector<32x32xi32>
    %254 = arith.addi %252, %253 : vector<32x32xi32>
    %255 = arith.cmpi eq, %250, %254 : vector<32x32xi32>
    %cst_149 = arith.constant 1.000000e+00 : f32
    %cst_150 = arith.constant 0.000000e+00 : f32
    %256 = vector.broadcast %cst_149 : f32 to vector<32x32xf32>
    %257 = vector.broadcast %cst_150 : f32 to vector<32x32xf32>
    %258 = arith.select %255, %256, %257 : vector<32x32xi1>, vector<32x32xf32>
    %cst_151 = arith.constant dense<0.000000e+00> : vector<32x16xf32>
    %259 = tpu.matmul %258, %248, %cst_151 {dimension_numbers = #tpu.dot_dimension_numbers<[1], [0], [0], [1], [0, 0, 1, 1], [], []>} : vector<32x32xf32>, vector<32x16xf32>, vector<32x16xf32> -> vector<32x16xf32>
    %c1_152 = arith.constant 1 : index
    %c0_153 = arith.constant 0 : index
    %c0_154 = arith.constant 0 : index
    %260 = vector.load %arg16[%c1_152, %c0_153, %c0_154] : memref<3x16x16xbf16, #tpu.memory_space<vmem>>, vector<1x16x16xbf16>
    %261 = vector.shape_cast %260 : vector<1x16x16xbf16> to vector<16x16xbf16>
    %cst_155 = arith.constant dense<0.000000e+00> : vector<32x16xf32>
    %262 = tpu.matmul %245, %261, %cst_155 {dimension_numbers = #tpu.dot_dimension_numbers<[1], [0], [0], [1], [0, 0, 1, 1], [], []>} : vector<32x16xbf16>, vector<16x16xbf16>, vector<32x16xf32> -> vector<32x16xf32>
    %263 = arith.addf %259, %262 : vector<32x16xf32>
    %c2_156 = arith.constant 2 : index
    %c0_157 = arith.constant 0 : index
    %c0_158 = arith.constant 0 : index
    %264 = vector.load %arg16[%c2_156, %c0_157, %c0_158] : memref<3x16x16xbf16, #tpu.memory_space<vmem>>, vector<1x16x16xbf16>
    %265 = vector.shape_cast %264 : vector<1x16x16xbf16> to vector<16x16xbf16>
    %cst_159 = arith.constant dense<0.000000e+00> : vector<32x16xf32>
    %266 = tpu.matmul %245, %265, %cst_159 {dimension_numbers = #tpu.dot_dimension_numbers<[1], [0], [0], [1], [0, 0, 1, 1], [], []>} : vector<32x16xbf16>, vector<16x16xbf16>, vector<32x16xf32> -> vector<32x16xf32>
    %267 = tpu.iota {dimensions = array<i32: 0>} : vector<32x32xi32>
    %268 = tpu.iota {dimensions = array<i32: 1>} : vector<32x32xi32>
    %c1_i32_160 = arith.constant 1 : i32
    %269 = vector.broadcast %c1_i32_160 : i32 to vector<32x32xi32>
    %270 = arith.muli %267, %269 : vector<32x32xi32>
    %c1_i32_161 = arith.constant 1 : i32
    %271 = vector.broadcast %c1_i32_161 : i32 to vector<32x32xi32>
    %272 = arith.addi %270, %271 : vector<32x32xi32>
    %273 = arith.cmpi eq, %268, %272 : vector<32x32xi32>
    %cst_162 = arith.constant 1.000000e+00 : f32
    %cst_163 = arith.constant 0.000000e+00 : f32
    %274 = vector.broadcast %cst_162 : f32 to vector<32x32xf32>
    %275 = vector.broadcast %cst_163 : f32 to vector<32x32xf32>
    %276 = arith.select %273, %274, %275 : vector<32x32xi1>, vector<32x32xf32>
    %cst_164 = arith.constant dense<0.000000e+00> : vector<32x16xf32>
    %277 = tpu.matmul %276, %266, %cst_164 {dimension_numbers = #tpu.dot_dimension_numbers<[1], [0], [0], [1], [0, 0, 1, 1], [], []>} : vector<32x32xf32>, vector<32x16xf32>, vector<32x16xf32> -> vector<32x16xf32>
    %278 = arith.addf %263, %277 : vector<32x16xf32>
    %c0_165 = arith.constant 0 : index
    %c0_166 = arith.constant 0 : index
    %279 = vector.load %arg17[%c0_165, %c0_166] : memref<1x16xf32, #tpu.memory_space<vmem>>, vector<1x16xf32>
    %280 = vector.broadcast %279 : vector<1x16xf32> to vector<32x16xf32>
    %281 = arith.addf %278, %280 : vector<32x16xf32>
    %cst_167 = arith.constant 0.000000e+00 : f32
    %282 = vector.broadcast %cst_167 : f32 to vector<32x16xf32>
    %283 = arith.maximumf %281, %282 : vector<32x16xf32>
    %284 = arith.truncf %283 : vector<32x16xf32> to vector<32x16xbf16>
    %c0_168 = arith.constant 0 : index
    %c0_169 = arith.constant 0 : index
    %c0_170 = arith.constant 0 : index
    %285 = vector.load %arg18[%c0_168, %c0_169, %c0_170] : memref<3x16x16xbf16, #tpu.memory_space<vmem>>, vector<1x16x16xbf16>
    %286 = vector.shape_cast %285 : vector<1x16x16xbf16> to vector<16x16xbf16>
    %cst_171 = arith.constant dense<0.000000e+00> : vector<32x16xf32>
    %287 = tpu.matmul %284, %286, %cst_171 {dimension_numbers = #tpu.dot_dimension_numbers<[1], [0], [0], [1], [0, 0, 1, 1], [], []>} : vector<32x16xbf16>, vector<16x16xbf16>, vector<32x16xf32> -> vector<32x16xf32>
    %288 = tpu.iota {dimensions = array<i32: 0>} : vector<32x32xi32>
    %289 = tpu.iota {dimensions = array<i32: 1>} : vector<32x32xi32>
    %c1_i32_172 = arith.constant 1 : i32
    %290 = vector.broadcast %c1_i32_172 : i32 to vector<32x32xi32>
    %291 = arith.muli %288, %290 : vector<32x32xi32>
    %c-1_i32_173 = arith.constant -1 : i32
    %292 = vector.broadcast %c-1_i32_173 : i32 to vector<32x32xi32>
    %293 = arith.addi %291, %292 : vector<32x32xi32>
    %294 = arith.cmpi eq, %289, %293 : vector<32x32xi32>
    %cst_174 = arith.constant 1.000000e+00 : f32
    %cst_175 = arith.constant 0.000000e+00 : f32
    %295 = vector.broadcast %cst_174 : f32 to vector<32x32xf32>
    %296 = vector.broadcast %cst_175 : f32 to vector<32x32xf32>
    %297 = arith.select %294, %295, %296 : vector<32x32xi1>, vector<32x32xf32>
    %cst_176 = arith.constant dense<0.000000e+00> : vector<32x16xf32>
    %298 = tpu.matmul %297, %287, %cst_176 {dimension_numbers = #tpu.dot_dimension_numbers<[1], [0], [0], [1], [0, 0, 1, 1], [], []>} : vector<32x32xf32>, vector<32x16xf32>, vector<32x16xf32> -> vector<32x16xf32>
    %c1_177 = arith.constant 1 : index
    %c0_178 = arith.constant 0 : index
    %c0_179 = arith.constant 0 : index
    %299 = vector.load %arg18[%c1_177, %c0_178, %c0_179] : memref<3x16x16xbf16, #tpu.memory_space<vmem>>, vector<1x16x16xbf16>
    %300 = vector.shape_cast %299 : vector<1x16x16xbf16> to vector<16x16xbf16>
    %cst_180 = arith.constant dense<0.000000e+00> : vector<32x16xf32>
    %301 = tpu.matmul %284, %300, %cst_180 {dimension_numbers = #tpu.dot_dimension_numbers<[1], [0], [0], [1], [0, 0, 1, 1], [], []>} : vector<32x16xbf16>, vector<16x16xbf16>, vector<32x16xf32> -> vector<32x16xf32>
    %302 = arith.addf %298, %301 : vector<32x16xf32>
    %c2_181 = arith.constant 2 : index
    %c0_182 = arith.constant 0 : index
    %c0_183 = arith.constant 0 : index
    %303 = vector.load %arg18[%c2_181, %c0_182, %c0_183] : memref<3x16x16xbf16, #tpu.memory_space<vmem>>, vector<1x16x16xbf16>
    %304 = vector.shape_cast %303 : vector<1x16x16xbf16> to vector<16x16xbf16>
    %cst_184 = arith.constant dense<0.000000e+00> : vector<32x16xf32>
    %305 = tpu.matmul %284, %304, %cst_184 {dimension_numbers = #tpu.dot_dimension_numbers<[1], [0], [0], [1], [0, 0, 1, 1], [], []>} : vector<32x16xbf16>, vector<16x16xbf16>, vector<32x16xf32> -> vector<32x16xf32>
    %306 = tpu.iota {dimensions = array<i32: 0>} : vector<32x32xi32>
    %307 = tpu.iota {dimensions = array<i32: 1>} : vector<32x32xi32>
    %c1_i32_185 = arith.constant 1 : i32
    %308 = vector.broadcast %c1_i32_185 : i32 to vector<32x32xi32>
    %309 = arith.muli %306, %308 : vector<32x32xi32>
    %c1_i32_186 = arith.constant 1 : i32
    %310 = vector.broadcast %c1_i32_186 : i32 to vector<32x32xi32>
    %311 = arith.addi %309, %310 : vector<32x32xi32>
    %312 = arith.cmpi eq, %307, %311 : vector<32x32xi32>
    %cst_187 = arith.constant 1.000000e+00 : f32
    %cst_188 = arith.constant 0.000000e+00 : f32
    %313 = vector.broadcast %cst_187 : f32 to vector<32x32xf32>
    %314 = vector.broadcast %cst_188 : f32 to vector<32x32xf32>
    %315 = arith.select %312, %313, %314 : vector<32x32xi1>, vector<32x32xf32>
    %cst_189 = arith.constant dense<0.000000e+00> : vector<32x16xf32>
    %316 = tpu.matmul %315, %305, %cst_189 {dimension_numbers = #tpu.dot_dimension_numbers<[1], [0], [0], [1], [0, 0, 1, 1], [], []>} : vector<32x32xf32>, vector<32x16xf32>, vector<32x16xf32> -> vector<32x16xf32>
    %317 = arith.addf %302, %316 : vector<32x16xf32>
    %c0_190 = arith.constant 0 : index
    %c0_191 = arith.constant 0 : index
    %318 = vector.load %arg19[%c0_190, %c0_191] : memref<1x16xf32, #tpu.memory_space<vmem>>, vector<1x16xf32>
    %319 = vector.broadcast %318 : vector<1x16xf32> to vector<32x16xf32>
    %320 = arith.addf %317, %319 : vector<32x16xf32>
    %321 = arith.addf %320, %236 : vector<32x16xf32>
    %c0_192 = arith.constant 0 : index
    %c0_193 = arith.constant 0 : index
    %322 = vector.load %arg20[%c0_192, %c0_193] : memref<1x16xf32, #tpu.memory_space<vmem>>, vector<1x16xf32>
    %323 = vector.broadcast %322 : vector<1x16xf32> to vector<32x16xf32>
    %324 = arith.mulf %321, %323 : vector<32x16xf32>
    %c0_194 = arith.constant 0 : index
    %c0_195 = arith.constant 0 : index
    %325 = vector.load %arg21[%c0_194, %c0_195] : memref<1x16xf32, #tpu.memory_space<vmem>>, vector<1x16xf32>
    %326 = vector.broadcast %325 : vector<1x16xf32> to vector<32x16xf32>
    %327 = arith.addf %324, %326 : vector<32x16xf32>
    %cst_196 = arith.constant 0.000000e+00 : f32
    %328 = vector.broadcast %cst_196 : f32 to vector<32x16xf32>
    %329 = arith.maximumf %327, %328 : vector<32x16xf32>
    %330 = arith.truncf %329 : vector<32x16xf32> to vector<32x16xbf16>
    %c0_197 = arith.constant 0 : index
    %c0_198 = arith.constant 0 : index
    %c0_199 = arith.constant 0 : index
    %331 = vector.load %arg22[%c0_197, %c0_198, %c0_199] : memref<3x16x16xbf16, #tpu.memory_space<vmem>>, vector<1x16x16xbf16>
    %332 = vector.shape_cast %331 : vector<1x16x16xbf16> to vector<16x16xbf16>
    %cst_200 = arith.constant dense<0.000000e+00> : vector<32x16xf32>
    %333 = tpu.matmul %330, %332, %cst_200 {dimension_numbers = #tpu.dot_dimension_numbers<[1], [0], [0], [1], [0, 0, 1, 1], [], []>} : vector<32x16xbf16>, vector<16x16xbf16>, vector<32x16xf32> -> vector<32x16xf32>
    %334 = tpu.iota {dimensions = array<i32: 0>} : vector<16x32xi32>
    %335 = tpu.iota {dimensions = array<i32: 1>} : vector<16x32xi32>
    %c2_i32_201 = arith.constant 2 : i32
    %336 = vector.broadcast %c2_i32_201 : i32 to vector<16x32xi32>
    %337 = arith.muli %334, %336 : vector<16x32xi32>
    %c0_i32_202 = arith.constant 0 : i32
    %338 = vector.broadcast %c0_i32_202 : i32 to vector<16x32xi32>
    %339 = arith.addi %337, %338 : vector<16x32xi32>
    %340 = arith.cmpi eq, %335, %339 : vector<16x32xi32>
    %cst_203 = arith.constant 1.000000e+00 : f32
    %cst_204 = arith.constant 0.000000e+00 : f32
    %341 = vector.broadcast %cst_203 : f32 to vector<16x32xf32>
    %342 = vector.broadcast %cst_204 : f32 to vector<16x32xf32>
    %343 = arith.select %340, %341, %342 : vector<16x32xi1>, vector<16x32xf32>
    %cst_205 = arith.constant dense<0.000000e+00> : vector<16x16xf32>
    %344 = tpu.matmul %343, %333, %cst_205 {dimension_numbers = #tpu.dot_dimension_numbers<[1], [0], [0], [1], [0, 0, 1, 1], [], []>} : vector<16x32xf32>, vector<32x16xf32>, vector<16x16xf32> -> vector<16x16xf32>
    %c1_206 = arith.constant 1 : index
    %c0_207 = arith.constant 0 : index
    %c0_208 = arith.constant 0 : index
    %345 = vector.load %arg22[%c1_206, %c0_207, %c0_208] : memref<3x16x16xbf16, #tpu.memory_space<vmem>>, vector<1x16x16xbf16>
    %346 = vector.shape_cast %345 : vector<1x16x16xbf16> to vector<16x16xbf16>
    %cst_209 = arith.constant dense<0.000000e+00> : vector<32x16xf32>
    %347 = tpu.matmul %330, %346, %cst_209 {dimension_numbers = #tpu.dot_dimension_numbers<[1], [0], [0], [1], [0, 0, 1, 1], [], []>} : vector<32x16xbf16>, vector<16x16xbf16>, vector<32x16xf32> -> vector<32x16xf32>
    %348 = tpu.iota {dimensions = array<i32: 0>} : vector<16x32xi32>
    %349 = tpu.iota {dimensions = array<i32: 1>} : vector<16x32xi32>
    %c2_i32_210 = arith.constant 2 : i32
    %350 = vector.broadcast %c2_i32_210 : i32 to vector<16x32xi32>
    %351 = arith.muli %348, %350 : vector<16x32xi32>
    %c1_i32_211 = arith.constant 1 : i32
    %352 = vector.broadcast %c1_i32_211 : i32 to vector<16x32xi32>
    %353 = arith.addi %351, %352 : vector<16x32xi32>
    %354 = arith.cmpi eq, %349, %353 : vector<16x32xi32>
    %cst_212 = arith.constant 1.000000e+00 : f32
    %cst_213 = arith.constant 0.000000e+00 : f32
    %355 = vector.broadcast %cst_212 : f32 to vector<16x32xf32>
    %356 = vector.broadcast %cst_213 : f32 to vector<16x32xf32>
    %357 = arith.select %354, %355, %356 : vector<16x32xi1>, vector<16x32xf32>
    %cst_214 = arith.constant dense<0.000000e+00> : vector<16x16xf32>
    %358 = tpu.matmul %357, %347, %cst_214 {dimension_numbers = #tpu.dot_dimension_numbers<[1], [0], [0], [1], [0, 0, 1, 1], [], []>} : vector<16x32xf32>, vector<32x16xf32>, vector<16x16xf32> -> vector<16x16xf32>
    %359 = arith.addf %344, %358 : vector<16x16xf32>
    %c2_215 = arith.constant 2 : index
    %c0_216 = arith.constant 0 : index
    %c0_217 = arith.constant 0 : index
    %360 = vector.load %arg22[%c2_215, %c0_216, %c0_217] : memref<3x16x16xbf16, #tpu.memory_space<vmem>>, vector<1x16x16xbf16>
    %361 = vector.shape_cast %360 : vector<1x16x16xbf16> to vector<16x16xbf16>
    %cst_218 = arith.constant dense<0.000000e+00> : vector<32x16xf32>
    %362 = tpu.matmul %330, %361, %cst_218 {dimension_numbers = #tpu.dot_dimension_numbers<[1], [0], [0], [1], [0, 0, 1, 1], [], []>} : vector<32x16xbf16>, vector<16x16xbf16>, vector<32x16xf32> -> vector<32x16xf32>
    %363 = tpu.iota {dimensions = array<i32: 0>} : vector<16x32xi32>
    %364 = tpu.iota {dimensions = array<i32: 1>} : vector<16x32xi32>
    %c2_i32_219 = arith.constant 2 : i32
    %365 = vector.broadcast %c2_i32_219 : i32 to vector<16x32xi32>
    %366 = arith.muli %363, %365 : vector<16x32xi32>
    %c2_i32_220 = arith.constant 2 : i32
    %367 = vector.broadcast %c2_i32_220 : i32 to vector<16x32xi32>
    %368 = arith.addi %366, %367 : vector<16x32xi32>
    %369 = arith.cmpi eq, %364, %368 : vector<16x32xi32>
    %cst_221 = arith.constant 1.000000e+00 : f32
    %cst_222 = arith.constant 0.000000e+00 : f32
    %370 = vector.broadcast %cst_221 : f32 to vector<16x32xf32>
    %371 = vector.broadcast %cst_222 : f32 to vector<16x32xf32>
    %372 = arith.select %369, %370, %371 : vector<16x32xi1>, vector<16x32xf32>
    %cst_223 = arith.constant dense<0.000000e+00> : vector<16x16xf32>
    %373 = tpu.matmul %372, %362, %cst_223 {dimension_numbers = #tpu.dot_dimension_numbers<[1], [0], [0], [1], [0, 0, 1, 1], [], []>} : vector<16x32xf32>, vector<32x16xf32>, vector<16x16xf32> -> vector<16x16xf32>
    %374 = arith.addf %359, %373 : vector<16x16xf32>
    %c0_224 = arith.constant 0 : index
    %c0_225 = arith.constant 0 : index
    %375 = vector.load %arg23[%c0_224, %c0_225] : memref<1x16xf32, #tpu.memory_space<vmem>>, vector<1x16xf32>
    %376 = vector.broadcast %375 : vector<1x16xf32> to vector<16x16xf32>
    %377 = arith.addf %374, %376 : vector<16x16xf32>
    %cst_226 = arith.constant 0.000000e+00 : f32
    %378 = vector.broadcast %cst_226 : f32 to vector<16x16xf32>
    %379 = arith.maximumf %377, %378 : vector<16x16xf32>
    %380 = tpu.iota {dimensions = array<i32: 0>} : vector<16x32xi32>
    %381 = tpu.iota {dimensions = array<i32: 1>} : vector<16x32xi32>
    %c2_i32_227 = arith.constant 2 : i32
    %382 = vector.broadcast %c2_i32_227 : i32 to vector<16x32xi32>
    %383 = arith.muli %380, %382 : vector<16x32xi32>
    %c0_i32_228 = arith.constant 0 : i32
    %384 = vector.broadcast %c0_i32_228 : i32 to vector<16x32xi32>
    %385 = arith.addi %383, %384 : vector<16x32xi32>
    %386 = arith.cmpi eq, %381, %385 : vector<16x32xi32>
    %cst_229 = arith.constant 1.000000e+00 : f32
    %cst_230 = arith.constant 0.000000e+00 : f32
    %387 = vector.broadcast %cst_229 : f32 to vector<16x32xf32>
    %388 = vector.broadcast %cst_230 : f32 to vector<16x32xf32>
    %389 = arith.select %386, %387, %388 : vector<16x32xi1>, vector<16x32xf32>
    %cst_231 = arith.constant dense<0.000000e+00> : vector<16x16xf32>
    %390 = tpu.matmul %389, %321, %cst_231 {dimension_numbers = #tpu.dot_dimension_numbers<[1], [0], [0], [1], [0, 0, 1, 1], [], []>} : vector<16x32xf32>, vector<32x16xf32>, vector<16x16xf32> -> vector<16x16xf32>
    %391 = tpu.iota {dimensions = array<i32: 0>} : vector<16x32xi32>
    %392 = tpu.iota {dimensions = array<i32: 1>} : vector<16x32xi32>
    %c2_i32_232 = arith.constant 2 : i32
    %393 = vector.broadcast %c2_i32_232 : i32 to vector<16x32xi32>
    %394 = arith.muli %391, %393 : vector<16x32xi32>
    %c1_i32_233 = arith.constant 1 : i32
    %395 = vector.broadcast %c1_i32_233 : i32 to vector<16x32xi32>
    %396 = arith.addi %394, %395 : vector<16x32xi32>
    %397 = arith.cmpi eq, %392, %396 : vector<16x32xi32>
    %cst_234 = arith.constant 1.000000e+00 : f32
    %cst_235 = arith.constant 0.000000e+00 : f32
    %398 = vector.broadcast %cst_234 : f32 to vector<16x32xf32>
    %399 = vector.broadcast %cst_235 : f32 to vector<16x32xf32>
    %400 = arith.select %397, %398, %399 : vector<16x32xi1>, vector<16x32xf32>
    %cst_236 = arith.constant dense<0.000000e+00> : vector<16x16xf32>
    %401 = tpu.matmul %400, %321, %cst_236 {dimension_numbers = #tpu.dot_dimension_numbers<[1], [0], [0], [1], [0, 0, 1, 1], [], []>} : vector<16x32xf32>, vector<32x16xf32>, vector<16x16xf32> -> vector<16x16xf32>
    %402 = arith.maximumf %390, %401 : vector<16x16xf32>
    %403 = arith.truncf %379 : vector<16x16xf32> to vector<16x16xbf16>
    %c0_237 = arith.constant 0 : index
    %c0_238 = arith.constant 0 : index
    %c0_239 = arith.constant 0 : index
    %404 = vector.load %arg24[%c0_237, %c0_238, %c0_239] : memref<3x16x16xbf16, #tpu.memory_space<vmem>>, vector<1x16x16xbf16>
    %405 = vector.shape_cast %404 : vector<1x16x16xbf16> to vector<16x16xbf16>
    %cst_240 = arith.constant dense<0.000000e+00> : vector<16x16xf32>
    %406 = tpu.matmul %403, %405, %cst_240 {dimension_numbers = #tpu.dot_dimension_numbers<[1], [0], [0], [1], [0, 0, 1, 1], [], []>} : vector<16x16xbf16>, vector<16x16xbf16>, vector<16x16xf32> -> vector<16x16xf32>
    %407 = tpu.iota {dimensions = array<i32: 0>} : vector<16x16xi32>
    %408 = tpu.iota {dimensions = array<i32: 1>} : vector<16x16xi32>
    %c1_i32_241 = arith.constant 1 : i32
    %409 = vector.broadcast %c1_i32_241 : i32 to vector<16x16xi32>
    %410 = arith.muli %407, %409 : vector<16x16xi32>
    %c-1_i32_242 = arith.constant -1 : i32
    %411 = vector.broadcast %c-1_i32_242 : i32 to vector<16x16xi32>
    %412 = arith.addi %410, %411 : vector<16x16xi32>
    %413 = arith.cmpi eq, %408, %412 : vector<16x16xi32>
    %cst_243 = arith.constant 1.000000e+00 : f32
    %cst_244 = arith.constant 0.000000e+00 : f32
    %414 = vector.broadcast %cst_243 : f32 to vector<16x16xf32>
    %415 = vector.broadcast %cst_244 : f32 to vector<16x16xf32>
    %416 = arith.select %413, %414, %415 : vector<16x16xi1>, vector<16x16xf32>
    %cst_245 = arith.constant dense<0.000000e+00> : vector<16x16xf32>
    %417 = tpu.matmul %416, %406, %cst_245 {dimension_numbers = #tpu.dot_dimension_numbers<[1], [0], [0], [1], [0, 0, 1, 1], [], []>} : vector<16x16xf32>, vector<16x16xf32>, vector<16x16xf32> -> vector<16x16xf32>
    %c1_246 = arith.constant 1 : index
    %c0_247 = arith.constant 0 : index
    %c0_248 = arith.constant 0 : index
    %418 = vector.load %arg24[%c1_246, %c0_247, %c0_248] : memref<3x16x16xbf16, #tpu.memory_space<vmem>>, vector<1x16x16xbf16>
    %419 = vector.shape_cast %418 : vector<1x16x16xbf16> to vector<16x16xbf16>
    %cst_249 = arith.constant dense<0.000000e+00> : vector<16x16xf32>
    %420 = tpu.matmul %403, %419, %cst_249 {dimension_numbers = #tpu.dot_dimension_numbers<[1], [0], [0], [1], [0, 0, 1, 1], [], []>} : vector<16x16xbf16>, vector<16x16xbf16>, vector<16x16xf32> -> vector<16x16xf32>
    %421 = arith.addf %417, %420 : vector<16x16xf32>
    %c2_250 = arith.constant 2 : index
    %c0_251 = arith.constant 0 : index
    %c0_252 = arith.constant 0 : index
    %422 = vector.load %arg24[%c2_250, %c0_251, %c0_252] : memref<3x16x16xbf16, #tpu.memory_space<vmem>>, vector<1x16x16xbf16>
    %423 = vector.shape_cast %422 : vector<1x16x16xbf16> to vector<16x16xbf16>
    %cst_253 = arith.constant dense<0.000000e+00> : vector<16x16xf32>
    %424 = tpu.matmul %403, %423, %cst_253 {dimension_numbers = #tpu.dot_dimension_numbers<[1], [0], [0], [1], [0, 0, 1, 1], [], []>} : vector<16x16xbf16>, vector<16x16xbf16>, vector<16x16xf32> -> vector<16x16xf32>
    %425 = tpu.iota {dimensions = array<i32: 0>} : vector<16x16xi32>
    %426 = tpu.iota {dimensions = array<i32: 1>} : vector<16x16xi32>
    %c1_i32_254 = arith.constant 1 : i32
    %427 = vector.broadcast %c1_i32_254 : i32 to vector<16x16xi32>
    %428 = arith.muli %425, %427 : vector<16x16xi32>
    %c1_i32_255 = arith.constant 1 : i32
    %429 = vector.broadcast %c1_i32_255 : i32 to vector<16x16xi32>
    %430 = arith.addi %428, %429 : vector<16x16xi32>
    %431 = arith.cmpi eq, %426, %430 : vector<16x16xi32>
    %cst_256 = arith.constant 1.000000e+00 : f32
    %cst_257 = arith.constant 0.000000e+00 : f32
    %432 = vector.broadcast %cst_256 : f32 to vector<16x16xf32>
    %433 = vector.broadcast %cst_257 : f32 to vector<16x16xf32>
    %434 = arith.select %431, %432, %433 : vector<16x16xi1>, vector<16x16xf32>
    %cst_258 = arith.constant dense<0.000000e+00> : vector<16x16xf32>
    %435 = tpu.matmul %434, %424, %cst_258 {dimension_numbers = #tpu.dot_dimension_numbers<[1], [0], [0], [1], [0, 0, 1, 1], [], []>} : vector<16x16xf32>, vector<16x16xf32>, vector<16x16xf32> -> vector<16x16xf32>
    %436 = arith.addf %421, %435 : vector<16x16xf32>
    %c0_259 = arith.constant 0 : index
    %c0_260 = arith.constant 0 : index
    %437 = vector.load %arg25[%c0_259, %c0_260] : memref<1x16xf32, #tpu.memory_space<vmem>>, vector<1x16xf32>
    %438 = vector.broadcast %437 : vector<1x16xf32> to vector<16x16xf32>
    %439 = arith.addf %436, %438 : vector<16x16xf32>
    %440 = arith.addf %439, %402 : vector<16x16xf32>
    %c0_261 = arith.constant 0 : index
    %c0_262 = arith.constant 0 : index
    %441 = vector.load %arg26[%c0_261, %c0_262] : memref<1x16xf32, #tpu.memory_space<vmem>>, vector<1x16xf32>
    %442 = vector.broadcast %441 : vector<1x16xf32> to vector<16x16xf32>
    %443 = arith.mulf %440, %442 : vector<16x16xf32>
    %c0_263 = arith.constant 0 : index
    %c0_264 = arith.constant 0 : index
    %444 = vector.load %arg27[%c0_263, %c0_264] : memref<1x16xf32, #tpu.memory_space<vmem>>, vector<1x16xf32>
    %445 = vector.broadcast %444 : vector<1x16xf32> to vector<16x16xf32>
    %446 = arith.addf %443, %445 : vector<16x16xf32>
    %cst_265 = arith.constant 0.000000e+00 : f32
    %447 = vector.broadcast %cst_265 : f32 to vector<16x16xf32>
    %448 = arith.maximumf %446, %447 : vector<16x16xf32>
    %449 = arith.truncf %448 : vector<16x16xf32> to vector<16x16xbf16>
    %c0_266 = arith.constant 0 : index
    %c0_267 = arith.constant 0 : index
    %c0_268 = arith.constant 0 : index
    %450 = vector.load %arg28[%c0_266, %c0_267, %c0_268] : memref<3x16x32xbf16, #tpu.memory_space<vmem>>, vector<1x16x32xbf16>
    %451 = vector.shape_cast %450 : vector<1x16x32xbf16> to vector<16x32xbf16>
    %cst_269 = arith.constant dense<0.000000e+00> : vector<16x32xf32>
    %452 = tpu.matmul %449, %451, %cst_269 {dimension_numbers = #tpu.dot_dimension_numbers<[1], [0], [0], [1], [0, 0, 1, 1], [], []>} : vector<16x16xbf16>, vector<16x32xbf16>, vector<16x32xf32> -> vector<16x32xf32>
    %453 = tpu.iota {dimensions = array<i32: 0>} : vector<16x16xi32>
    %454 = tpu.iota {dimensions = array<i32: 1>} : vector<16x16xi32>
    %c1_i32_270 = arith.constant 1 : i32
    %455 = vector.broadcast %c1_i32_270 : i32 to vector<16x16xi32>
    %456 = arith.muli %453, %455 : vector<16x16xi32>
    %c-1_i32_271 = arith.constant -1 : i32
    %457 = vector.broadcast %c-1_i32_271 : i32 to vector<16x16xi32>
    %458 = arith.addi %456, %457 : vector<16x16xi32>
    %459 = arith.cmpi eq, %454, %458 : vector<16x16xi32>
    %cst_272 = arith.constant 1.000000e+00 : f32
    %cst_273 = arith.constant 0.000000e+00 : f32
    %460 = vector.broadcast %cst_272 : f32 to vector<16x16xf32>
    %461 = vector.broadcast %cst_273 : f32 to vector<16x16xf32>
    %462 = arith.select %459, %460, %461 : vector<16x16xi1>, vector<16x16xf32>
    %cst_274 = arith.constant dense<0.000000e+00> : vector<16x32xf32>
    %463 = tpu.matmul %462, %452, %cst_274 {dimension_numbers = #tpu.dot_dimension_numbers<[1], [0], [0], [1], [0, 0, 1, 1], [], []>} : vector<16x16xf32>, vector<16x32xf32>, vector<16x32xf32> -> vector<16x32xf32>
    %c1_275 = arith.constant 1 : index
    %c0_276 = arith.constant 0 : index
    %c0_277 = arith.constant 0 : index
    %464 = vector.load %arg28[%c1_275, %c0_276, %c0_277] : memref<3x16x32xbf16, #tpu.memory_space<vmem>>, vector<1x16x32xbf16>
    %465 = vector.shape_cast %464 : vector<1x16x32xbf16> to vector<16x32xbf16>
    %cst_278 = arith.constant dense<0.000000e+00> : vector<16x32xf32>
    %466 = tpu.matmul %449, %465, %cst_278 {dimension_numbers = #tpu.dot_dimension_numbers<[1], [0], [0], [1], [0, 0, 1, 1], [], []>} : vector<16x16xbf16>, vector<16x32xbf16>, vector<16x32xf32> -> vector<16x32xf32>
    %467 = arith.addf %463, %466 : vector<16x32xf32>
    %c2_279 = arith.constant 2 : index
    %c0_280 = arith.constant 0 : index
    %c0_281 = arith.constant 0 : index
    %468 = vector.load %arg28[%c2_279, %c0_280, %c0_281] : memref<3x16x32xbf16, #tpu.memory_space<vmem>>, vector<1x16x32xbf16>
    %469 = vector.shape_cast %468 : vector<1x16x32xbf16> to vector<16x32xbf16>
    %cst_282 = arith.constant dense<0.000000e+00> : vector<16x32xf32>
    %470 = tpu.matmul %449, %469, %cst_282 {dimension_numbers = #tpu.dot_dimension_numbers<[1], [0], [0], [1], [0, 0, 1, 1], [], []>} : vector<16x16xbf16>, vector<16x32xbf16>, vector<16x32xf32> -> vector<16x32xf32>
    %471 = tpu.iota {dimensions = array<i32: 0>} : vector<16x16xi32>
    %472 = tpu.iota {dimensions = array<i32: 1>} : vector<16x16xi32>
    %c1_i32_283 = arith.constant 1 : i32
    %473 = vector.broadcast %c1_i32_283 : i32 to vector<16x16xi32>
    %474 = arith.muli %471, %473 : vector<16x16xi32>
    %c1_i32_284 = arith.constant 1 : i32
    %475 = vector.broadcast %c1_i32_284 : i32 to vector<16x16xi32>
    %476 = arith.addi %474, %475 : vector<16x16xi32>
    %477 = arith.cmpi eq, %472, %476 : vector<16x16xi32>
    %cst_285 = arith.constant 1.000000e+00 : f32
    %cst_286 = arith.constant 0.000000e+00 : f32
    %478 = vector.broadcast %cst_285 : f32 to vector<16x16xf32>
    %479 = vector.broadcast %cst_286 : f32 to vector<16x16xf32>
    %480 = arith.select %477, %478, %479 : vector<16x16xi1>, vector<16x16xf32>
    %cst_287 = arith.constant dense<0.000000e+00> : vector<16x32xf32>
    %481 = tpu.matmul %480, %470, %cst_287 {dimension_numbers = #tpu.dot_dimension_numbers<[1], [0], [0], [1], [0, 0, 1, 1], [], []>} : vector<16x16xf32>, vector<16x32xf32>, vector<16x32xf32> -> vector<16x32xf32>
    %482 = arith.addf %467, %481 : vector<16x32xf32>
    %c0_288 = arith.constant 0 : index
    %c0_289 = arith.constant 0 : index
    %483 = vector.load %arg29[%c0_288, %c0_289] : memref<1x32xf32, #tpu.memory_space<vmem>>, vector<1x32xf32>
    %484 = vector.broadcast %483 : vector<1x32xf32> to vector<16x32xf32>
    %485 = arith.addf %482, %484 : vector<16x32xf32>
    %cst_290 = arith.constant 0.000000e+00 : f32
    %486 = vector.broadcast %cst_290 : f32 to vector<16x32xf32>
    %487 = arith.maximumf %485, %486 : vector<16x32xf32>
    %488 = tpu.iota {dimensions = array<i32: 0>} : vector<16x32xi32>
    %489 = tpu.iota {dimensions = array<i32: 1>} : vector<16x32xi32>
    %c8_i32 = arith.constant 8 : i32
    %490 = vector.broadcast %c8_i32 : i32 to vector<16x32xi32>
    %491 = arith.addi %488, %490 : vector<16x32xi32>
    %492 = arith.cmpi eq, %489, %491 : vector<16x32xi32>
    %cst_291 = arith.constant 1.000000e+00 : f32
    %cst_292 = arith.constant 0.000000e+00 : f32
    %493 = vector.broadcast %cst_291 : f32 to vector<16x32xf32>
    %494 = vector.broadcast %cst_292 : f32 to vector<16x32xf32>
    %495 = arith.select %492, %493, %494 : vector<16x32xi1>, vector<16x32xf32>
    %cst_293 = arith.constant dense<0.000000e+00> : vector<16x32xf32>
    %496 = tpu.matmul %440, %495, %cst_293 {dimension_numbers = #tpu.dot_dimension_numbers<[1], [0], [0], [1], [0, 0, 1, 1], [], []>} : vector<16x16xf32>, vector<16x32xf32>, vector<16x32xf32> -> vector<16x32xf32>
    %497 = arith.truncf %487 : vector<16x32xf32> to vector<16x32xbf16>
    %c0_294 = arith.constant 0 : index
    %c0_295 = arith.constant 0 : index
    %c0_296 = arith.constant 0 : index
    %498 = vector.load %arg30[%c0_294, %c0_295, %c0_296] : memref<3x32x32xbf16, #tpu.memory_space<vmem>>, vector<1x32x32xbf16>
    %499 = vector.shape_cast %498 : vector<1x32x32xbf16> to vector<32x32xbf16>
    %cst_297 = arith.constant dense<0.000000e+00> : vector<16x32xf32>
    %500 = tpu.matmul %497, %499, %cst_297 {dimension_numbers = #tpu.dot_dimension_numbers<[1], [0], [0], [1], [0, 0, 1, 1], [], []>} : vector<16x32xbf16>, vector<32x32xbf16>, vector<16x32xf32> -> vector<16x32xf32>
    %501 = tpu.iota {dimensions = array<i32: 0>} : vector<16x16xi32>
    %502 = tpu.iota {dimensions = array<i32: 1>} : vector<16x16xi32>
    %c1_i32_298 = arith.constant 1 : i32
    %503 = vector.broadcast %c1_i32_298 : i32 to vector<16x16xi32>
    %504 = arith.muli %501, %503 : vector<16x16xi32>
    %c-1_i32_299 = arith.constant -1 : i32
    %505 = vector.broadcast %c-1_i32_299 : i32 to vector<16x16xi32>
    %506 = arith.addi %504, %505 : vector<16x16xi32>
    %507 = arith.cmpi eq, %502, %506 : vector<16x16xi32>
    %cst_300 = arith.constant 1.000000e+00 : f32
    %cst_301 = arith.constant 0.000000e+00 : f32
    %508 = vector.broadcast %cst_300 : f32 to vector<16x16xf32>
    %509 = vector.broadcast %cst_301 : f32 to vector<16x16xf32>
    %510 = arith.select %507, %508, %509 : vector<16x16xi1>, vector<16x16xf32>
    %cst_302 = arith.constant dense<0.000000e+00> : vector<16x32xf32>
    %511 = tpu.matmul %510, %500, %cst_302 {dimension_numbers = #tpu.dot_dimension_numbers<[1], [0], [0], [1], [0, 0, 1, 1], [], []>} : vector<16x16xf32>, vector<16x32xf32>, vector<16x32xf32> -> vector<16x32xf32>
    %c1_303 = arith.constant 1 : index
    %c0_304 = arith.constant 0 : index
    %c0_305 = arith.constant 0 : index
    %512 = vector.load %arg30[%c1_303, %c0_304, %c0_305] : memref<3x32x32xbf16, #tpu.memory_space<vmem>>, vector<1x32x32xbf16>
    %513 = vector.shape_cast %512 : vector<1x32x32xbf16> to vector<32x32xbf16>
    %cst_306 = arith.constant dense<0.000000e+00> : vector<16x32xf32>
    %514 = tpu.matmul %497, %513, %cst_306 {dimension_numbers = #tpu.dot_dimension_numbers<[1], [0], [0], [1], [0, 0, 1, 1], [], []>} : vector<16x32xbf16>, vector<32x32xbf16>, vector<16x32xf32> -> vector<16x32xf32>
    %515 = arith.addf %511, %514 : vector<16x32xf32>
    %c2_307 = arith.constant 2 : index
    %c0_308 = arith.constant 0 : index
    %c0_309 = arith.constant 0 : index
    %516 = vector.load %arg30[%c2_307, %c0_308, %c0_309] : memref<3x32x32xbf16, #tpu.memory_space<vmem>>, vector<1x32x32xbf16>
    %517 = vector.shape_cast %516 : vector<1x32x32xbf16> to vector<32x32xbf16>
    %cst_310 = arith.constant dense<0.000000e+00> : vector<16x32xf32>
    %518 = tpu.matmul %497, %517, %cst_310 {dimension_numbers = #tpu.dot_dimension_numbers<[1], [0], [0], [1], [0, 0, 1, 1], [], []>} : vector<16x32xbf16>, vector<32x32xbf16>, vector<16x32xf32> -> vector<16x32xf32>
    %519 = tpu.iota {dimensions = array<i32: 0>} : vector<16x16xi32>
    %520 = tpu.iota {dimensions = array<i32: 1>} : vector<16x16xi32>
    %c1_i32_311 = arith.constant 1 : i32
    %521 = vector.broadcast %c1_i32_311 : i32 to vector<16x16xi32>
    %522 = arith.muli %519, %521 : vector<16x16xi32>
    %c1_i32_312 = arith.constant 1 : i32
    %523 = vector.broadcast %c1_i32_312 : i32 to vector<16x16xi32>
    %524 = arith.addi %522, %523 : vector<16x16xi32>
    %525 = arith.cmpi eq, %520, %524 : vector<16x16xi32>
    %cst_313 = arith.constant 1.000000e+00 : f32
    %cst_314 = arith.constant 0.000000e+00 : f32
    %526 = vector.broadcast %cst_313 : f32 to vector<16x16xf32>
    %527 = vector.broadcast %cst_314 : f32 to vector<16x16xf32>
    %528 = arith.select %525, %526, %527 : vector<16x16xi1>, vector<16x16xf32>
    %cst_315 = arith.constant dense<0.000000e+00> : vector<16x32xf32>
    %529 = tpu.matmul %528, %518, %cst_315 {dimension_numbers = #tpu.dot_dimension_numbers<[1], [0], [0], [1], [0, 0, 1, 1], [], []>} : vector<16x16xf32>, vector<16x32xf32>, vector<16x32xf32> -> vector<16x32xf32>
    %530 = arith.addf %515, %529 : vector<16x32xf32>
    %c0_316 = arith.constant 0 : index
    %c0_317 = arith.constant 0 : index
    %531 = vector.load %arg31[%c0_316, %c0_317] : memref<1x32xf32, #tpu.memory_space<vmem>>, vector<1x32xf32>
    %532 = vector.broadcast %531 : vector<1x32xf32> to vector<16x32xf32>
    %533 = arith.addf %530, %532 : vector<16x32xf32>
    %534 = arith.addf %533, %496 : vector<16x32xf32>
    %c0_318 = arith.constant 0 : index
    %c0_319 = arith.constant 0 : index
    %535 = vector.load %arg32[%c0_318, %c0_319] : memref<1x32xf32, #tpu.memory_space<vmem>>, vector<1x32xf32>
    %536 = vector.broadcast %535 : vector<1x32xf32> to vector<16x32xf32>
    %537 = arith.mulf %534, %536 : vector<16x32xf32>
    %c0_320 = arith.constant 0 : index
    %c0_321 = arith.constant 0 : index
    %538 = vector.load %arg33[%c0_320, %c0_321] : memref<1x32xf32, #tpu.memory_space<vmem>>, vector<1x32xf32>
    %539 = vector.broadcast %538 : vector<1x32xf32> to vector<16x32xf32>
    %540 = arith.addf %537, %539 : vector<16x32xf32>
    %cst_322 = arith.constant 0.000000e+00 : f32
    %541 = vector.broadcast %cst_322 : f32 to vector<16x32xf32>
    %542 = arith.maximumf %540, %541 : vector<16x32xf32>
    %cst_323 = arith.constant dense<0.000000e+00> : vector<32xf32>
    %543 = vector.multi_reduction <add>, %542, %cst_323 [0] : vector<16x32xf32> to vector<32xf32>
    %544 = vector.shape_cast %543 : vector<32xf32> to vector<1x32xf32>
    %cst_324 = arith.constant 6.250000e-02 : f32
    %545 = vector.broadcast %cst_324 : f32 to vector<1x32xf32>
    %546 = arith.mulf %544, %545 : vector<1x32xf32>
    %c0_325 = arith.constant 0 : index
    %c0_326 = arith.constant 0 : index
    %547 = vector.load %arg34[%c0_325, %c0_326] : memref<32x3xf32, #tpu.memory_space<vmem>>, vector<32x3xf32>
    %cst_327 = arith.constant dense<0.000000e+00> : vector<1x3xf32>
    %548 = tpu.matmul %546, %547, %cst_327 {dimension_numbers = #tpu.dot_dimension_numbers<[1], [0], [0], [1], [0, 0, 1, 1], [], []>} : vector<1x32xf32>, vector<32x3xf32>, vector<1x3xf32> -> vector<1x3xf32>
    %c0_328 = arith.constant 0 : index
    %c0_329 = arith.constant 0 : index
    %549 = vector.load %arg35[%c0_328, %c0_329] : memref<1x3xf32, #tpu.memory_space<vmem>>, vector<1x3xf32>
    %550 = arith.addf %548, %549 : vector<1x3xf32>
    %c0_330 = arith.constant 0 : index
    %c0_331 = arith.constant 0 : index
    %c0_332 = arith.constant 0 : index
    %551 = vector.load %arg36[%c0_330, %c0_331, %c0_332] : memref<1x1x3xf32, #tpu.memory_space<vmem>>, vector<1x1x3xf32>
    %552 = vector.shape_cast %551 : vector<1x1x3xf32> to vector<1x3xf32>
    %553 = vector.shape_cast %550 : vector<1x3xf32> to vector<1x1x3xf32>
    tpu.vector_store %arg36[%c0_330, %c0_331, %c0_332], %553 {strides = array<i32>} : memref<1x1x3xf32, #tpu.memory_space<vmem>>, vector<1x1x3xf32>,
    return
  }
  func.func @transform_0(%arg0: i32) -> (i32, i32, i32) {
    %c0_i32 = arith.constant 0 : i32
    %c0_i32_0 = arith.constant 0 : i32
    %c0_i32_1 = arith.constant 0 : i32
    return %arg0, %c0_i32, %c0_i32_0 : i32, i32, i32
  }
  func.func @transform_1(%arg0: i32) -> (i32, i32, i32) {
    %c0_i32 = arith.constant 0 : i32
    %c0_i32_0 = arith.constant 0 : i32
    %c0_i32_1 = arith.constant 0 : i32
    %c0_i32_2 = arith.constant 0 : i32
    return %c0_i32, %c0_i32_0, %c0_i32_1 : i32, i32, i32
  }
  func.func @transform_2(%arg0: i32) -> (i32, i32) {
    %c0_i32 = arith.constant 0 : i32
    %c0_i32_0 = arith.constant 0 : i32
    %c0_i32_1 = arith.constant 0 : i32
    return %c0_i32, %c0_i32_0 : i32, i32
  }
  func.func @transform_3(%arg0: i32) -> (i32, i32, i32) {
    %c0_i32 = arith.constant 0 : i32
    %c0_i32_0 = arith.constant 0 : i32
    %c0_i32_1 = arith.constant 0 : i32
    %c0_i32_2 = arith.constant 0 : i32
    return %c0_i32, %c0_i32_0, %c0_i32_1 : i32, i32, i32
  }
  func.func @transform_4(%arg0: i32) -> (i32, i32) {
    %c0_i32 = arith.constant 0 : i32
    %c0_i32_0 = arith.constant 0 : i32
    %c0_i32_1 = arith.constant 0 : i32
    return %c0_i32, %c0_i32_0 : i32, i32
  }
  func.func @transform_5(%arg0: i32) -> (i32, i32, i32) {
    %c0_i32 = arith.constant 0 : i32
    %c0_i32_0 = arith.constant 0 : i32
    %c0_i32_1 = arith.constant 0 : i32
    %c0_i32_2 = arith.constant 0 : i32
    return %c0_i32, %c0_i32_0, %c0_i32_1 : i32, i32, i32
  }
  func.func @transform_6(%arg0: i32) -> (i32, i32) {
    %c0_i32 = arith.constant 0 : i32
    %c0_i32_0 = arith.constant 0 : i32
    %c0_i32_1 = arith.constant 0 : i32
    return %c0_i32, %c0_i32_0 : i32, i32
  }
  func.func @transform_7(%arg0: i32) -> (i32, i32) {
    %c0_i32 = arith.constant 0 : i32
    %c0_i32_0 = arith.constant 0 : i32
    %c0_i32_1 = arith.constant 0 : i32
    return %c0_i32, %c0_i32_0 : i32, i32
  }
  func.func @transform_8(%arg0: i32) -> (i32, i32) {
    %c0_i32 = arith.constant 0 : i32
    %c0_i32_0 = arith.constant 0 : i32
    %c0_i32_1 = arith.constant 0 : i32
    return %c0_i32, %c0_i32_0 : i32, i32
  }
  func.func @transform_9(%arg0: i32) -> (i32, i32, i32) {
    %c0_i32 = arith.constant 0 : i32
    %c0_i32_0 = arith.constant 0 : i32
    %c0_i32_1 = arith.constant 0 : i32
    %c0_i32_2 = arith.constant 0 : i32
    return %c0_i32, %c0_i32_0, %c0_i32_1 : i32, i32, i32
  }
  func.func @transform_10(%arg0: i32) -> (i32, i32) {
    %c0_i32 = arith.constant 0 : i32
    %c0_i32_0 = arith.constant 0 : i32
    %c0_i32_1 = arith.constant 0 : i32
    return %c0_i32, %c0_i32_0 : i32, i32
  }
  func.func @transform_11(%arg0: i32) -> (i32, i32, i32) {
    %c0_i32 = arith.constant 0 : i32
    %c0_i32_0 = arith.constant 0 : i32
    %c0_i32_1 = arith.constant 0 : i32
    %c0_i32_2 = arith.constant 0 : i32
    return %c0_i32, %c0_i32_0, %c0_i32_1 : i32, i32, i32
  }
  func.func @transform_12(%arg0: i32) -> (i32, i32) {
    %c0_i32 = arith.constant 0 : i32
    %c0_i32_0 = arith.constant 0 : i32
    %c0_i32_1 = arith.constant 0 : i32
    return %c0_i32, %c0_i32_0 : i32, i32
  }
  func.func @transform_13(%arg0: i32) -> (i32, i32) {
    %c0_i32 = arith.constant 0 : i32
    %c0_i32_0 = arith.constant 0 : i32
    %c0_i32_1 = arith.constant 0 : i32
    return %c0_i32, %c0_i32_0 : i32, i32
  }
  func.func @transform_14(%arg0: i32) -> (i32, i32) {
    %c0_i32 = arith.constant 0 : i32
    %c0_i32_0 = arith.constant 0 : i32
    %c0_i32_1 = arith.constant 0 : i32
    return %c0_i32, %c0_i32_0 : i32, i32
  }
  func.func @transform_15(%arg0: i32) -> (i32, i32, i32) {
    %c0_i32 = arith.constant 0 : i32
    %c0_i32_0 = arith.constant 0 : i32
    %c0_i32_1 = arith.constant 0 : i32
    %c0_i32_2 = arith.constant 0 : i32
    return %c0_i32, %c0_i32_0, %c0_i32_1 : i32, i32, i32
  }
  func.func @transform_16(%arg0: i32) -> (i32, i32) {
    %c0_i32 = arith.constant 0 : i32
    %c0_i32_0 = arith.constant 0 : i32
    %c0_i32_1 = arith.constant 0 : i32
    return %c0_i32, %c0_i32_0 : i32, i32
  }
  func.func @transform_17(%arg0: i32) -> (i32, i32, i32) {
    %c0_i32 = arith.constant 0 : i32
    %c0_i32_0 = arith.constant 0 : i32
    %c0_i32_1 = arith.constant 0 : i32
    %c0_i32_2 = arith.constant 0 : i32
    return %c0_i32, %c0_i32_0, %c0_i32_1 : i32, i32, i32
  }
  func.func @transform_18(%arg0: i32) -> (i32, i32) {
    %c0_i32 = arith.constant 0 : i32
    %c0_i32_0 = arith.constant 0 : i32
    %c0_i32_1 = arith.constant 0 : i32
    return %c0_i32, %c0_i32_0 : i32, i32
  }
  func.func @transform_19(%arg0: i32) -> (i32, i32) {
    %c0_i32 = arith.constant 0 : i32
    %c0_i32_0 = arith.constant 0 : i32
    %c0_i32_1 = arith.constant 0 : i32
    return %c0_i32, %c0_i32_0 : i32, i32
  }
  func.func @transform_20(%arg0: i32) -> (i32, i32) {
    %c0_i32 = arith.constant 0 : i32
    %c0_i32_0 = arith.constant 0 : i32
    %c0_i32_1 = arith.constant 0 : i32
    return %c0_i32, %c0_i32_0 : i32, i32
  }
  func.func @transform_21(%arg0: i32) -> (i32, i32, i32) {
    %c0_i32 = arith.constant 0 : i32
    %c0_i32_0 = arith.constant 0 : i32
    %c0_i32_1 = arith.constant 0 : i32
    %c0_i32_2 = arith.constant 0 : i32
    return %c0_i32, %c0_i32_0, %c0_i32_1 : i32, i32, i32
  }
  func.func @transform_22(%arg0: i32) -> (i32, i32) {
    %c0_i32 = arith.constant 0 : i32
    %c0_i32_0 = arith.constant 0 : i32
    %c0_i32_1 = arith.constant 0 : i32
    return %c0_i32, %c0_i32_0 : i32, i32
  }
  func.func @transform_23(%arg0: i32) -> (i32, i32, i32) {
    %c0_i32 = arith.constant 0 : i32
    %c0_i32_0 = arith.constant 0 : i32
    %c0_i32_1 = arith.constant 0 : i32
    %c0_i32_2 = arith.constant 0 : i32
    return %c0_i32, %c0_i32_0, %c0_i32_1 : i32, i32, i32
  }
  func.func @transform_24(%arg0: i32) -> (i32, i32) {
    %c0_i32 = arith.constant 0 : i32
    %c0_i32_0 = arith.constant 0 : i32
    %c0_i32_1 = arith.constant 0 : i32
    return %c0_i32, %c0_i32_0 : i32, i32
  }
  func.func @transform_25(%arg0: i32) -> (i32, i32) {
    %c0_i32 = arith.constant 0 : i32
    %c0_i32_0 = arith.constant 0 : i32
    %c0_i32_1 = arith.constant 0 : i32
    return %c0_i32, %c0_i32_0 : i32, i32
  }
  func.func @transform_26(%arg0: i32) -> (i32, i32) {
    %c0_i32 = arith.constant 0 : i32
    %c0_i32_0 = arith.constant 0 : i32
    %c0_i32_1 = arith.constant 0 : i32
    return %c0_i32, %c0_i32_0 : i32, i32
  }
  func.func @transform_27(%arg0: i32) -> (i32, i32, i32) {
    %c0_i32 = arith.constant 0 : i32
    %c0_i32_0 = arith.constant 0 : i32
    %c0_i32_1 = arith.constant 0 : i32
    %c0_i32_2 = arith.constant 0 : i32
    return %c0_i32, %c0_i32_0, %c0_i32_1 : i32, i32, i32
  }
  func.func @transform_28(%arg0: i32) -> (i32, i32) {
    %c0_i32 = arith.constant 0 : i32
    %c0_i32_0 = arith.constant 0 : i32
    %c0_i32_1 = arith.constant 0 : i32
    return %c0_i32, %c0_i32_0 : i32, i32
  }
  func.func @transform_29(%arg0: i32) -> (i32, i32, i32) {
    %c0_i32 = arith.constant 0 : i32
    %c0_i32_0 = arith.constant 0 : i32
    %c0_i32_1 = arith.constant 0 : i32
    %c0_i32_2 = arith.constant 0 : i32
    return %c0_i32, %c0_i32_0, %c0_i32_1 : i32, i32, i32
  }
  func.func @transform_30(%arg0: i32) -> (i32, i32) {
    %c0_i32 = arith.constant 0 : i32
    %c0_i32_0 = arith.constant 0 : i32
    %c0_i32_1 = arith.constant 0 : i32
    return %c0_i32, %c0_i32_0 : i32, i32
  }
  func.func @transform_31(%arg0: i32) -> (i32, i32) {
    %c0_i32 = arith.constant 0 : i32
    %c0_i32_0 = arith.constant 0 : i32
    %c0_i32_1 = arith.constant 0 : i32
    return %c0_i32, %c0_i32_0 : i32, i32
  }
  func.func @transform_32(%arg0: i32) -> (i32, i32) {
    %c0_i32 = arith.constant 0 : i32
    %c0_i32_0 = arith.constant 0 : i32
    %c0_i32_1 = arith.constant 0 : i32
    return %c0_i32, %c0_i32_0 : i32, i32
  }
  func.func @transform_33(%arg0: i32) -> (i32, i32) {
    %c0_i32 = arith.constant 0 : i32
    %c0_i32_0 = arith.constant 0 : i32
    %c0_i32_1 = arith.constant 0 : i32
    return %c0_i32, %c0_i32_0 : i32, i32
  }
  func.func @transform_34(%arg0: i32) -> (i32, i32) {
    %c0_i32 = arith.constant 0 : i32
    %c0_i32_0 = arith.constant 0 : i32
    %c0_i32_1 = arith.constant 0 : i32
    return %c0_i32, %c0_i32_0 : i32, i32
  }
  func.func @transform_35(%arg0: i32) -> (i32, i32, i32) {
    %c0_i32 = arith.constant 0 : i32
    %c0_i32_0 = arith.constant 0 : i32
    %c0_i32_1 = arith.constant 0 : i32
    return %arg0, %c0_i32, %c0_i32_0 : i32, i32, i32
  }
}

</mosaic_0001>

<bundles_post_ra>
// kernel: resnet1d_forward.1
= control target key start
LH: loop header
LB: loop body
LE: loop exit
PB: predicated region body
PF: predicated region fallthrough
CT: control target
= control target key end

     0   :  { %s9938_s6 = smov 1   ;;  %s9939_s10 = smov 2   ;;  %s11422_s0 = inlined_call_operand.smem [shape: u32[36], index: -1, kind: input, shape index: {}] }
   0x1   :  { %s10014_s5 = sld [smem:[%s11422_s0]]   ;;  %s9940_s14 = smov 3  }
   0x2   :  { %s10019_s9 = sld [smem:[%s11422_s0 + %s9938_s6]]   ;;  %s9941_s18 = smov 4  }
   0x3   :  { %s10024_s13 = sld [smem:[%s11422_s0 + %s9939_s10]]   ;;  %s9942_s22 = smov 5  }
   0x4   :  { %s10029_s17 = sld [smem:[%s11422_s0 + %s9940_s14]]   ;;  %s9943_s26 = smov 6  }
   0x5   :  { %s10034_s21 = sld [smem:[%s11422_s0 + %s9941_s18]]   ;;  %s9944_s30 = smov 7  }
   0x6   :  { %s10039_s25 = sld [smem:[%s11422_s0 + %s9942_s22]]   ;;  %s9945_s4 = smov 8  }
   0x7   :  { %11471 = sst [smem:[#allocation55_spill]] %s10014_s5  ;;  %s9946_s10 = smov 9  }
   0x8   :  { %s10044_s29 = sld [smem:[%s11422_s0 + %s9943_s26]]   ;;  %s9947_s15 = smov 10  }
   0x9   :  { %11472 = sst [smem:[#allocation56_spill]] %s10024_s13  ;;  %s9948_s20 = smov 11  }
   0xa   :  { %11473 = sst [smem:[#allocation57_spill]] %s10029_s17  ;;  %s9949_s26 = smov 12  }
   0xb   :  { %s10049_s3 = sld [smem:[%s11422_s0 + %s9944_s30]]   ;;  %s9950_s1 = smov 13  }
   0xc   :  { %11474 = sst [smem:[#allocation58_spill]] %s10039_s25  ;;  %s9951_s7 = smov 14  }
   0xd   :  { %s10054_s8 = sld [smem:[%s11422_s0 + %s9945_s4]]   ;;  %s9953_s22 = smov 16  }
   0xe   :  { %11475 = sst [smem:[#allocation59_spill]] %s10044_s29  ;;  %s9954_s28 = smov 17  }
   0xf   :  { %s10059_s14 = sld [smem:[%s11422_s0 + %s9946_s10]]  }
  0x10   :  { %s10064_s19 = sld [smem:[%s11422_s0 + %s9947_s15]]   ;;  %s9952_s15 = smov 15  }
  0x11   :  { %11476 = sst [smem:[#allocation60_spill]] %s10049_s3 }
  0x12   :  { %s10069_s24 = sld [smem:[%s11422_s0 + %s9948_s20]]  }
  0x13   :  { %11477 = sst [smem:[#allocation61_spill]] %s10054_s8 }
  0x14   :  { %s10074_s30 = sld [smem:[%s11422_s0 + %s9949_s26]]  }
  0x15   :  { %11478 = sst [smem:[#allocation62_spill]] %s10059_s14 }
  0x16   :  { %11479 = sst [smem:[#allocation63_spill]] %s10064_s19 }
  0x17   :  { %s10079_s6 = sld [smem:[%s11422_s0 + %s9950_s1]]  }
  0x18   :  { %11480 = sst [smem:[#allocation64_spill]] %s10069_s24 }
  0x19   :  { %s10084_s12 = sld [smem:[%s11422_s0 + %s9951_s7]]   ;;  %s9955_s7 = smov 18  }
  0x1a   :  { %s10089_s20 = sld [smem:[%s11422_s0 + %s9952_s15]]   ;;  %s9956_s15 = smov 19  }
  0x1b   :  { %s10094_s27 = sld [smem:[%s11422_s0 + %s9953_s22]]   ;;  %s9957_s22 = smov 20  }
  0x1c   :  { %s10099_s4 = sld [smem:[%s11422_s0 + %s9954_s28]]   ;;  %s9958_s28 = smov 21  }
  0x1d   :  { %11481 = sst [smem:[#allocation65_spill]] %s10079_s6 }
  0x1e   :  { %s10104_s24 = sld [smem:[%s11422_s0 + %s9955_s7]]   ;;  %s9959_s7 = smov 22  }
  0x1f   :  { %s10114_s14 = sld [smem:[%s11422_s0 + %s9957_s22]]   ;;  %s9961_s22 = smov 24  }
  0x20   :  { %11482 = sst [smem:[#allocation66_spill]] %s10089_s20 }
  0x21   :  { %11483 = sst [smem:[#allocation67_spill]] %s10094_s27 }
  0x22   :  { %11484 = sst [smem:[#allocation68_spill]] %s10099_s4 }
  0x23   :  { %s10109_s20 = sld [smem:[%s11422_s0 + %s9956_s15]]   ;;  %s9960_s15 = smov 23  }
  0x24   :  { %s10119_s4 = sld [smem:[%s11422_s0 + %s9958_s28]]   ;;  %s9962_s28 = smov 25  }
  0x25   :  { %s10124_s25 = sld [smem:[%s11422_s0 + %s9959_s7]]   ;;  %s9963_s7 = smov 26  }
  0x26   :  { %s10129_s17 = sld [smem:[%s11422_s0 + %s9960_s15]]   ;;  %s9964_s15 = smov 27  }
  0x27   :  { %s10134_s5 = sld [smem:[%s11422_s0 + %s9961_s22]]   ;;  %s9965_s22 = smov 28  }
  0x29   :  { %11485 = sst [smem:[#allocation69_spill]] %s10109_s20 }
  0x2a   :  { %11486 = sst [smem:[#allocation70_spill]] %s10119_s4 }
  0x2b   :  { %11487 = sst [smem:[#allocation71_spill]] %s10124_s25 }
  0x2c   :  { %s10139_s4 = sld [smem:[%s11422_s0 + %s9962_s28]]   ;;  %s9966_s28 = smov 29  }
  0x2d   :  { %11488 = sst [smem:[#allocation72_spill]] %s10134_s5 }
  0x2e   :  { %s10144_s25 = sld [smem:[%s11422_s0 + %s9963_s7]]   ;;  %s9967_s7 = smov 30  }
  0x2f   :  { %s10149_s20 = sld [smem:[%s11422_s0 + %s9964_s15]]   ;;  %s9968_s15 = smov 31  }
  0x30   :  { %s10154_s5 = sld [smem:[%s11422_s0 + %s9965_s22]]   ;;  %s9969_s22 = smov 32  }
  0x31   :  { %s10159_s27 = sld [smem:[%s11422_s0 + %s9966_s28]]   ;;  %s9970_s28 = smov 33  }
  0x32   :  { %11489 = sst [smem:[#allocation73_spill]] %s10139_s4 }
  0x33   :  { %s10174_s6 = sld [smem:[%s11422_s0 + %s9969_s22]]  }
  0x34   :  { %11490 = sst [smem:[#allocation74_spill]] %s10144_s25 }
  0x35   :  { %11491 = sst [smem:[#allocation75_spill]] %s10149_s20 }
  0x36   :  { %11492 = sst [smem:[#allocation76_spill]] %s10154_s5 }
  0x37   :  { %11493 = sst [smem:[#allocation77_spill]] %s10159_s27 }
  0x38   :  { %s10164_s25 = sld [smem:[%s11422_s0 + %s9967_s7]]   ;;  %s9971_s7 = smov 34  }
  0x39   :  { %s10169_s20 = sld [smem:[%s11422_s0 + %s9968_s15]]   ;;  %s9972_s15 = smov 35  }
  0x3a   :  { %11495 = sst [smem:[#allocation79_spill]] %s10174_s6 }
  0x3b   :  { %s10179_s27 = sld [smem:[%s11422_s0 + %s9970_s28]]  }
  0x3c   :  { %s10189_s19 = sld [smem:[%s11422_s0 + %s9972_s15]]  }
  0x3e   :  { %11494 = sst [smem:[#allocation78_spill]] %s10164_s25 }
  0x3f   :  { %s10184_s25 = sld [smem:[%s11422_s0 + %s9971_s7]]  }
  0x40   :  { %76 = vsyncpa [#allocation3], 0 }
  0x41   :  { %77 = vsyncpa [#allocation6], 0 }
  0x42   :  { %78 = vsyncpa [#allocation9], 0 }
  0x43   :  { %79 = vsyncpa [#allocation12], 0 }
  0x44   :  { %80 = vsyncpa [#allocation15], 0 }
  0x45   :  { %81 = vsyncpa [#allocation18], 0 }
  0x46   :  { %82 = vsyncpa [#allocation21], 0 }
  0x47   :  { %83 = vsyncpa [#allocation24], 0 }
  0x48   :  { %84 = vsyncpa [#allocation27], 0 }
  0x49   :  { %85 = vsyncpa [#allocation30], 0 }
  0x4a   :  { %86 = vsyncpa [#allocation33], 0 }
  0x4b   :  { %87 = vsyncpa [#allocation36], 0 }
  0x4c   :  { %88 = vsyncpa [#allocation39], 0 }
  0x4d   :  { %89 = vsyncpa [#allocation4], 0 }
  0x4e   :  { %91 = vsyncpa [#allocation4 + $0x1], 0  ;;  %s10191_s22 = smov 0   ;;  %s10193_s23 = smov 0  }
  0x4f   :  { %s10195_s0 = smov 0   ;;  %s10197_s26 = smov 0  }
  0x50 LB: > { %s11496_s6 = sld [smem:[#allocation79_spill]]  ;;  %s11497_s5 = sld [smem:[#allocation76_spill]]  ;;  %s9932_s0 = sphi %s10195_s0, %s11572_s0   ;;  %s9928_s23 = sphi %s10193_s23, %s11574_s23   ;;  %s9924_s22 = sphi %s10191_s22, %s11573_s22   ;;  %s9936_s26 = sphi %s10197_s26, %s11570_s26  }
  0x51   : > { %s11498_s4 = sld [smem:[#allocation73_spill]]  ;;  %s11499_s3 = sld [smem:[#allocation60_spill]] }
  0x52   : > { %s11500_s8 = sld [smem:[#allocation61_spill]]  ;;  %s11501_s29 = sld [smem:[#allocation59_spill]] }
  0x53   : > { %s11502_s13 = sld [smem:[#allocation56_spill]]  ;;  %11503 = sst [smem:[#allocation80_spill]] %s9924_s22 }
  0x54   : > { %11504 = sst [smem:[#allocation81_spill]] %s9932_s0  ;;  %s10212_s28 = sadd.s32 4294967295, %s9936_s26  }
  0x55   : > { %s7002_s1 = sadd.s32 4294967294, %s9936_s26   ;;  %s10216_s2 = sadd.s32 1, %s9936_s26  }
  0x56   : > { %11505 = sst [smem:[#allocation82_spill]] %s10216_s2  ;;  %s844_s7 = sadd.s32 1, %s9932_s0 }
  0x57   : > { %s841_s10 = ssub.s32 %s9936_s26, %s10216_s2  ;;  %p854_p0 = scmp.ne.s32.totalorder %s9932_s0, %s9928_s23 }
  0x58   : > { %p842_p1 = scmp.eq.s32.totalorder %s841_s10, 0  ;;  %p855_p2 = scmp.eq.s32.totalorder %s10212_s28, 1 }
  0x59   : > { %p860_p3 = scmp.ne.s32.totalorder %s9928_s23, %s9924_s22  ;;  %p861_p4 = scmp.eq.s32.totalorder %s7002_s1, 1 }
  0x5a   : > { %s10227_s11 = scalar_select %p842_p1, %s9932_s0, %s844_s7  }
  0x5b   : > { %p10229_p5 = por %p855_p2, %p854_p0  ;;  %p10233_p6 = por %p861_p4, %p860_p3 }
  0x5c   : > { %11506 = sst [smem:[#allocation83_spill]] %s10227_s11  ;;  %p7003_p7 = scmp.ge.s32.totalorder %s9936_s26, 1 }
  0x5d   : > { %s11507_s15 = scalar_select %p10229_p5, 1, 0 }
  0x5e   : > { %s11508_s16 = scalar_select %p10233_p6, 1, 0 }
  0x5f   : > { %p868_p8 = scmp.lt.s32.totalorder %s9936_s26, 3  ;;  %p11445_p9 = scmp.eq.s32.totalorder %s10212_s28, 0 }
  0x60   : > { %11509 = sst [smem:[#allocation84_spill]] %s11508_s16  ;;  %s9973_s1 = smov [#allocation5]  }
  0x61   : > { %p10240_p10 = pnand %p7003_p7, %p868_p8  ;;  %s894_s7 = sshll.u32 %s9973_s1, 4  ;;  %s895_s7 = int_to_ptr.vmem [resolvable:$true] %s894_s7 }
  0x62   : > { %s9974_s10 = smov [#allocation8]   ;;  %s9975_s2 = smov [#allocation11]  }
  0x63   : > { %s11510_s18 = scalar_select %p10240_p10, 1, 0 }
  0x64   : > { %p8892_p11 = pneg %p10240_p10  ;;  %s922_s11 = sshll.u32 %s9974_s10, 4  ;;  %s10252_s11 = int_to_ptr.vmem [resolvable:$true] %s922_s11 }
  0x65   : > { %s944_s16 = sshll.u32 %s9975_s2, 4  ;;  %s9150_s22 = scalar_lea.hbm %s11502_s13, 16  ;;  %s10254_s16 = int_to_ptr.vmem [resolvable:$true] %s944_s16 }
  0x66   : > { %p10248_p12 = pnand %p11445_p9, %p8892_p11  ;;  %p9151_p13 = scmp.ne.s32.totalorder %s11502_s13, %s9150_s22 }
  0x67   : > { %p9157_p3 = scmp.lt.u32.totalorder %s9150_s22, %s11502_s13 }
  0x68   : > { %p10260_p0 = pneg %p10248_p12 }
  0x6a   : > { %p9153_p1 = pnand %p10260_p0, %p9151_p13 }
  0x6c   : > { %p9154_p2 = pneg %p9153_p1 }
  0x6e   : > { %p9159_p4 = pnand %p9157_p3, %p9154_p2 }
  0x70   : > { %9162 = shalt.err (!%p9159_p4)
}
  0x71   : > { %s9163_s10 = scalar_lea.vmem %s895_s7, 16  ;;  %s9170_s2 = scalar_lea.vmem %s895_s7, 32 }
  0x72   : > { %p9164_p7 = scmp.ne.s32.totalorder %s895_s7, %s9163_s10  ;;  %p9171_p9 = scmp.lt.s32.totalorder %s895_s7, %s895_s7 }
  0x73   : > { %p9172_p6 = scmp.lt.s32.totalorder %s9170_s2, %s9163_s10 }
  0x74   : > { %p9166_p8 = pnand %p9164_p7, %p10260_p0 }
  0x75   : > { %p9173_p5 = por %p9172_p6, %p9171_p9 }
  0x76   : > { %p9167_p11 = pneg %p9166_p8 }
  0x78   : > { %p9174_p10 = pnand %p9173_p5, %p9167_p11 }
  0x7a   : > { %9177 = shalt.err (!%p9174_p10)
}
  0x7b   : > { %8898 = dma.hbm_to_vmem [thread:$0]  (!%p10248_p12), %s11502_s13, 16, %s895_s7, [#allocation6]  }
  0x7c   : > { %s9178_s22 = scalar_lea.hbm %s11501_s29, 16 }
  0x7d   : > { %p9179_p13 = scmp.ne.s32.totalorder %s11501_s29, %s9178_s22  ;;  %p9185_p3 = scmp.lt.u32.totalorder %s9178_s22, %s11501_s29 }
  0x7f   : > { %p9181_p1 = pnand %p9179_p13, %p10260_p0 }
  0x81   : > { %p9182_p2 = pneg %p9181_p1 }
  0x83   : > { %p9187_p4 = pnand %p9185_p3, %p9182_p2 }
  0x85   : > { %9190 = shalt.err (!%p9187_p4)
}
  0x86   : > { %s9191_s10 = scalar_lea.vmem %s10252_s11, 16  ;;  %s9198_s2 = scalar_lea.vmem %s10252_s11, 32 }
  0x87   : > { %p9192_p5 = scmp.ne.s32.totalorder %s10252_s11, %s9191_s10  ;;  %p9199_p10 = scmp.lt.s32.totalorder %s10252_s11, %s10252_s11 }
  0x88   : > { %p9200_p7 = scmp.lt.s32.totalorder %s9198_s2, %s9191_s10 }
  0x89   : > { %p9194_p6 = pnand %p9192_p5, %p10260_p0 }
  0x8a   : > { %p9201_p8 = por %p9200_p7, %p9199_p10 }
  0x8b   : > { %p9195_p9 = pneg %p9194_p6 }
  0x8d   : > { %p9202_p11 = pnand %p9201_p8, %p9195_p9 }
  0x8f   : > { %9205 = shalt.err (!%p9202_p11)
}
  0x90   : > { %8904 = dma.hbm_to_vmem [thread:$0]  (!%p10248_p12), %s11501_s29, 16, %s10252_s11, [#allocation9]  }
  0x91   : > { %s9206_s7 = scalar_lea.hbm %s11500_s8, 16 }
  0x92   : > { %p9207_p13 = scmp.ne.s32.totalorder %s11500_s8, %s9206_s7  ;;  %p9213_p3 = scmp.lt.u32.totalorder %s9206_s7, %s11500_s8 }
  0x94   : > { %p9209_p1 = pnand %p9207_p13, %p10260_p0 }
  0x96   : > { %p9210_p2 = pneg %p9209_p1 }
  0x98   : > { %p9215_p4 = pnand %p9213_p3, %p9210_p2 }
  0x9a   : > { %9218 = shalt.err (!%p9215_p4)
}
  0x9b   : > { %s9219_s22 = scalar_lea.vmem %s10254_s16, 16  ;;  %s9226_s10 = scalar_lea.vmem %s10254_s16, 32 }
  0x9c   : > { %p9220_p5 = scmp.ne.s32.totalorder %s10254_s16, %s9219_s22  ;;  %p9227_p10 = scmp.lt.s32.totalorder %s10254_s16, %s10254_s16 }
  0x9d   : > { %p9228_p7 = scmp.lt.s32.totalorder %s9226_s10, %s9219_s22 }
  0x9e   : > { %p9222_p6 = pnand %p9220_p5, %p10260_p0 }
  0x9f   : > { %p9229_p8 = por %p9228_p7, %p9227_p10 }
  0xa0   : > { %p9223_p9 = pneg %p9222_p6 }
  0xa2   : > { %p9230_p11 = pnand %p9229_p8, %p9223_p9 }
  0xa4   : > { %9233 = shalt.err (!%p9230_p11)
}
  0xa5   : > { %8910 = dma.hbm_to_vmem [thread:$0]  (!%p10248_p12), %s11500_s8, 16, %s10254_s16, [#allocation12]  }
  0xa6   : > { %s9976_s11 = smov [#allocation14]   ;;  %s9977_s7 = smov [#allocation17]  }
  0xa7   : > { %s972_s2 = sshll.u32 %s9976_s11, 4  ;;  %s994_s13 = sshll.u32 %s9977_s7, 4  ;;  %s973_s2 = int_to_ptr.vmem [resolvable:$true] %s972_s2  ;;  %s995_s13 = int_to_ptr.vmem [resolvable:$true] %s994_s13 }
  0xa8   : > { %s9234_s29 = scalar_lea.hbm %s10074_s30, 16 }
  0xa9   : > { %p9235_p13 = scmp.ne.s32.totalorder %s10074_s30, %s9234_s29  ;;  %p9241_p3 = scmp.lt.u32.totalorder %s9234_s29, %s10074_s30 }
  0xab   : > { %p9237_p1 = pnand %p9235_p13, %p10260_p0 }
  0xad   : > { %p9238_p2 = pneg %p9237_p1 }
  0xaf   : > { %p9243_p4 = pnand %p9241_p3, %p9238_p2 }
  0xb1   : > { %9246 = shalt.err (!%p9243_p4)
}
  0xb2   : > { %s9247_s22 = scalar_lea.vmem %s973_s2, 16  ;;  %s9254_s16 = scalar_lea.vmem %s973_s2, 32 }
  0xb3   : > { %p9248_p5 = scmp.ne.s32.totalorder %s973_s2, %s9247_s22  ;;  %p9255_p10 = scmp.lt.s32.totalorder %s973_s2, %s973_s2 }
  0xb4   : > { %p9256_p7 = scmp.lt.s32.totalorder %s9254_s16, %s9247_s22 }
  0xb5   : > { %p9250_p6 = pnand %p9248_p5, %p10260_p0 }
  0xb6   : > { %p9257_p8 = por %p9256_p7, %p9255_p10 }
  0xb7   : > { %p9251_p9 = pneg %p9250_p6 }
  0xb9   : > { %p9258_p11 = pnand %p9257_p8, %p9251_p9 }
  0xbb   : > { %9261 = shalt.err (!%p9258_p11)
}
  0xbc   : > { %8916 = dma.hbm_to_vmem [thread:$0]  (!%p10248_p12), %s10074_s30, 16, %s973_s2, [#allocation15]  }
  0xbd   : > { %s9262_s29 = scalar_lea.hbm %s10084_s12, 16 }
  0xbe   : > { %p9263_p13 = scmp.ne.s32.totalorder %s10084_s12, %s9262_s29  ;;  %p9269_p3 = scmp.lt.u32.totalorder %s9262_s29, %s10084_s12 }
  0xc0   : > { %p9265_p1 = pnand %p9263_p13, %p10260_p0 }
  0xc2   : > { %p9266_p2 = pneg %p9265_p1 }
  0xc4   : > { %p9271_p4 = pnand %p9269_p3, %p9266_p2 }
  0xc6   : > { %9274 = shalt.err (!%p9271_p4)
}
  0xc7   : > { %s9275_s10 = scalar_lea.vmem %s995_s13, 16  ;;  %s9282_s11 = scalar_lea.vmem %s995_s13, 32 }
  0xc8   : > { %p9276_p5 = scmp.ne.s32.totalorder %s995_s13, %s9275_s10  ;;  %p9283_p10 = scmp.lt.s32.totalorder %s995_s13, %s995_s13 }
  0xc9   : > { %p9284_p7 = scmp.lt.s32.totalorder %s9282_s11, %s9275_s10 }
  0xca   : > { %p9278_p6 = pnand %p9276_p5, %p10260_p0 }
  0xcb   : > { %p9285_p8 = por %p9284_p7, %p9283_p10 }
  0xcc   : > { %p9279_p9 = pneg %p9278_p6 }
  0xce   : > { %p9286_p11 = pnand %p9285_p8, %p9279_p9 }
  0xd0   : > { %9289 = shalt.err (!%p9286_p11)
}
  0xd1   : > { %8922 = dma.hbm_to_vmem [thread:$0]  (!%p10248_p12), %s10084_s12, 16, %s995_s13, [#allocation18]  }
  0xd2   : > { %s9978_s2 = smov [#allocation20]   ;;  %s9979_s22 = smov [#allocation23]  }
  0xd3   : > { %s1022_s7 = sshll.u32 %s9978_s2, 4  ;;  %s1044_s16 = sshll.u32 %s9979_s22, 4  ;;  %s1023_s7 = int_to_ptr.vmem [resolvable:$true] %s1022_s7  ;;  %s1045_s16 = int_to_ptr.vmem [resolvable:$true] %s1044_s16 }
  0xd4   : > { %s9290_s29 = scalar_lea.hbm %s10104_s24, 16 }
  0xd5   : > { %p9291_p13 = scmp.ne.s32.totalorder %s10104_s24, %s9290_s29  ;;  %p9297_p3 = scmp.lt.u32.totalorder %s9290_s29, %s10104_s24 }
  0xd7   : > { %p9293_p1 = pnand %p9291_p13, %p10260_p0 }
  0xd9   : > { %p9294_p2 = pneg %p9293_p1 }
  0xdb   : > { %p9299_p4 = pnand %p9297_p3, %p9294_p2 }
  0xdd   : > { %9302 = shalt.err (!%p9299_p4)
}
  0xde   : > { %s9303_s10 = scalar_lea.vmem %s1023_s7, 16  ;;  %s9310_s13 = scalar_lea.vmem %s1023_s7, 32 }
  0xdf   : > { %p9304_p5 = scmp.ne.s32.totalorder %s1023_s7, %s9303_s10  ;;  %p9311_p10 = scmp.lt.s32.totalorder %s1023_s7, %s1023_s7 }
  0xe0   : > { %p9312_p7 = scmp.lt.s32.totalorder %s9310_s13, %s9303_s10 }
  0xe1   : > { %p9306_p6 = pnand %p9304_p5, %p10260_p0 }
  0xe2   : > { %p9313_p8 = por %p9312_p7, %p9311_p10 }
  0xe3   : > { %p9307_p9 = pneg %p9306_p6 }
  0xe5   : > { %p9314_p11 = pnand %p9313_p8, %p9307_p9 }
  0xe7   : > { %9317 = shalt.err (!%p9314_p11)
}
  0xe8   : > { %8928 = dma.hbm_to_vmem [thread:$0]  (!%p10248_p12), %s10104_s24, 16, %s1023_s7, [#allocation21]  }
  0xe9   : > { %s9318_s11 = scalar_lea.hbm %s10114_s14, 16 }
  0xea   : > { %p9319_p13 = scmp.ne.s32.totalorder %s10114_s14, %s9318_s11  ;;  %p9325_p3 = scmp.lt.u32.totalorder %s9318_s11, %s10114_s14 }
  0xec   : > { %p9321_p1 = pnand %p9319_p13, %p10260_p0 }
  0xee   : > { %p9322_p2 = pneg %p9321_p1 }
  0xf0   : > { %p9327_p4 = pnand %p9325_p3, %p9322_p2 }
  0xf2   : > { %9330 = shalt.err (!%p9327_p4)
}
  0xf3   : > { %s9331_s2 = scalar_lea.vmem %s1045_s16, 16  ;;  %s9338_s22 = scalar_lea.vmem %s1045_s16, 32 }
  0xf4   : > { %p9332_p5 = scmp.ne.s32.totalorder %s1045_s16, %s9331_s2  ;;  %p9339_p10 = scmp.lt.s32.totalorder %s1045_s16, %s1045_s16 }
  0xf5   : > { %p9340_p7 = scmp.lt.s32.totalorder %s9338_s22, %s9331_s2 }
  0xf6   : > { %p9334_p6 = pnand %p9332_p5, %p10260_p0 }
  0xf7   : > { %p9341_p8 = por %p9340_p7, %p9339_p10 }
  0xf8   : > { %p9335_p9 = pneg %p9334_p6 }
  0xfa   : > { %p9342_p11 = pnand %p9341_p8, %p9335_p9 }
  0xfc   : > { %9345 = shalt.err (!%p9342_p11)
}
  0xfd   : > { %8934 = dma.hbm_to_vmem [thread:$0]  (!%p10248_p12), %s10114_s14, 16, %s1045_s16, [#allocation24]  }
  0xfe   : > { %s9980_s7 = smov [#allocation26]   ;;  %s9346_s10 = scalar_lea.hbm %s10129_s17, 384 }
  0xff   : > { %s1068_s29 = sshll.u32 %s9980_s7, 4  ;;  %p9347_p13 = scmp.ne.s32.totalorder %s10129_s17, %s9346_s10  ;;  %s1069_s29 = int_to_ptr.vmem [resolvable:$true] %s1068_s29 }
 0x100   : > { %p9353_p3 = scmp.lt.u32.totalorder %s9346_s10, %s10129_s17 }
 0x101   : > { %p9349_p1 = pnand %p9347_p13, %p10260_p0 }
 0x103   : > { %p9350_p2 = pneg %p9349_p1 }
 0x105   : > { %p9355_p4 = pnand %p9353_p3, %p9350_p2 }
 0x107   : > { %9358 = shalt.err (!%p9355_p4)
}
 0x108   : > { %s9359_s13 = scalar_lea.vmem %s1069_s29, 384  ;;  %p9367_p10 = scmp.lt.s32.totalorder %s1069_s29, %s1069_s29 }
 0x109   : > { %p9360_p5 = scmp.ne.s32.totalorder %s1069_s29, %s9359_s13  ;;  %p9368_p7 = scmp.lt.s32.totalorder %s9359_s13, %s9359_s13 }
 0x10b   : > { %p9362_p6 = pnand %p9360_p5, %p10260_p0  ;;  %p9369_p8 = por %p9368_p7, %p9367_p10 }
 0x10d   : > { %p9363_p9 = pneg %p9362_p6 }
 0x10f   : > { %p9370_p11 = pnand %p9369_p8, %p9363_p9 }
 0x111   : > { %9373 = shalt.err (!%p9370_p11)
}
 0x112   : > { %s9981_s16 = smov 64   ;;  %s9982_s11 = smov 4  }
 0x113   : > { %8940 = dma.hbm_to_vmem [thread:$0]  (!%p10248_p12), %s10129_s17, 384, %s1069_s29, [#allocation27], %s9981_s16, %s9981_s16, %s9982_s11  }
 0x114   : > { %s9983_s2 = smov [#allocation29]   ;;  %s9984_s7 = smov [#allocation32]  }
 0x115   : > { %s1093_s22 = sshll.u32 %s9983_s2, 4  ;;  %s1118_s10 = sshll.u32 %s9984_s7, 4  ;;  %s1094_s22 = int_to_ptr.vmem [resolvable:$true] %s1093_s22  ;;  %s10354_s10 = int_to_ptr.vmem [resolvable:$true] %s1118_s10 }
 0x116   : > { %s9374_s13 = scalar_lea.hbm %s11498_s4, 16 }
 0x117   : > { %p9375_p13 = scmp.ne.s32.totalorder %s11498_s4, %s9374_s13  ;;  %p9381_p3 = scmp.lt.u32.totalorder %s9374_s13, %s11498_s4 }
 0x119   : > { %p9377_p1 = pnand %p9375_p13, %p10260_p0 }
 0x11b   : > { %p9378_p2 = pneg %p9377_p1 }
 0x11d   : > { %p9383_p4 = pnand %p9381_p3, %p9378_p2 }
 0x11f   : > { %9386 = shalt.err (!%p9383_p4)
}
 0x120   : > { %s9387_s8 = scalar_lea.vmem %s1094_s22, 16  ;;  %s9394_s29 = scalar_lea.vmem %s1094_s22, 32 }
 0x121   : > { %p9388_p5 = scmp.ne.s32.totalorder %s1094_s22, %s9387_s8  ;;  %p9395_p10 = scmp.lt.s32.totalorder %s1094_s22, %s1094_s22 }
 0x122   : > { %p9396_p7 = scmp.lt.s32.totalorder %s9394_s29, %s9387_s8 }
 0x123   : > { %p9390_p6 = pnand %p9388_p5, %p10260_p0 }
 0x124   : > { %p9397_p8 = por %p9396_p7, %p9395_p10 }
 0x125   : > { %p9391_p9 = pneg %p9390_p6 }
 0x127   : > { %p9398_p11 = pnand %p9397_p8, %p9391_p9 }
 0x129   : > { %9401 = shalt.err (!%p9398_p11)
}
 0x12a   : > { %8946 = dma.hbm_to_vmem [thread:$0]  (!%p10248_p12), %s11498_s4, 16, %s1094_s22, [#allocation30]  }
 0x12b   : > { %s9402_s16 = scalar_lea.hbm %s11497_s5, 16 }
 0x12c   : > { %p9403_p13 = scmp.ne.s32.totalorder %s11497_s5, %s9402_s16  ;;  %p9409_p3 = scmp.lt.u32.totalorder %s9402_s16, %s11497_s5 }
 0x12e   : > { %p9405_p1 = pnand %p9403_p13, %p10260_p0 }
 0x130   : > { %p9406_p2 = pneg %p9405_p1 }
 0x132   : > { %p9411_p4 = pnand %p9409_p3, %p9406_p2 }
 0x134   : > { %9414 = shalt.err (!%p9411_p4)
}
 0x135   : > { %s9415_s8 = scalar_lea.vmem %s10354_s10, 16  ;;  %s9422_s11 = scalar_lea.vmem %s10354_s10, 32 }
 0x136   : > { %p9416_p5 = scmp.ne.s32.totalorder %s10354_s10, %s9415_s8  ;;  %p9423_p10 = scmp.lt.s32.totalorder %s10354_s10, %s10354_s10 }
 0x137   : > { %p9424_p7 = scmp.lt.s32.totalorder %s9422_s11, %s9415_s8 }
 0x138   : > { %p9418_p6 = pnand %p9416_p5, %p10260_p0 }
 0x139   : > { %p9425_p8 = por %p9424_p7, %p9423_p10 }
 0x13a   : > { %p9419_p9 = pneg %p9418_p6 }
 0x13c   : > { %p9426_p11 = pnand %p9425_p8, %p9419_p9 }
 0x13e   : > { %9429 = shalt.err (!%p9426_p11)
}
 0x13f   : > { %8952 = dma.hbm_to_vmem [thread:$0]  (!%p10248_p12), %s11497_s5, 16, %s10354_s10, [#allocation33]  }
 0x140   : > { %s9985_s2 = smov [#allocation35]   ;;  %s9986_s7 = smov [#allocation2]  }
 0x141   : > { %s1143_s22 = sshll.u32 %s9985_s2, 4  ;;  %s880_s13 = sshll.u32 %s9986_s7, 4  ;;  %s1144_s22 = int_to_ptr.vmem [resolvable:$true] %s1143_s22  ;;  %s10382_s13 = int_to_ptr.vmem [resolvable:$true] %s880_s13 }
 0x142   : > { %s9430_s29 = scalar_lea.hbm %s10169_s20, 16 }
 0x143   : > { %p9431_p13 = scmp.ne.s32.totalorder %s10169_s20, %s9430_s29  ;;  %p9437_p3 = scmp.lt.u32.totalorder %s9430_s29, %s10169_s20 }
 0x145   : > { %p9433_p1 = pnand %p9431_p13, %p10260_p0 }
 0x147   : > { %p9434_p2 = pneg %p9433_p1 }
 0x149   : > { %p9439_p4 = pnand %p9437_p3, %p9434_p2 }
 0x14b   : > { %9442 = shalt.err (!%p9439_p4)
}
 0x14c   : > { %s9443_s16 = scalar_lea.vmem %s1144_s22, 16  ;;  %s9450_s10 = scalar_lea.vmem %s1144_s22, 32 }
 0x14d   : > { %p9444_p5 = scmp.ne.s32.totalorder %s1144_s22, %s9443_s16  ;;  %p9451_p10 = scmp.lt.s32.totalorder %s1144_s22, %s1144_s22 }
 0x14e   : > { %p9452_p7 = scmp.lt.s32.totalorder %s9450_s10, %s9443_s16 }
 0x14f   : > { %p9446_p6 = pnand %p9444_p5, %p10260_p0 }
 0x150   : > { %p9453_p8 = por %p9452_p7, %p9451_p10 }
 0x151   : > { %p9447_p9 = pneg %p9446_p6 }
 0x153   : > { %p9454_p11 = pnand %p9453_p8, %p9447_p9 }
 0x155   : > { %9457 = shalt.err (!%p9454_p11)
}
 0x156   : > { %8958 = dma.hbm_to_vmem [thread:$0]  (!%p10248_p12), %s10169_s20, 16, %s1144_s22, [#allocation36]  }
 0x157   : > { %s9458_s8 = scalar_lea.hbm %s10019_s9, 96 }
 0x158   : > { %p9459_p13 = scmp.ne.s32.totalorder %s10019_s9, %s9458_s8  ;;  %p9465_p3 = scmp.lt.u32.totalorder %s9458_s8, %s10019_s9 }
 0x15a   : > { %p9461_p1 = pnand %p9459_p13, %p10260_p0 }
 0x15c   : > { %p9462_p2 = pneg %p9461_p1 }
 0x15e   : > { %p9467_p4 = pnand %p9465_p3, %p9462_p2 }
 0x160   : > { %9470 = shalt.err (!%p9467_p4)
}
 0x161   : > { %s9471_s11 = scalar_lea.vmem %s10382_s13, 96  ;;  %p9479_p10 = scmp.lt.s32.totalorder %s10382_s13, %s10382_s13 }
 0x162   : > { %p9472_p5 = scmp.ne.s32.totalorder %s10382_s13, %s9471_s11  ;;  %p9480_p7 = scmp.lt.s32.totalorder %s9471_s11, %s9471_s11 }
 0x164   : > { %p9474_p6 = pnand %p9472_p5, %p10260_p0  ;;  %p9481_p8 = por %p9480_p7, %p9479_p10 }
 0x166   : > { %p9475_p9 = pneg %p9474_p6 }
 0x168   : > { %p9482_p11 = pnand %p9481_p8, %p9475_p9 }
 0x16a   : > { %9485 = shalt.err (!%p9482_p11)
}
 0x16b   : > { %s9987_s2 = smov 32   ;;  %s9988_s22 = smov 2  }
 0x16c   : > { %8895 = dma.hbm_to_vmem [thread:$0]  (!%p10248_p12), %s10019_s9, 96, %s10382_s13, [#allocation3], %s9987_s2, %s9987_s2, %s9988_s22  }
 0x16d   : > { %s9989_s7 = smov [#allocation7]   ;;  %s9990_s16 = smov [#allocation10]  }
 0x16e   : > { %s908_s29 = sshll.u32 %s9989_s7, 4  ;;  %s933_s10 = sshll.u32 %s9990_s16, 4  ;;  %s909_s29 = int_to_ptr.vmem [resolvable:$true] %s908_s29  ;;  %s10409_s10 = int_to_ptr.vmem [resolvable:$true] %s933_s10 }
 0x16f   : > { %s9486_s8 = scalar_lea.hbm %s10034_s21, 16 }
 0x170   : > { %p9487_p13 = scmp.ne.s32.totalorder %s10034_s21, %s9486_s8  ;;  %p9493_p3 = scmp.lt.u32.totalorder %s9486_s8, %s10034_s21 }
 0x172   : > { %p9489_p1 = pnand %p9487_p13, %p10260_p0 }
 0x174   : > { %p9490_p2 = pneg %p9489_p1 }
 0x176   : > { %p9495_p4 = pnand %p9493_p3, %p9490_p2 }
 0x178   : > { %9498 = shalt.err (!%p9495_p4)
}
 0x179   : > { %s9499_s11 = scalar_lea.vmem %s909_s29, 16  ;;  %s9506_s13 = scalar_lea.vmem %s909_s29, 32 }
 0x17a   : > { %p9500_p5 = scmp.ne.s32.totalorder %s909_s29, %s9499_s11  ;;  %p9507_p10 = scmp.lt.s32.totalorder %s909_s29, %s909_s29 }
 0x17b   : > { %p9508_p7 = scmp.lt.s32.totalorder %s9506_s13, %s9499_s11 }
 0x17c   : > { %p9502_p6 = pnand %p9500_p5, %p10260_p0 }
 0x17d   : > { %p9509_p8 = por %p9508_p7, %p9507_p10 }
 0x17e   : > { %p9503_p9 = pneg %p9502_p6 }
 0x180   : > { %p9510_p11 = pnand %p9509_p8, %p9503_p9 }
 0x182   : > { %9513 = shalt.err (!%p9510_p11)
}
 0x183   : > { %8901 = dma.hbm_to_vmem [thread:$0]  (!%p10248_p12), %s10034_s21, 16, %s909_s29, [#allocation6]  }
 0x184   : > { %s9514_s2 = scalar_lea.hbm %s11499_s3, 16 }
 0x185   : > { %p9515_p13 = scmp.ne.s32.totalorder %s11499_s3, %s9514_s2  ;;  %p9521_p3 = scmp.lt.u32.totalorder %s9514_s2, %s11499_s3 }
 0x187   : > { %p9517_p1 = pnand %p9515_p13, %p10260_p0 }
 0x189   : > { %p9518_p2 = pneg %p9517_p1 }
 0x18b   : > { %p9523_p4 = pnand %p9521_p3, %p9518_p2 }
 0x18d   : > { %9526 = shalt.err (!%p9523_p4)
}
 0x18e   : > { %s9527_s22 = scalar_lea.vmem %s10409_s10, 16  ;;  %s9534_s7 = scalar_lea.vmem %s10409_s10, 32 }
 0x18f   : > { %p9528_p5 = scmp.ne.s32.totalorder %s10409_s10, %s9527_s22  ;;  %p9535_p10 = scmp.lt.s32.totalorder %s10409_s10, %s10409_s10 }
 0x190   : > { %p9536_p7 = scmp.lt.s32.totalorder %s9534_s7, %s9527_s22 }
 0x191   : > { %p9530_p6 = pnand %p9528_p5, %p10260_p0 }
 0x192   : > { %p9537_p8 = por %p9536_p7, %p9535_p10 }
 0x193   : > { %p9531_p9 = pneg %p9530_p6 }
 0x195   : > { %p9538_p11 = pnand %p9537_p8, %p9531_p9 }
 0x197   : > { %9541 = shalt.err (!%p9538_p11)
}
 0x198   : > { %s11513_s29 = sld [smem:[#allocation63_spill]]  ;;  %s9991_s16 = smov [#allocation13]  }
 0x199   : > { %8907 = dma.hbm_to_vmem [thread:$0]  (!%p10248_p12), %s11499_s3, 16, %s10409_s10, [#allocation9]  }
 0x19a   : > { %s958_s8 = sshll.u32 %s9991_s16, 4  ;;  %s9992_s11 = smov [#allocation16]   ;;  %s959_s8 = int_to_ptr.vmem [resolvable:$true] %s958_s8 }
 0x19b   : > { %s983_s13 = sshll.u32 %s9992_s11, 4  ;;  %s10437_s13 = int_to_ptr.vmem [resolvable:$true] %s983_s13 }
 0x19e   : > { %s9542_s2 = scalar_lea.hbm %s11513_s29, 16 }
 0x19f   : > { %p9543_p13 = scmp.ne.s32.totalorder %s11513_s29, %s9542_s2  ;;  %p9549_p3 = scmp.lt.u32.totalorder %s9542_s2, %s11513_s29 }
 0x1a1   : > { %p9545_p1 = pnand %p9543_p13, %p10260_p0 }
 0x1a3   : > { %p9546_p2 = pneg %p9545_p1 }
 0x1a5   : > { %p9551_p4 = pnand %p9549_p3, %p9546_p2 }
 0x1a7   : > { %9554 = shalt.err (!%p9551_p4)
}
 0x1a8   : > { %s9555_s22 = scalar_lea.vmem %s959_s8, 16  ;;  %s9562_s10 = scalar_lea.vmem %s959_s8, 32 }
 0x1a9   : > { %p9556_p5 = scmp.ne.s32.totalorder %s959_s8, %s9555_s22  ;;  %p9563_p10 = scmp.lt.s32.totalorder %s959_s8, %s959_s8 }
 0x1aa   : > { %p9564_p7 = scmp.lt.s32.totalorder %s9562_s10, %s9555_s22 }
 0x1ab   : > { %p9558_p6 = pnand %p9556_p5, %p10260_p0 }
 0x1ac   : > { %p9565_p8 = por %p9564_p7, %p9563_p10 }
 0x1ad   : > { %p9559_p9 = pneg %p9558_p6 }
 0x1af   : > { %p9566_p11 = pnand %p9565_p8, %p9559_p9 }
 0x1b1   : > { %9569 = shalt.err (!%p9566_p11)
}
 0x1b2   : > { %s11514_s7 = sld [smem:[#allocation65_spill]] }
 0x1b3   : > { %8913 = dma.hbm_to_vmem [thread:$0]  (!%p10248_p12), %s11513_s29, 16, %s959_s8, [#allocation12]  }
 0x1b8   : > { %s9570_s16 = scalar_lea.hbm %s11514_s7, 16 }
 0x1b9   : > { %p9571_p13 = scmp.ne.s32.totalorder %s11514_s7, %s9570_s16  ;;  %p9577_p3 = scmp.lt.u32.totalorder %s9570_s16, %s11514_s7 }
 0x1bb   : > { %p9573_p1 = pnand %p9571_p13, %p10260_p0 }
 0x1bd   : > { %p9574_p2 = pneg %p9573_p1 }
 0x1bf   : > { %p9579_p4 = pnand %p9577_p3, %p9574_p2 }
 0x1c1   : > { %9582 = shalt.err (!%p9579_p4)
}
 0x1c2   : > { %s9583_s11 = scalar_lea.vmem %s10437_s13, 16  ;;  %s9590_s2 = scalar_lea.vmem %s10437_s13, 32 }
 0x1c3   : > { %p9584_p5 = scmp.ne.s32.totalorder %s10437_s13, %s9583_s11  ;;  %p9591_p10 = scmp.lt.s32.totalorder %s10437_s13, %s10437_s13 }
 0x1c4   : > { %p9592_p7 = scmp.lt.s32.totalorder %s9590_s2, %s9583_s11 }
 0x1c5   : > { %p9586_p6 = pnand %p9584_p5, %p10260_p0 }
 0x1c6   : > { %p9593_p8 = por %p9592_p7, %p9591_p10 }
 0x1c7   : > { %p9587_p9 = pneg %p9586_p6 }
 0x1c9   : > { %p9594_p11 = pnand %p9593_p8, %p9587_p9 }
 0x1cb   : > { %9597 = shalt.err (!%p9594_p11)
}
 0x1cc   : > { %s11515_s8 = sld [smem:[#allocation67_spill]]  ;;  %s9993_s22 = smov [#allocation19]  }
 0x1cd   : > { %8919 = dma.hbm_to_vmem [thread:$0]  (!%p10248_p12), %s11514_s7, 16, %s10437_s13, [#allocation15]  }
 0x1ce   : > { %s1008_s10 = sshll.u32 %s9993_s22, 4  ;;  %s9994_s16 = smov [#allocation22]   ;;  %s1009_s10 = int_to_ptr.vmem [resolvable:$true] %s1008_s10 }
 0x1cf   : > { %s1033_s3 = sshll.u32 %s9994_s16, 4  ;;  %s10465_s3 = int_to_ptr.vmem [resolvable:$true] %s1033_s3 }
 0x1d2   : > { %s9598_s11 = scalar_lea.hbm %s11515_s8, 16 }
 0x1d3   : > { %p9599_p13 = scmp.ne.s32.totalorder %s11515_s8, %s9598_s11  ;;  %p9605_p3 = scmp.lt.u32.totalorder %s9598_s11, %s11515_s8 }
 0x1d5   : > { %p9601_p1 = pnand %p9599_p13, %p10260_p0 }
 0x1d7   : > { %p9602_p2 = pneg %p9601_p1 }
 0x1d9   : > { %p9607_p4 = pnand %p9605_p3, %p9602_p2 }
 0x1db   : > { %9610 = shalt.err (!%p9607_p4)
}
 0x1dc   : > { %s9611_s2 = scalar_lea.vmem %s1009_s10, 16  ;;  %s9618_s13 = scalar_lea.vmem %s1009_s10, 32 }
 0x1dd   : > { %p9612_p5 = scmp.ne.s32.totalorder %s1009_s10, %s9611_s2  ;;  %p9619_p10 = scmp.lt.s32.totalorder %s1009_s10, %s1009_s10 }
 0x1de   : > { %p9620_p7 = scmp.lt.s32.totalorder %s9618_s13, %s9611_s2 }
 0x1df   : > { %p9614_p6 = pnand %p9612_p5, %p10260_p0 }
 0x1e0   : > { %p9621_p8 = por %p9620_p7, %p9619_p10 }
 0x1e1   : > { %p9615_p9 = pneg %p9614_p6 }
 0x1e3   : > { %p9622_p11 = pnand %p9621_p8, %p9615_p9 }
 0x1e5   : > { %9625 = shalt.err (!%p9622_p11)
}
 0x1e6   : > { %s11516_s22 = sld [smem:[#allocation69_spill]] }
 0x1e7   : > { %8925 = dma.hbm_to_vmem [thread:$0]  (!%p10248_p12), %s11515_s8, 16, %s1009_s10, [#allocation18]  }
 0x1ec   : > { %s11517_s16 = smov %s11516_s22  ;;  %s9626_s11 = scalar_lea.hbm %s11516_s22, 16 }
 0x1ed   : > { %p9627_p13 = scmp.ne.s32.totalorder %s11517_s16, %s9626_s11  ;;  %p9633_p3 = scmp.lt.u32.totalorder %s9626_s11, %s11517_s16 }
 0x1ef   : > { %p9629_p1 = pnand %p9627_p13, %p10260_p0 }
 0x1f1   : > { %p9630_p2 = pneg %p9629_p1 }
 0x1f3   : > { %p9635_p4 = pnand %p9633_p3, %p9630_p2 }
 0x1f5   : > { %9638 = shalt.err (!%p9635_p4)
}
 0x1f6   : > { %s9639_s2 = scalar_lea.vmem %s10465_s3, 16  ;;  %s9646_s13 = scalar_lea.vmem %s10465_s3, 32 }
 0x1f7   : > { %p9640_p5 = scmp.ne.s32.totalorder %s10465_s3, %s9639_s2  ;;  %p9647_p10 = scmp.lt.s32.totalorder %s10465_s3, %s10465_s3 }
 0x1f8   : > { %p9648_p7 = scmp.lt.s32.totalorder %s9646_s13, %s9639_s2 }
 0x1f9   : > { %p9642_p6 = pnand %p9640_p5, %p10260_p0 }
 0x1fa   : > { %p9649_p8 = por %p9648_p7, %p9647_p10 }
 0x1fb   : > { %p9643_p9 = pneg %p9642_p6 }
 0x1fd   : > { %p9650_p11 = pnand %p9649_p8, %p9643_p9 }
 0x1ff   : > { %9653 = shalt.err (!%p9650_p11)
}
 0x200   : > { %s11518_s10 = sld [smem:[#allocation71_spill]]  ;;  %s9995_s22 = smov [#allocation25]  }
 0x201   : > { %8931 = dma.hbm_to_vmem [thread:$0]  (!%p10248_p12), %s11517_s16, 16, %s10465_s3, [#allocation21]  }
 0x202   : > { %s1058_s11 = sshll.u32 %s9995_s22, 4  ;;  %s9996_s4 = smov [#allocation28]   ;;  %s1059_s11 = int_to_ptr.vmem [resolvable:$true] %s1058_s11 }
 0x203   : > { %s1082_s5 = sshll.u32 %s9996_s4, 4  ;;  %s10493_s5 = int_to_ptr.vmem [resolvable:$true] %s1082_s5 }
 0x206   : > { %s9654_s2 = scalar_lea.hbm %s11518_s10, 16 }
 0x207   : > { %p9655_p13 = scmp.ne.s32.totalorder %s11518_s10, %s9654_s2  ;;  %p9661_p3 = scmp.lt.u32.totalorder %s9654_s2, %s11518_s10 }
 0x209   : > { %p9657_p1 = pnand %p9655_p13, %p10260_p0 }
 0x20b   : > { %p9658_p2 = pneg %p9657_p1 }
 0x20d   : > { %p9663_p4 = pnand %p9661_p3, %p9658_p2 }
 0x20f   : > { %9666 = shalt.err (!%p9663_p4)
}
 0x210   : > { %s9667_s13 = scalar_lea.vmem %s1059_s11, 16  ;;  %s9674_s3 = scalar_lea.vmem %s1059_s11, 32 }
 0x211   : > { %p9668_p5 = scmp.ne.s32.totalorder %s1059_s11, %s9667_s13  ;;  %p9675_p10 = scmp.lt.s32.totalorder %s1059_s11, %s1059_s11 }
 0x212   : > { %p9676_p7 = scmp.lt.s32.totalorder %s9674_s3, %s9667_s13 }
 0x213   : > { %p9670_p6 = pnand %p9668_p5, %p10260_p0 }
 0x214   : > { %p9677_p8 = por %p9676_p7, %p9675_p10 }
 0x215   : > { %p9671_p9 = pneg %p9670_p6 }
 0x217   : > { %p9678_p11 = pnand %p9677_p8, %p9671_p9 }
 0x219   : > { %9681 = shalt.err (!%p9678_p11)
}
 0x21a   : > { %s11519_s4 = sld [smem:[#allocation72_spill]] }
 0x21b   : > { %8937 = dma.hbm_to_vmem [thread:$0]  (!%p10248_p12), %s11518_s10, 16, %s1059_s11, [#allocation24]  }
 0x220   : > { %s9682_s22 = scalar_lea.hbm %s11519_s4, 16 }
 0x221   : > { %p9683_p13 = scmp.ne.s32.totalorder %s11519_s4, %s9682_s22  ;;  %p9689_p3 = scmp.lt.u32.totalorder %s9682_s22, %s11519_s4 }
 0x223   : > { %p9685_p1 = pnand %p9683_p13, %p10260_p0 }
 0x225   : > { %p9686_p2 = pneg %p9685_p1 }
 0x227   : > { %p9691_p4 = pnand %p9689_p3, %p9686_p2 }
 0x229   : > { %9694 = shalt.err (!%p9691_p4)
}
 0x22a   : > { %s9695_s2 = scalar_lea.vmem %s10493_s5, 16  ;;  %s9702_s13 = scalar_lea.vmem %s10493_s5, 32 }
 0x22b   : > { %p9696_p5 = scmp.ne.s32.totalorder %s10493_s5, %s9695_s2  ;;  %p9703_p10 = scmp.lt.s32.totalorder %s10493_s5, %s10493_s5 }
 0x22c   : > { %p9704_p7 = scmp.lt.s32.totalorder %s9702_s13, %s9695_s2 }
 0x22d   : > { %p9698_p6 = pnand %p9696_p5, %p10260_p0 }
 0x22e   : > { %p9705_p8 = por %p9704_p7, %p9703_p10 }
 0x22f   : > { %p9699_p9 = pneg %p9698_p6 }
 0x231   : > { %p9706_p11 = pnand %p9705_p8, %p9699_p9 }
 0x233   : > { %9709 = shalt.err (!%p9706_p11)
}
 0x234   : > { %s11520_s11 = sld [smem:[#allocation74_spill]]  ;;  %s9997_s3 = smov [#allocation31]  }
 0x235   : > { %8943 = dma.hbm_to_vmem [thread:$0]  (!%p10248_p12), %s11519_s4, 16, %s10493_s5, [#allocation27]  }
 0x236   : > { %s1104_s22 = sshll.u32 %s9997_s3, 4  ;;  %s9998_s7 = smov [#allocation34]   ;;  %s1105_s22 = int_to_ptr.vmem [resolvable:$true] %s1104_s22 }
 0x237   : > { %s1132_s8 = sshll.u32 %s9998_s7, 4  ;;  %s10521_s8 = int_to_ptr.vmem [resolvable:$true] %s1132_s8 }
 0x23a   : > { %s9710_s2 = scalar_lea.hbm %s11520_s11, 16 }
 0x23b   : > { %p9711_p13 = scmp.ne.s32.totalorder %s11520_s11, %s9710_s2  ;;  %p9717_p3 = scmp.lt.u32.totalorder %s9710_s2, %s11520_s11 }
 0x23d   : > { %p9713_p1 = pnand %p9711_p13, %p10260_p0 }
 0x23f   : > { %p9714_p2 = pneg %p9713_p1 }
 0x241   : > { %p9719_p4 = pnand %p9717_p3, %p9714_p2 }
 0x243   : > { %9722 = shalt.err (!%p9719_p4)
}
 0x244   : > { %s9723_s13 = scalar_lea.vmem %s1105_s22, 16  ;;  %s9730_s5 = scalar_lea.vmem %s1105_s22, 32 }
 0x245   : > { %p9724_p5 = scmp.ne.s32.totalorder %s1105_s22, %s9723_s13  ;;  %p9731_p10 = scmp.lt.s32.totalorder %s1105_s22, %s1105_s22 }
 0x246   : > { %p9732_p7 = scmp.lt.s32.totalorder %s9730_s5, %s9723_s13 }
 0x247   : > { %p9726_p6 = pnand %p9724_p5, %p10260_p0 }
 0x248   : > { %p9733_p8 = por %p9732_p7, %p9731_p10 }
 0x249   : > { %p9727_p9 = pneg %p9726_p6 }
 0x24b   : > { %p9734_p11 = pnand %p9733_p8, %p9727_p9 }
 0x24d   : > { %9737 = shalt.err (!%p9734_p11)
}
 0x24e   : > { %s11521_s7 = sld [smem:[#allocation78_spill]] }
 0x24f   : > { %8949 = dma.hbm_to_vmem [thread:$0]  (!%p10248_p12), %s11520_s11, 16, %s1105_s22, [#allocation30]  }
 0x254   : > { %s9738_s3 = scalar_lea.hbm %s11521_s7, 16 }
 0x255   : > { %p9739_p13 = scmp.ne.s32.totalorder %s11521_s7, %s9738_s3  ;;  %p9745_p3 = scmp.lt.u32.totalorder %s9738_s3, %s11521_s7 }
 0x257   : > { %p9741_p1 = pnand %p9739_p13, %p10260_p0 }
 0x259   : > { %p9742_p2 = pneg %p9741_p1 }
 0x25b   : > { %p9747_p4 = pnand %p9745_p3, %p9742_p2 }
 0x25d   : > { %9750 = shalt.err (!%p9747_p4)
}
 0x25e   : > { %s9751_s2 = scalar_lea.vmem %s10521_s8, 16  ;;  %s9758_s13 = scalar_lea.vmem %s10521_s8, 32 }
 0x25f   : > { %p9752_p5 = scmp.ne.s32.totalorder %s10521_s8, %s9751_s2  ;;  %p9759_p10 = scmp.lt.s32.totalorder %s10521_s8, %s10521_s8 }
 0x260   : > { %p9760_p7 = scmp.lt.s32.totalorder %s9758_s13, %s9751_s2 }
 0x261   : > { %p9754_p6 = pnand %p9752_p5, %p10260_p0 }
 0x262   : > { %p9761_p8 = por %p9760_p7, %p9759_p10 }
 0x263   : > { %p9755_p9 = pneg %p9754_p6 }
 0x265   : > { %p9762_p11 = pnand %p9761_p8, %p9755_p9 }
 0x267   : > { %9765 = shalt.err (!%p9762_p11)
}
 0x268   : > { %8955 = dma.hbm_to_vmem [thread:$0]  (!%p10248_p12), %s11521_s7, 16, %s10521_s8, [#allocation33]  }
 0x269   : > { %s9999_s22 = smov [#allocation37]   ;;  %s10000_s3 = smov [#allocation38]  }
 0x26a   : > { %s1154_s5 = sshll.u32 %s9999_s22, 4  ;;  %s1168_s4 = sshll.u32 %s10000_s3, 4  ;;  %s1155_s5 = int_to_ptr.vmem [resolvable:$true] %s1154_s5  ;;  %s10549_s4 = int_to_ptr.vmem [resolvable:$true] %s1168_s4 }
 0x26b   : > { %s9766_s2 = scalar_lea.hbm %s11496_s6, 16 }
 0x26c   : > { %p9767_p13 = scmp.ne.s32.totalorder %s11496_s6, %s9766_s2  ;;  %p9773_p3 = scmp.lt.u32.totalorder %s9766_s2, %s11496_s6 }
 0x26e   : > { %p9769_p1 = pnand %p9767_p13, %p10260_p0 }
 0x270   : > { %p9770_p2 = pneg %p9769_p1 }
 0x272   : > { %p9775_p4 = pnand %p9773_p3, %p9770_p2 }
 0x274   : > { %9778 = shalt.err (!%p9775_p4)
}
 0x275   : > { %s9779_s13 = scalar_lea.vmem %s1155_s5, 16  ;;  %s9786_s8 = scalar_lea.vmem %s1155_s5, 32 }
 0x276   : > { %p9780_p5 = scmp.ne.s32.totalorder %s1155_s5, %s9779_s13  ;;  %p9787_p10 = scmp.lt.s32.totalorder %s1155_s5, %s1155_s5 }
 0x277   : > { %p9788_p7 = scmp.lt.s32.totalorder %s9786_s8, %s9779_s13 }
 0x278   : > { %p9782_p6 = pnand %p9780_p5, %p10260_p0 }
 0x279   : > { %p9789_p8 = por %p9788_p7, %p9787_p10 }
 0x27a   : > { %p9783_p9 = pneg %p9782_p6 }
 0x27c   : > { %p9790_p11 = pnand %p9789_p8, %p9783_p9 }
 0x27e   : > { %9793 = shalt.err (!%p9790_p11)
}
 0x27f   : > { %8961 = dma.hbm_to_vmem [thread:$0]  (!%p10248_p12), %s11496_s6, 16, %s1155_s5, [#allocation36]  }
 0x280   : > { %s9794_s22 = scalar_lea.hbm %s10184_s25, 16 }
 0x281   : > { %p9795_p13 = scmp.ne.s32.totalorder %s10184_s25, %s9794_s22  ;;  %p9801_p3 = scmp.lt.u32.totalorder %s9794_s22, %s10184_s25 }
 0x283   : > { %p9797_p1 = pnand %p9795_p13, %p10260_p0 }
 0x285   : > { %p9798_p2 = pneg %p9797_p1 }
 0x287   : > { %p9803_p4 = pnand %p9801_p3, %p9798_p2 }
 0x289   : > { %9806 = shalt.err (!%p9803_p4)
}
 0x28a   : > { %s9807_s3 = scalar_lea.vmem %s10549_s4, 16  ;;  %s9814_s2 = scalar_lea.vmem %s10549_s4, 32 }
 0x28b   : > { %p9808_p5 = scmp.ne.s32.totalorder %s10549_s4, %s9807_s3  ;;  %p9815_p10 = scmp.lt.s32.totalorder %s10549_s4, %s10549_s4 }
 0x28c   : > { %p9816_p7 = scmp.lt.s32.totalorder %s9814_s2, %s9807_s3 }
 0x28d   : > { %p9810_p6 = pnand %p9808_p5, %p10260_p0 }
 0x28e   : > { %p9817_p8 = por %p9816_p7, %p9815_p10 }
 0x28f   : > { %p9811_p9 = pneg %p9810_p6 }
 0x291   : > { %p9818_p11 = pnand %p9817_p8, %p9811_p9 }
 0x293   : > { %9821 = shalt.err (!%p9818_p11)
}
 0x294   : > { %8964 = dma.hbm_to_vmem [thread:$0]  (!%p10248_p12), %s10184_s25, 16, %s10549_s4, [#allocation39]  }
 0x295   : > { %p11522_p13 = scmp.ne.s32.totalorder %s11510_s18, 0 }
 0x296   : > { %p11523_p1 = scmp.eq.s32.totalorder (!%p11522_p13), %s10212_s28, 0 }
 0x297   : > { %1189 = sbr.rel (%p11522_p13) target bundleno = 6305 (0x18a1), region = 160 }
 0x29e   : > { %9867 = dma.done.wait (%p11523_p1), [#allocation3], 96   ;;  %p11524_p0 = pmov %p11523_p1 }
 0x2a0   : > { %9869 = vsyncadd (%p11524_p0), [#allocation3], 4294967200  ;;  %p11525_p2 = pmov %p11524_p0 }
 0x2a1   : > { %p11526_p3 = pmov %p11524_p0 }
 0x2a2   : > { %9871 = dma.done.wait (%p11525_p2), [#allocation6], 32  }
 0x2a3   : > { %9873 = vsyncadd (%p11526_p3), [#allocation6], 4294967264  ;;  %p11527_p4 = pmov %p11524_p0 }
 0x2a4   : > { %p11528_p12 = pmov %p11524_p0 }
 0x2a5   : > { %9875 = dma.done.wait (%p11527_p4), [#allocation9], 32  }
 0x2a6   : > { %9877 = vsyncadd (%p11528_p12), [#allocation9], 4294967264  ;;  %p11529_p5 = pmov %p11524_p0 }
 0x2a7   : > { %p11530_p6 = pmov %p11524_p0 }
 0x2a8   : > { %9879 = dma.done.wait (%p11529_p5), [#allocation12], 32  }
 0x2a9   : > { %9881 = vsyncadd (%p11530_p6), [#allocation12], 4294967264  ;;  %p11531_p9 = pmov %p11524_p0 }
 0x2aa   : > { %p11532_p10 = pmov %p11524_p0 }
 0x2ab   : > { %9883 = dma.done.wait (%p11531_p9), [#allocation15], 32  }
 0x2ac   : > { %9885 = vsyncadd (%p11532_p10), [#allocation15], 4294967264  ;;  %p11533_p7 = pmov %p11524_p0 }
 0x2ad   : > { %p11534_p8 = pmov %p11524_p0 }
 0x2ae   : > { %9887 = dma.done.wait (%p11533_p7), [#allocation18], 32  }
 0x2af   : > { %9889 = vsyncadd (%p11534_p8), [#allocation18], 4294967264  ;;  %p11535_p11 = pmov %p11524_p0 }
 0x2b0   : > { %p11536_p13 = pmov %p11524_p0 }
 0x2b1   : > { %9891 = dma.done.wait (%p11535_p11), [#allocation21], 32  }
 0x2b2   : > { %9893 = vsyncadd (%p11536_p13), [#allocation21], 4294967264  ;;  %p11537_p1 = pmov %p11524_p0 }
 0x2b4   : > { %9895 = dma.done.wait (%p11537_p1), [#allocation24], 32  }
 0x2b5   : > { %9897 = vsyncadd (%p11524_p0), [#allocation24], 4294967264  ;;  %p11538_p2 = pmov %p11524_p0 }
 0x2b6   : > { %p11539_p3 = pmov %p11524_p0 }
 0x2b7   : > { %9899 = dma.done.wait (%p11538_p2), [#allocation27], 400  }
 0x2b8   : > { %9901 = vsyncadd (%p11539_p3), [#allocation27], 4294966896  ;;  %p11540_p4 = pmov %p11524_p0 }
 0x2b9   : > { %p11541_p12 = pmov %p11524_p0 }
 0x2ba   : > { %9903 = dma.done.wait (%p11540_p4), [#allocation30], 32  }
 0x2bb   : > { %9905 = vsyncadd (%p11541_p12), [#allocation30], 4294967264  ;;  %p11542_p5 = pmov %p11524_p0 }
 0x2bc   : > { %p11543_p6 = pmov %p11524_p0 }
 0x2bd   : > { %9907 = dma.done.wait (%p11542_p5), [#allocation33], 32  }
 0x2be   : > { %9909 = vsyncadd (%p11543_p6), [#allocation33], 4294967264  ;;  %p11544_p9 = pmov %p11524_p0 }
 0x2bf   : > { %p11545_p10 = pmov %p11524_p0 }
 0x2c0   : > { %9911 = dma.done.wait (%p11544_p9), [#allocation36], 32  }
 0x2c1   : > { %9913 = vsyncadd (%p11545_p10), [#allocation36], 4294967264  ;;  %p11546_p7 = pmov %p11524_p0 }
 0x2c2   : > { %p11547_p8 = pmov %p11524_p0 }
 0x2c3   : > { %9915 = dma.done.wait (%p11546_p7), [#allocation39], 16  }
 0x2c4   : > { %9917 = vsyncadd (%p11547_p8), [#allocation39], 4294967280  ;;  %s11548_s0 = sld [smem:[#allocation55_spill]]  ;;  %p1368_p11 = scmp.lt.s32.totalorder %s10212_s28, 1  ;;  %vm1400_vm0 = vcmask 1041408   ;;  %vm1387_vm1 = vcmask 31744   ;;  %v1469_v18 = vlaneseq }
 0x2c5   : > { %v1386_v0 = vld [vmem:[#allocation2] sm:$0x3]  ;;  %v1505_v1 = vld [vmem:[#allocation2 + $0x2] sm:$0x3]  ;;  %v1705_v10 = vld [vmem:[#allocation2 + $0x4] sm:$0x3] }
 0x2c6   : > { %s1369_s18 = scalar_select %p1368_p11, %s10212_s28, 1  ;;  %8791 = vmatprep.subr.msk.bf16.mxu0 %vm1400_vm0, %v1386_v0  ;;  %8792 = vmatprep.subr.msk.bf16.mxu1 %vm1400_vm0, %v1505_v1  ;;  %v1402_v3 = vsel %vm1400_vm0, %v1386_v0, 0  ;;  %v1507_v4 = vsel %vm1400_vm0, %v1505_v1, 0  ;;  %v1707_v13 = vsel %vm1400_vm0, %v1705_v10, 0  ;;  %v10652_v19 = vshrl.u32 %v1469_v18, 7 }
 0x2c7   : > { %7739 = vmatpush3.bf16.msra.mxu0 %v1402_v3  ;;  %7749 = vmatpush3.bf16.msra.mxu1 %v1507_v4  ;;  %v10654_v20 = vand.u32 127, %v1469_v18  ;;  %v11457_v22 = vmov 0.0   ;;  %vm1574_vm3 = vcmask 523264   ;;  %s11549_s5 = sld [smem:[#allocation57_spill]]  ;;  %s11550_s13 = sld [smem:[#allocation58_spill]] }
 0x2c8   : > { %s7353_s1 = sshll.u32 %s1369_s18, 6  ;;  %8793 = vmatprep.subr.msk.bf16.mxu1 %vm1400_vm0, %v1705_v10  ;;  %v1480_v21 = vadd.s32 4294967295, %v10652_v19  ;;  %v1476_v24 = vadd.s32 48, %v10652_v19  ;;  %v10681_v39 = vadd.s32 8, %v10652_v19  ;;  %v10690_v47 = vadd.s32 16, %v10652_v19  ;;  %s11551_s8 = sld [smem:[#allocation62_spill]] }
 0x2c9   : > { %v10694_v50 = vadd.s32 24, %v10652_v19  ;;  %v10697_v51 = vadd.s32 32, %v10652_v19  ;;  %v10703_v55 = vadd.s32 40, %v10652_v19  ;;  %v1477_v0 = vadd.s32 56, %v10652_v19  ;;  %s11557_s22 = sld [smem:[#allocation64_spill]]  ;;  %s11559_s2 = sld [smem:[#allocation66_spill]] }
 0x2ca   : > { %s1372_s4 = scalar_lea.vmem %s11548_s0, %s7353_s1  ;;  %vm1488_vm2 = vcmp.eq.s32.totalorder %v10654_v20, %v1480_v21  ;;  %v1780_v25 = vadd.s32 1, %v1476_v24  ;;  %v1481_v49 = vadd.s32 4294967295, %v10681_v39  ;;  %v1482_v52 = vadd.s32 4294967295, %v10690_v47  ;;  %s11560_s0 = sld [smem:[#allocation68_spill]] }
 0x2cb   : > { %v1374_v2 = vld [vmem:[%s1372_s4] sm:$0xff]  ;;  %v1375_v5 = vld [vmem:[%s1372_s4 + $0x8] sm:$0xff]  ;;  %v1376_v6 = vld [vmem:[%s1372_s4 + $0x10] sm:$0xff]  ;;  %v10659_v23 = vsel %vm1488_vm2, 1.0, %v11457_v22  ;;  %v1483_v54 = vadd.s32 4294967295, %v10694_v50  ;;  %v1484_v57 = vadd.s32 4294967295, %v10697_v51 }
 0x2cc   : > { %v1377_v7 = vld [vmem:[%s1372_s4 + $0x18] sm:$0xff]  ;;  %v1382_v8 = vpack.c.bf16 %v1375_v5, %v1374_v2  ;;  %v1378_v11 = vld [vmem:[%s1372_s4 + $0x20] sm:$0xff]  ;;  %v1379_v12 = vld [vmem:[%s1372_s4 + $0x28] sm:$0xff]  ;;  %vm1788_vm4 = vcmp.eq.s32.totalorder %v10654_v20, %v1780_v25  ;;  %vm1489_vm5 = vcmp.eq.s32.totalorder %v10654_v20, %v1481_v49  ;;  %vm1490_vm6 = vcmp.eq.s32.totalorder %v10654_v20, %v1482_v52  ;;  %s11562_s1 = sld [smem:[#allocation70_spill]]  ;;  %p11566_p1 = scmp.ne.s32.totalorder %s11507_s15, 0 }
 0x2cd   : > { %v1383_v9 = vpack.c.bf16 %v1377_v7, %v1376_v6  ;;  %v1384_v14 = vpack.c.bf16 %v1379_v12, %v1378_v11  ;;  %v1380_v15 = vld [vmem:[%s1372_s4 + $0x30] sm:$0xff]  ;;  %v1381_v16 = vld [vmem:[%s1372_s4 + $0x38] sm:$0xff]  ;;  %v10666_v26 = vsel %vm1788_vm4, 1.0, %v11457_v22  ;;  %v10707_v61 = vsel %vm1489_vm5, 1.0, %v11457_v22  ;;  %s11563_s4 = sld [smem:[#allocation75_spill]] }
 0x2ce   : > { %7740 = vmatprep.mubr.msk.bf16.mxu0 %vm1387_vm1, %v1382_v8  ;;  %7750 = vmatprep.mubr.msk.bf16.mxu1 %vm1387_vm1, %v1382_v8  ;;  %v1385_v17 = vpack.c.bf16 %v1381_v16, %v1380_v15  ;;  %vm1491_vm7 = vcmp.eq.s32.totalorder %v10654_v20, %v1483_v54  ;;  %v1485_v63 = vadd.s32 4294967295, %v10703_v55  ;;  %vm1492_vm8 = vcmp.eq.s32.totalorder %v10654_v20, %v1484_v57 }
 0x2cf   : > { %7741 = vmatmul.mubr.msk.bf16.vlgmr.msra.gmra.mrb[0].mxu0 %vm1387_vm1, %v1383_v9  ;;  %7751 = vmatmul.mubr.msk.bf16.vlgmr.msra.gmra.mrb[0].mxu1 %vm1387_vm1, %v1383_v9  ;;  %v10717_v1 = vsel %vm1490_vm6, 1.0, %v11457_v22  ;;  %v10720_v2 = vsel %vm1491_vm7, 1.0, %v11457_v22  ;;  %v1486_v3 = vadd.s32 4294967295, %v1476_v24  ;;  %v10723_v5 = vsel %vm1492_vm8, 1.0, %v11457_v22  ;;  %s11558_s3 = smov %s11557_s22 }
 0x2d0   : > { %7787 = vmatpush3.bf16.msra.mxu1 %v1707_v13  ;;  %7744 = vmatprep.mubr.msk.bf16.mxu0 %vm1387_vm1, %v1384_v14  ;;  %vm1493_vm9 = vcmp.eq.s32.totalorder %v10654_v20, %v1485_v63  ;;  %v1487_v6 = vadd.s32 4294967295, %v1477_v0  ;;  %v1781_v15 = vadd.s32 1, %v1477_v0  ;;  %v1776_v16 = vadd.s32 1, %v10690_v47  ;;  %s11561_s18 = smov %s11560_s0 }
 0x2d1   : > { %7754 = vmatprep.mubr.msk.bf16.mxu1 %vm1387_vm1, %v1384_v14  ;;  %v10734_v12 = vsel %vm1493_vm9, 1.0, %v11457_v22  ;;  %vm1494_vm10 = vcmp.eq.s32.totalorder %v10654_v20, %v1486_v3  ;;  %v1777_v24 = vadd.s32 1, %v10694_v50  ;;  %v1778_v25 = vadd.s32 1, %v10697_v51 }
 0x2d2   : > { %vm1495_vm11 = vcmp.eq.s32.totalorder %v10654_v20, %v1487_v6  ;;  %vm1789_vm14 = vcmp.eq.s32.totalorder %v10654_v20, %v1781_v15  ;;  %vm1784_vm15 = vcmp.eq.s32.totalorder %v10654_v20, %v1776_v16  ;;  %vm1970_vm4 = vcmask 130048  }
 0x2d3   : > { %v10747_v18 = vsel %vm1495_vm11, 1.0, %v11457_v22  ;;  %vm1785_vm0 = vcmp.eq.s32.totalorder %v10654_v20, %v1777_v24 }
 0x2d7   : > { %7745 = vmatmul.mubr.msk.bf16.gmra.mrb[4].mxu0 %vm1387_vm1, %v1385_v17  ;;  %7755 = vmatmul.mubr.msk.bf16.gmra.mrb[4].mxu1 %vm1387_vm1, %v1385_v17 }
 0x2d8   : > { %7788 = vmatprep.mubr.msk.bf16.mxu1 %vm1387_vm1, %v1382_v8  ;;  %7774 = vmatprep.mubr.msk.f32.mxu0 %vm1574_vm3, %v10659_v23  ;;  %v1774_v8 = vadd.s32 1, %v10652_v19 }
 0x2da   : > { %vm1782_vm12 = vcmp.eq.s32.totalorder %v10654_v20, %v1774_v8 }
 0x2db   : > { %v10750_v21 = vsel %vm1782_vm12, 1.0, %v11457_v22 }
 0x2df   : > { %7789 = vmatmul.mubr.msk.bf16.vlgmr.msra.gmra.mrb[8].mxu1 %vm1387_vm1, %v1383_v9 }
 0x2e0   : > { %7792 = vmatprep.mubr.msk.bf16.mxu1 %vm1387_vm1, %v1384_v14  ;;  %v1775_v14 = vadd.s32 1, %v10681_v39 }
 0x2e2   : > { %vm1783_vm13 = vcmp.eq.s32.totalorder %v10654_v20, %v1775_v14 }
 0x2e7   : > { %7793 = vmatmul.mubr.msk.bf16.gmra.mrb[12].mxu1 %vm1387_vm1, %v1385_v17  ;;  %v10744_v17 = vsel %vm1494_vm10, 1.0, %v11457_v22  ;;  %vm1786_vm1 = vcmp.eq.s32.totalorder %v10654_v20, %v1778_v25 }
 0x2e8   : > { %7821 = vmatprep.mubr.msk.f32.mxu1 %vm1574_vm3, %v10666_v26 }
 0x3a2   : > { %v7742_v27 = vpop.f32.mrb[0].mxu0  ;;  %v10670_v28 = vpop.f32.mrb[0].mxu1 }
 0x3a3   : > { %v1438_v29 = vpop.f32.mrb[1].mxu0  ;;  %v10672_v30 = vpop.f32.mrb[1].mxu1 }
 0x3a4   : > { %v7743_v31 = vpop.f32.mrb[2].mxu0  ;;  %v10674_v32 = vpop.f32.mrb[2].mxu1 }
 0x3a5   : > { %v8471_v33 = vpack.c.bf16 %v7743_v31, %v7742_v27  ;;  %v1441_v34 = vpop.f32.mrb[3].mxu0  ;;  %v10676_v35 = vpop.f32.mrb[3].mxu1  ;;  %v10764_v27 = vsel %vm1783_vm13, 1.0, %v11457_v22  ;;  %v10770_v31 = vsel %vm1784_vm15, 1.0, %v11457_v22 }
 0x3a6   : > { %v8467_v36 = vpack.c.bf16 %v1441_v34, %v1438_v29  ;;  %v10767_v29 = vsel %vm1789_vm14, 1.0, %v11457_v22  ;;  %v10782_v34 = vsel %vm1785_vm0, 1.0, %v11457_v22 }
 0x3a8   : > { %8468 = vmatprep.subr.bf16.mxu0 %v8467_v36 }
 0x3a9   : > { %8470 = vmatpush3.bf16.msra.mxu0 %v8467_v36  ;;  %v10785_v36 = vsel %vm1786_vm1, 1.0, %v11457_v22  ;;  %vm10002_vm1 = vmmov 0  }
 0x3aa   : > { %v7746_v37 = vpop.f32.mrb[4].mxu0  ;;  %v10678_v38 = vpop.f32.mrb[4].mxu1  ;;  %8472 = vmatprep.subr.bf16.mxu0 %v8471_v33 }
 0x3ab   : > { %v1454_v40 = vpop.f32.mrb[5].mxu0  ;;  %v10683_v41 = vpop.f32.mrb[5].mxu1 }
 0x3ac   : > { %v7747_v42 = vpop.f32.mrb[6].mxu0  ;;  %v10685_v43 = vpop.f32.mrb[6].mxu1 }
 0x3ad   : > { %v8479_v44 = vpack.c.bf16 %v7747_v42, %v7746_v37  ;;  %v1457_v45 = vpop.f32.mrb[7].mxu0  ;;  %v10687_v46 = vpop.f32.mrb[7].mxu1  ;;  %8474 = vmatpush3.bf16.msra.mxu0 %v8471_v33  ;;  %v1779_v33 = vadd.s32 1, %v10703_v55  ;;  %v9118_v42 = vld [vmem:[%s11549_s5] sm:$0xff]  }
 0x3ae   : > { %v8475_v48 = vpack.c.bf16 %v1457_v45, %v1454_v40  ;;  %v9117_v40 = vld [vmem:[%s11549_s5 + $0x8] sm:$0xff]  }
 0x3af   : > { %vm1787_vm2 = vcmp.eq.s32.totalorder %v10654_v20, %v1779_v33 }
 0x3b0   : > { %8476 = vmatprep.subr.bf16.mxu0 %v8475_v48  ;;  %v10793_v37 = vsel %vm1787_vm2, 1.0, %v11457_v22  ;;  %vm6133_vm2 = vcmp.eq.s32.totalorder %v10654_v20, %v10681_v39 }
 0x3b1   : > { %8478 = vmatpush3.bf16.msra.mxu0 %v8475_v48 }
 0x3b2   : > { %8480 = vmatprep.subr.bf16.mxu0 %v8479_v44  ;;  %v7790_v53 = vpop.f32.mrb[8].mxu1 }
 0x3b3   : > { %v1743_v56 = vpop.f32.mrb[9].mxu1 }
 0x3b4   : > { %v7791_v58 = vpop.f32.mrb[10].mxu1 }
 0x3b5   : > { %v8487_v59 = vpack.c.bf16 %v7791_v58, %v7790_v53  ;;  %8482 = vmatpush3.bf16.msra.mxu0 %v8479_v44  ;;  %v1746_v60 = vpop.f32.mrb[11].mxu1  ;;  %v9119_v44 = vld [vmem:[%s11549_s5 + $0x10] sm:$0xff]  }
 0x3b6   : > { %v8483_v62 = vpack.c.bf16 %v1746_v60, %v1743_v56 }
 0x3b8   : > { %7775 = vmatmul.mubr.msk.f32.vlgmr.msra.gmra.mrb[8].mxu0 %vm1574_vm3, %v10707_v61  ;;  %8484 = vmatprep.subr.bf16.mxu0 %v8483_v62 }
 0x3b9   : > { %8765 = vmatprep.subr.bf16.mxu1 %v8483_v62  ;;  %8486 = vmatpush3.bf16.msra.mxu0 %v8483_v62 }
 0x3ba   : > { %8769 = vmatpush3.bf16.msra.mxu1 %v8483_v62  ;;  %v7794_v4 = vpop.f32.mrb[12].mxu1  ;;  %8488 = vmatprep.subr.bf16.mxu0 %v8487_v59 }
 0x3bb   : > { %8766 = vmatprep.subr.bf16.mxu1 %v8487_v59  ;;  %7777 = vmatprep.mubr.msk.f32.mxu0 %vm1574_vm3, %v10717_v1  ;;  %v1759_v7 = vpop.f32.mrb[13].mxu1 }
 0x3bc   : > { %7778 = vmatmul.mubr.msk.f32.gmra.mrb[10].mxu0 %vm1574_vm3, %v10720_v2  ;;  %v7795_v9 = vpop.f32.mrb[14].mxu1 }
 0x3bd   : > { %v8495_v10 = vpack.c.bf16 %v7795_v9, %v7794_v4  ;;  %v1762_v11 = vpop.f32.mrb[15].mxu1  ;;  %8490 = vmatpush3.bf16.msra.mxu0 %v8487_v59  ;;  %7780 = vmatprep.mubr.msk.f32.mxu0 %vm1574_vm3, %v10723_v5 }
 0x3be   : > { %v8491_v13 = vpack.c.bf16 %v1762_v11, %v1759_v7  ;;  %8770 = vmatpush3.bf16.msra.mxu1 %v8487_v59 }
 0x3c0   : > { %7781 = vmatmul.mubr.msk.f32.gmra.mrb[12].mxu0 %vm1574_vm3, %v10734_v12  ;;  %8492 = vmatprep.subr.bf16.mxu0 %v8491_v13 }
 0x3c1   : > { %8767 = vmatprep.subr.bf16.mxu1 %v8491_v13  ;;  %8494 = vmatpush3.bf16.msra.mxu0 %v8491_v13 }
 0x3c2   : > { %8771 = vmatpush3.bf16.msra.mxu1 %v8491_v13  ;;  %8496 = vmatprep.subr.bf16.mxu0 %v8495_v10 }
 0x3c3   : > { %8768 = vmatprep.subr.bf16.mxu1 %v8495_v10  ;;  %7783 = vmatprep.mubr.msk.f32.mxu0 %vm1574_vm3, %v10744_v17 }
 0x3c4   : > { %7784 = vmatmul.mubr.msk.f32.gmra.mrb[14].mxu0 %vm1574_vm3, %v10747_v18 }
 0x3c5   : > { %8498 = vmatpush3.bf16.msra.mxu0 %v8495_v10  ;;  %7812 = vmatprep.mubr.msk.f32.mxu0 %vm1574_vm3, %v10750_v21 }
 0x3c6   : > { %8772 = vmatpush3.bf16.msra.mxu1 %v8495_v10  ;;  %7834 = vmatprep.subr.bf16.mxu0 %v9117_v40 }
 0x3c7   : > { %7824 = vmatprep.subr.bf16.mxu1 %v9118_v42 }
 0x3c8   : > { %7813 = vmatmul.mubr.msk.f32.vlgmr.msra.gmra.mrb[16].mxu0 %vm1574_vm3, %v10764_v27 }
 0x3c9   : > { %7822 = vmatmul.mubr.msk.f32.vlgmr.msra.gmra.mrb[16].mxu1 %vm1574_vm3, %v10767_v29  ;;  %7815 = vmatprep.mubr.msk.f32.mxu0 %vm1574_vm3, %v10770_v31 }
 0x3ca   : > { %7835 = vmatpush3.bf16.msra.mxu0 %v9117_v40  ;;  %7825 = vmatpush3.bf16.msra.mxu1 %v9118_v42 }
 0x3cb   : > { %7872 = vmatprep.subr.bf16.mxu0 %v9119_v44 }
 0x3cc   : > { %7816 = vmatmul.mubr.msk.f32.gmra.mrb[18].mxu0 %vm1574_vm3, %v10782_v34 }
 0x3cd   : > { %7818 = vmatprep.mubr.msk.f32.mxu0 %vm1574_vm3, %v10785_v36 }
 0x3d0   : > { %7819 = vmatmul.mubr.msk.f32.gmra.mrb[20].mxu0 %vm1574_vm3, %v10793_v37 }
 0x48b   : > { %v7776_v45 = vpop.f32.mrb[8].mxu0 }
 0x48c   : > { %v1671_v48 = vadd.f32 %v7776_v45, %v10676_v35  ;;  %v1665_v49 = vpop.f32.mrb[9].mxu0 }
 0x48d   : > { %v1666_v51 = vadd.f32 %v1665_v49, %v10672_v30  ;;  %v7084_v30 = vld [vmem:[#allocation5] ss:$0 sm:$0xff] }
 0x48f   : > { %v7779_v52 = vpop.f32.mrb[10].mxu0 }
 0x490   : > { %v1681_v53 = vadd.f32 %v7779_v52, %v10674_v32  ;;  %v1675_v54 = vpop.f32.mrb[11].mxu0 }
 0x491   : > { %v1676_v55 = vadd.f32 %v10670_v28, %v1675_v54 }
 0x493   : > { %v7782_v56 = vpop.f32.mrb[12].mxu0 }
 0x494   : > { %v1691_v57 = vadd.f32 %v7782_v56, %v10687_v46  ;;  %v1685_v58 = vpop.f32.mrb[13].mxu0 }
 0x495   : > { %v1686_v59 = vadd.f32 %v1685_v58, %v10683_v41 }
 0x497   : > { %v7785_v60 = vpop.f32.mrb[14].mxu0 }
 0x498   : > { %v1701_v62 = vadd.f32 %v7785_v60, %v10685_v43  ;;  %v1695_v63 = vpop.f32.mrb[15].mxu0 }
 0x499   : > { %v1696_v35 = vadd.f32 %v10678_v38, %v1695_v63 }
 0x49b   : > { %v7814_v0 = vpop.f32.mrb[16].mxu0 }
 0x49c   : > { %v1928_v3 = vadd.f32 %v7814_v0, %v1671_v48  ;;  %v7823_v4 = vpop.f32.mrb[16].mxu1  ;;  %v1888_v32 = vpop.f32.mrb[17].mxu0 }
 0x49d   : > { %v1934_v6 = vadd.f32 %v7823_v4, %v1701_v62  ;;  %v1927_v7 = vadd.f32 %v1888_v32, %v1666_v51  ;;  %v1918_v28 = vpop.f32.mrb[17].mxu1 }
 0x49e   : > { %v10808_v8 = vadd.f32 %v7084_v30, %v1928_v3  ;;  %v1933_v46 = vadd.f32 %v1918_v28, %v1696_v35 }
 0x49f   : > { %v10810_v9 = vadd.f32 %v7084_v30, %v1927_v7  ;;  %v7817_v41 = vpop.f32.mrb[18].mxu0  ;;  %v10828_v49 = vadd.f32 %v7084_v30, %v1934_v6 }
 0x4a0   : > { %v1951_v10 = vmax.f32 %v10808_v8, 0.0  ;;  %v1930_v43 = vadd.f32 %v7817_v41, %v1681_v53  ;;  %v1898_v11 = vpop.f32.mrb[19].mxu0  ;;  %v10830_v51 = vadd.f32 %v7084_v30, %v1933_v46 }
 0x4a1   : > { %v1950_v38 = vmax.f32 %v10810_v9, 0.0  ;;  %v1929_v13 = vadd.f32 %v1898_v11, %v1676_v55  ;;  %v11460_v56 = vmax.f32 %v10828_v49, 0.0 }
 0x4a2   : > { %v10814_v14 = vadd.f32 %v7084_v30, %v1930_v43 }
 0x4a3   : > { %v1958_v15 = vpack.c.bf16 %v1951_v10, %v1950_v38  ;;  %v10820_v16 = vadd.f32 %v7084_v30, %v1929_v13  ;;  %v7820_v24 = vpop.f32.mrb[20].mxu0 }
 0x4a4   : > { %v1953_v25 = vmax.f32 %v10814_v14, 0.0  ;;  %v1932_v33 = vadd.f32 %v7820_v24, %v1691_v57  ;;  %v1908_v40 = vpop.f32.mrb[21].mxu0  ;;  %v11459_v57 = vmax.f32 %v10830_v51, 0.0 }
 0x4a5   : > { %v1952_v42 = vmax.f32 %v10820_v16, 0.0  ;;  %v1931_v45 = vadd.f32 %v1908_v40, %v1686_v59  ;;  %7826 = vmatprep.mubr.msk.bf16.mxu1 %vm1970_vm4, %v1958_v15  ;;  %7836 = vmatprep.mubr.msk.bf16.mxu0 %vm1970_vm4, %v1958_v15 }
 0x4a6   : > { %v10826_v48 = vadd.f32 %v7084_v30, %v1932_v33  ;;  %v1961_v59 = vpack.c.bf16 %v11460_v56, %v11459_v57 }
 0x4a7   : > { %v1959_v52 = vpack.c.bf16 %v1953_v25, %v1952_v42  ;;  %v10836_v53 = vadd.f32 %v7084_v30, %v1931_v45 }
 0x4a8   : > { %v11462_v54 = vmax.f32 %v10826_v48, 0.0  ;;  %v11552_v14 = vmax.f32 %v10826_v48, 0.0 }
 0x4a9   : > { %v11461_v55 = vmax.f32 %v10836_v53, 0.0  ;;  %7827 = vmatmul.mubr.msk.bf16.vlgmr.msra.gmra.mrb[20].mxu1 %vm1970_vm4, %v1959_v52  ;;  %7837 = vmatmul.mubr.msk.bf16.vlgmr.msra.gmra.mrb[24].mxu0 %vm1970_vm4, %v1959_v52  ;;  %v11553_v16 = vmax.f32 %v10836_v53, 0.0 }
 0x4aa   : > { %7873 = vmatpush3.bf16.msra.mxu0 %v9119_v44 }
 0x4ab   : > { %v1960_v58 = vpack.c.bf16 %v11462_v54, %v11461_v55 }
 0x4ad   : > { %7830 = vmatprep.mubr.msk.bf16.mxu1 %vm1970_vm4, %v1960_v58  ;;  %7840 = vmatprep.mubr.msk.bf16.mxu0 %vm1970_vm4, %v1960_v58 }
 0x4b1   : > { %7831 = vmatmul.mubr.msk.bf16.gmra.mrb[24].mxu1 %vm1970_vm4, %v1961_v59  ;;  %7841 = vmatmul.mubr.msk.bf16.gmra.mrb[28].mxu0 %vm1970_vm4, %v1961_v59 }
 0x4b2   : > { %7874 = vmatprep.mubr.msk.bf16.mxu0 %vm1970_vm4, %v1958_v15  ;;  %7860 = vmatprep.mubr.msk.f32.mxu1 %vm1574_vm3, %v10659_v23 }
 0x4b9   : > { %7875 = vmatmul.mubr.msk.bf16.vlgmr.msra.gmra.mrb[32].mxu0 %vm1970_vm4, %v1959_v52 }
 0x4ba   : > { %7878 = vmatprep.mubr.msk.bf16.mxu0 %vm1970_vm4, %v1960_v58 }
 0x4c1   : > { %7879 = vmatmul.mubr.msk.bf16.gmra.mrb[36].mxu0 %vm1970_vm4, %v1961_v59 }
 0x57c   : > { %v7828_v44 = vpop.f32.mrb[20].mxu1  ;;  %v10862_v60 = vpop.f32.mrb[24].mxu0 }
 0x57d   : > { %v2017_v62 = vpop.f32.mrb[21].mxu1  ;;  %v10864_v63 = vpop.f32.mrb[25].mxu0 }
 0x57e   : > { %v7829_v35 = vpop.f32.mrb[22].mxu1  ;;  %v10866_v0 = vpop.f32.mrb[26].mxu0 }
 0x57f   : > { %v8503_v30 = vpack.c.bf16 %v7829_v35, %v7828_v44  ;;  %v2020_v3 = vpop.f32.mrb[23].mxu1  ;;  %v10868_v4 = vpop.f32.mrb[27].mxu0 }
 0x580   : > { %v8499_v32 = vpack.c.bf16 %v2020_v3, %v2017_v62 }
 0x582   : > { %8500 = vmatprep.subr.bf16.mxu1 %v8499_v32 }
 0x583   : > { %8502 = vmatpush3.bf16.msra.mxu1 %v8499_v32 }
 0x584   : > { %v7832_v6 = vpop.f32.mrb[24].mxu1  ;;  %v10870_v7 = vpop.f32.mrb[28].mxu0  ;;  %8504 = vmatprep.subr.bf16.mxu1 %v8503_v30 }
 0x585   : > { %v2033_v28 = vpop.f32.mrb[25].mxu1  ;;  %v10872_v46 = vpop.f32.mrb[29].mxu0 }
 0x586   : > { %v7833_v41 = vpop.f32.mrb[26].mxu1  ;;  %v10874_v43 = vpop.f32.mrb[30].mxu0 }
 0x587   : > { %v8511_v11 = vpack.c.bf16 %v7833_v41, %v7832_v6  ;;  %v2036_v13 = vpop.f32.mrb[27].mxu1  ;;  %v2110_v15 = vpop.f32.mrb[31].mxu0  ;;  %8506 = vmatpush3.bf16.msra.mxu1 %v8503_v30  ;;  %v9120_v6 = vld [vmem:[%s11550_s13] sm:$0xff]   ;;  %v9122_v41 = vld [vmem:[%s11550_s13 + $0x10] sm:$0xff]  }
 0x588   : > { %v8507_v24 = vpack.c.bf16 %v2036_v13, %v2033_v28  ;;  %v9121_v28 = vld [vmem:[%s11550_s13 + $0x8] sm:$0xff]   ;;  %7910 = vmatprep.subr.bf16.mxu0 %v9120_v6 }
 0x589   : > { %7911 = vmatpush3.bf16.msra.mxu0 %v9120_v6 }
 0x58a   : > { %8508 = vmatprep.subr.bf16.mxu1 %v8507_v24 }
 0x58b   : > { %8510 = vmatpush3.bf16.msra.mxu1 %v8507_v24 }
 0x58c   : > { %8512 = vmatprep.subr.bf16.mxu1 %v8511_v11  ;;  %v7876_v33 = vpop.f32.mrb[32].mxu0 }
 0x58d   : > { %v2270_v40 = vpop.f32.mrb[33].mxu0 }
 0x58e   : > { %v7877_v45 = vpop.f32.mrb[34].mxu0 }
 0x58f   : > { %v8519_v52 = vpack.c.bf16 %v7877_v45, %v7876_v33  ;;  %8514 = vmatpush3.bf16.msra.mxu1 %v8511_v11  ;;  %v2273_v58 = vpop.f32.mrb[35].mxu0 }
 0x590   : > { %v8515_v59 = vpack.c.bf16 %v2273_v58, %v2270_v40 }
 0x592   : > { %7861 = vmatmul.mubr.msk.f32.vlgmr.msra.gmra.mrb[18].mxu1 %vm1574_vm3, %v10707_v61  ;;  %8516 = vmatprep.subr.bf16.mxu1 %v8515_v59 }
 0x593   : > { %8518 = vmatpush3.bf16.msra.mxu1 %v8515_v59  ;;  %7863 = vmatprep.mubr.msk.f32.mxu1 %vm1574_vm3, %v10717_v1 }
 0x594   : > { %v7880_v44 = vpop.f32.mrb[36].mxu0  ;;  %8520 = vmatprep.subr.bf16.mxu1 %v8519_v52 }
 0x595   : > { %v2286_v62 = vpop.f32.mrb[37].mxu0 }
 0x596   : > { %7864 = vmatmul.mubr.msk.f32.gmra.mrb[28].mxu1 %vm1574_vm3, %v10720_v2  ;;  %v7881_v35 = vpop.f32.mrb[38].mxu0 }
 0x597   : > { %v8527_v30 = vpack.c.bf16 %v7881_v35, %v7880_v44  ;;  %v2289_v3 = vpop.f32.mrb[39].mxu0  ;;  %8522 = vmatpush3.bf16.msra.mxu1 %v8519_v52  ;;  %7866 = vmatprep.mubr.msk.f32.mxu1 %vm1574_vm3, %v10723_v5 }
 0x598   : > { %v8523_v32 = vpack.c.bf16 %v2289_v3, %v2286_v62 }
 0x59a   : > { %7867 = vmatmul.mubr.msk.f32.gmra.mrb[30].mxu1 %vm1574_vm3, %v10734_v12  ;;  %8524 = vmatprep.subr.bf16.mxu1 %v8523_v32 }
 0x59b   : > { %8526 = vmatpush3.bf16.msra.mxu1 %v8523_v32  ;;  %7869 = vmatprep.mubr.msk.f32.mxu1 %vm1574_vm3, %v10744_v17 }
 0x59c   : > { %8528 = vmatprep.subr.bf16.mxu1 %v8527_v30 }
 0x59e   : > { %7870 = vmatmul.mubr.msk.f32.gmra.mrb[32].mxu1 %vm1574_vm3, %v10747_v18 }
 0x59f   : > { %8530 = vmatpush3.bf16.msra.mxu1 %v8527_v30  ;;  %7898 = vmatprep.mubr.msk.f32.mxu1 %vm1574_vm3, %v10750_v21 }
 0x5a0   : > { %7920 = vmatprep.subr.bf16.mxu1 %v9121_v28 }
 0x5a2   : > { %7899 = vmatmul.mubr.msk.f32.vlgmr.msra.gmra.mrb[34].mxu1 %vm1574_vm3, %v10764_v27 }
 0x5a3   : > { %7901 = vmatprep.mubr.msk.f32.mxu1 %vm1574_vm3, %v10770_v31  ;;  %7921 = vmatpush3.bf16.msra.mxu1 %v9121_v28  ;;  %v7120_v28 = vld [vmem:[#allocation7] ss:$0 sm:$0xff] }
 0x5a4   : > { %7958 = vmatprep.subr.bf16.mxu1 %v9122_v41 }
 0x5a6   : > { %7902 = vmatmul.mubr.msk.f32.gmra.mrb[36].mxu1 %vm1574_vm3, %v10782_v34 }
 0x5a7   : > { %7904 = vmatprep.mubr.msk.f32.mxu1 %vm1574_vm3, %v10785_v36 }
 0x5aa   : > { %7905 = vmatmul.mubr.msk.f32.gmra.mrb[38].mxu1 %vm1574_vm3, %v10793_v37 }
 0x5ab   : > { %7907 = vmatprep.mubr.msk.f32.mxu1 %vm1574_vm3, %v10666_v26 }
 0x5ae   : > { %7908 = vmatmul.mubr.msk.f32.gmra.mrb[40].mxu1 %vm1574_vm3, %v10767_v29 }
 0x665   : > { %v7862_v11 = vpop.f32.mrb[18].mxu1 }
 0x666   : > { %v2194_v13 = vadd.f32 %v7862_v11, %v10868_v4  ;;  %v2188_v24 = vpop.f32.mrb[19].mxu1 }
 0x667   : > { %v2189_v33 = vadd.f32 %v2188_v24, %v10864_v63 }
 0x669   : > { %v7865_v40 = vpop.f32.mrb[28].mxu1 }
 0x66a   : > { %v2204_v45 = vadd.f32 %v7865_v40, %v10866_v0  ;;  %v2198_v52 = vpop.f32.mrb[29].mxu1 }
 0x66b   : > { %v2199_v58 = vadd.f32 %v10862_v60, %v2198_v52 }
 0x66d   : > { %v7868_v59 = vpop.f32.mrb[30].mxu1 }
 0x66e   : > { %v2214_v44 = vadd.f32 %v7868_v59, %v2110_v15  ;;  %v2208_v62 = vpop.f32.mrb[31].mxu1 }
 0x66f   : > { %v2209_v35 = vadd.f32 %v2208_v62, %v10872_v46 }
 0x671   : > { %v7871_v30 = vpop.f32.mrb[32].mxu1 }
 0x672   : > { %v2224_v3 = vadd.f32 %v7871_v30, %v10874_v43  ;;  %v2218_v32 = vpop.f32.mrb[33].mxu1 }
 0x673   : > { %v2219_v4 = vadd.f32 %v10870_v7, %v2218_v32 }
 0x675   : > { %v7900_v6 = vpop.f32.mrb[34].mxu1 }
 0x676   : > { %v2407_v63 = vadd.f32 %v7900_v6, %v2194_v13  ;;  %v2367_v11 = vpop.f32.mrb[35].mxu1 }
 0x677   : > { %v2406_v24 = vadd.f32 %v2367_v11, %v2189_v33 }
 0x678   : > { %v2422_v0 = vadd.f32 %v7120_v28, %v2407_v63 }
 0x679   : > { %v2421_v40 = vadd.f32 %v7120_v28, %v2406_v24  ;;  %v7903_v22 = vpop.f32.mrb[36].mxu1 }
 0x67a   : > { %v2430_v60 = vmax.f32 %v2422_v0, 0.0  ;;  %v2409_v52 = vadd.f32 %v7903_v22, %v2204_v45  ;;  %v2377_v15 = vpop.f32.mrb[37].mxu1 }
 0x67b   : > { %v2429_v59 = vmax.f32 %v2421_v40, 0.0  ;;  %v2408_v57 = vadd.f32 %v2377_v15, %v2199_v58 }
 0x67c   : > { %v2424_v46 = vadd.f32 %v7120_v28, %v2409_v52 }
 0x67d   : > { %v2437_v62 = vpack.c.bf16 %v2430_v60, %v2429_v59  ;;  %v2423_v56 = vadd.f32 %v7120_v28, %v2408_v57  ;;  %v7906_v43 = vpop.f32.mrb[38].mxu1 }
 0x67e   : > { %v2432_v30 = vmax.f32 %v2424_v46, 0.0  ;;  %v2411_v55 = vadd.f32 %v7906_v43, %v2214_v44  ;;  %v2387_v7 = vpop.f32.mrb[39].mxu1 }
 0x67f   : > { %v2431_v32 = vmax.f32 %v2423_v56, 0.0  ;;  %v2410_v54 = vadd.f32 %v2387_v7, %v2209_v35  ;;  %7912 = vmatprep.mubr.msk.bf16.mxu0 %vm1970_vm4, %v2437_v62  ;;  %7922 = vmatprep.mubr.msk.bf16.mxu1 %vm1970_vm4, %v2437_v62 }
 0x680   : > { %v2426_v13 = vadd.f32 %v7120_v28, %v2411_v55 }
 0x681   : > { %v2438_v33 = vpack.c.bf16 %v2432_v30, %v2431_v32  ;;  %v2425_v6 = vadd.f32 %v7120_v28, %v2410_v54  ;;  %v7909_v22 = vpop.f32.mrb[40].mxu1 }
 0x682   : > { %v2434_v45 = vmax.f32 %v2426_v13, 0.0  ;;  %v2413_v63 = vadd.f32 %v7909_v22, %v2224_v3  ;;  %v2397_v58 = vpop.f32.mrb[41].mxu1 }
 0x683   : > { %v2433_v11 = vmax.f32 %v2425_v6, 0.0  ;;  %v2412_v24 = vadd.f32 %v2397_v58, %v2219_v4  ;;  %7913 = vmatmul.mubr.msk.bf16.vlgmr.msra.gmra.mrb[40].mxu0 %vm1970_vm4, %v2438_v33  ;;  %7923 = vmatmul.mubr.msk.bf16.vlgmr.msra.gmra.mrb[44].mxu1 %vm1970_vm4, %v2438_v33 }
 0x684   : > { %v2428_v57 = vadd.f32 %v7120_v28, %v2413_v63  ;;  %7959 = vmatpush3.bf16.msra.mxu1 %v9122_v41 }
 0x685   : > { %v2439_v56 = vpack.c.bf16 %v2434_v45, %v2433_v11  ;;  %v2427_v44 = vadd.f32 %v7120_v28, %v2412_v24 }
 0x686   : > { %v2436_v35 = vmax.f32 %v2428_v57, 0.0 }
 0x687   : > { %v2435_v0 = vmax.f32 %v2427_v44, 0.0  ;;  %7916 = vmatprep.mubr.msk.bf16.mxu0 %vm1970_vm4, %v2439_v56  ;;  %7926 = vmatprep.mubr.msk.bf16.mxu1 %vm1970_vm4, %v2439_v56 }
 0x689   : > { %v2440_v54 = vpack.c.bf16 %v2436_v35, %v2435_v0 }
 0x68b   : > { %7917 = vmatmul.mubr.msk.bf16.gmra.mrb[44].mxu0 %vm1970_vm4, %v2440_v54  ;;  %7927 = vmatmul.mubr.msk.bf16.gmra.mrb[48].mxu1 %vm1970_vm4, %v2440_v54 }
 0x68c   : > { %7960 = vmatprep.mubr.msk.bf16.mxu1 %vm1970_vm4, %v2437_v62  ;;  %7946 = vmatprep.mubr.msk.f32.mxu0 %vm1574_vm3, %v10659_v23 }
 0x693   : > { %7961 = vmatmul.mubr.msk.bf16.vlgmr.msra.gmra.mrb[52].mxu1 %vm1970_vm4, %v2438_v33 }
 0x694   : > { %7964 = vmatprep.mubr.msk.bf16.mxu1 %vm1970_vm4, %v2439_v56 }
 0x69b   : > { %7965 = vmatmul.mubr.msk.bf16.gmra.mrb[56].mxu1 %vm1970_vm4, %v2440_v54 }
 0x756   : > { %v7914_v55 = vpop.f32.mrb[40].mxu0  ;;  %v10930_v41 = vpop.f32.mrb[44].mxu1 }
 0x757   : > { %v2495_v3 = vpop.f32.mrb[41].mxu0  ;;  %v10932_v4 = vpop.f32.mrb[45].mxu1 }
 0x758   : > { %v7915_v28 = vpop.f32.mrb[42].mxu0  ;;  %v10934_v40 = vpop.f32.mrb[46].mxu1 }
 0x759   : > { %v8535_v60 = vpack.c.bf16 %v7915_v28, %v7914_v55  ;;  %v2498_v52 = vpop.f32.mrb[43].mxu0  ;;  %v10936_v15 = vpop.f32.mrb[47].mxu1 }
 0x75a   : > { %v8531_v59 = vpack.c.bf16 %v2498_v52, %v2495_v3 }
 0x75c   : > { %8532 = vmatprep.subr.bf16.mxu0 %v8531_v59 }
 0x75d   : > { %8534 = vmatpush3.bf16.msra.mxu0 %v8531_v59 }
 0x75e   : > { %v7918_v46 = vpop.f32.mrb[44].mxu0  ;;  %v10938_v62 = vpop.f32.mrb[48].mxu1  ;;  %8536 = vmatprep.subr.bf16.mxu0 %v8535_v60 }
 0x75f   : > { %v2511_v43 = vpop.f32.mrb[45].mxu0  ;;  %v10940_v30 = vpop.f32.mrb[49].mxu1 }
 0x760   : > { %v7919_v7 = vpop.f32.mrb[46].mxu0  ;;  %v10942_v32 = vpop.f32.mrb[50].mxu1 }
 0x761   : > { %v8543_v13 = vpack.c.bf16 %v7919_v7, %v7918_v46  ;;  %v2514_v33 = vpop.f32.mrb[47].mxu0  ;;  %v2588_v6 = vpop.f32.mrb[51].mxu1  ;;  %8538 = vmatpush3.bf16.msra.mxu0 %v8535_v60 }
 0x762   : > { %v8539_v22 = vpack.c.bf16 %v2514_v33, %v2511_v43 }
 0x764   : > { %8540 = vmatprep.subr.bf16.mxu0 %v8539_v22 }
 0x765   : > { %8542 = vmatpush3.bf16.msra.mxu0 %v8539_v22 }
 0x766   : > { %8544 = vmatprep.subr.bf16.mxu0 %v8543_v13  ;;  %v7962_v45 = vpop.f32.mrb[52].mxu1 }
 0x767   : > { %v2748_v63 = vpop.f32.mrb[53].mxu1 }
 0x768   : > { %v7963_v58 = vpop.f32.mrb[54].mxu1 }
 0x769   : > { %v8551_v11 = vpack.c.bf16 %v7963_v58, %v7962_v45  ;;  %8546 = vmatpush3.bf16.msra.mxu0 %v8543_v13  ;;  %v2751_v24 = vpop.f32.mrb[55].mxu1  ;;  %v7156_v45 = vld [vmem:[#allocation8] ss:$0 sm:$0xff] }
 0x76a   : > { %v8547_v57 = vpack.c.bf16 %v2751_v24, %v2748_v63 }
 0x76c   : > { %7947 = vmatmul.mubr.msk.f32.vlgmr.msra.gmra.mrb[22].mxu0 %vm1574_vm3, %v10707_v61  ;;  %8548 = vmatprep.subr.bf16.mxu0 %v8547_v57 }
 0x76d   : > { %8550 = vmatpush3.bf16.msra.mxu0 %v8547_v57  ;;  %7949 = vmatprep.mubr.msk.f32.mxu0 %vm1574_vm3, %v10717_v1 }
 0x76e   : > { %v7966_v56 = vpop.f32.mrb[56].mxu1  ;;  %8552 = vmatprep.subr.bf16.mxu0 %v8551_v11 }
 0x76f   : > { %v2764_v44 = vpop.f32.mrb[57].mxu1 }
 0x770   : > { %7950 = vmatmul.mubr.msk.f32.gmra.mrb[48].mxu0 %vm1574_vm3, %v10720_v2  ;;  %v7967_v35 = vpop.f32.mrb[58].mxu1 }
 0x771   : > { %v8559_v0 = vpack.c.bf16 %v7967_v35, %v7966_v56  ;;  %v2767_v54 = vpop.f32.mrb[59].mxu1  ;;  %8554 = vmatpush3.bf16.msra.mxu0 %v8551_v11  ;;  %7952 = vmatprep.mubr.msk.f32.mxu0 %vm1574_vm3, %v10723_v5  ;;  %v9123_v5 = vld [vmem:[%s11551_s8 + $0x8] sm:$0xff]  }
 0x772   : > { %v8555_v55 = vpack.c.bf16 %v2767_v54, %v2764_v44  ;;  %v7157_v11 = vld [vmem:[#allocation10] ss:$0 sm:$0xff]  ;;  %v7158_v56 = vld [vmem:[#allocation11] ss:$0 sm:$0xff] }
 0x774   : > { %7953 = vmatmul.mubr.msk.f32.gmra.mrb[50].mxu0 %vm1574_vm3, %v10734_v12  ;;  %8556 = vmatprep.subr.bf16.mxu0 %v8555_v55  ;;  %v9124_v12 = vld [vmem:[%s11551_s8] sm:$0xff]  }
 0x775   : > { %8558 = vmatpush3.bf16.msra.mxu0 %v8555_v55  ;;  %7955 = vmatprep.mubr.msk.f32.mxu0 %vm1574_vm3, %v10744_v17  ;;  %v10977_v17 = vld [vmem:[%s11551_s8 + $0x10] sm:$0xff]  }
 0x776   : > { %8560 = vmatprep.subr.bf16.mxu0 %v8559_v0  ;;  %7996 = vmatprep.subr.bf16.mxu1 %v9124_v12 }
 0x777   : > { %7997 = vmatpush3.bf16.msra.mxu1 %v9124_v12 }
 0x778   : > { %7956 = vmatmul.mubr.msk.f32.gmra.mrb[52].mxu0 %vm1574_vm3, %v10747_v18 }
 0x779   : > { %8562 = vmatpush3.bf16.msra.mxu0 %v8559_v0  ;;  %7984 = vmatprep.mubr.msk.f32.mxu0 %vm1574_vm3, %v10750_v21 }
 0x77a   : > { %8006 = vmatprep.subr.bf16.mxu0 %v9123_v5 }
 0x77c   : > { %7985 = vmatmul.mubr.msk.f32.vlgmr.msra.gmra.mrb[54].mxu0 %vm1574_vm3, %v10764_v27 }
 0x77d   : > { %7987 = vmatprep.mubr.msk.f32.mxu0 %vm1574_vm3, %v10770_v31  ;;  %8007 = vmatpush3.bf16.msra.mxu0 %v9123_v5 }
 0x77e   : > { %8060 = vmatprep.subr.bf16.mxu0 %v10977_v17 }
 0x780   : > { %7988 = vmatmul.mubr.msk.f32.gmra.mrb[56].mxu0 %vm1574_vm3, %v10782_v34 }
 0x781   : > { %7990 = vmatprep.mubr.msk.f32.mxu0 %vm1574_vm3, %v10785_v36 }
 0x784   : > { %7991 = vmatmul.mubr.msk.f32.gmra.mrb[58].mxu0 %vm1574_vm3, %v10793_v37 }
 0x785   : > { %7993 = vmatprep.mubr.msk.f32.mxu0 %vm1574_vm3, %v10666_v26 }
 0x788   : > { %7994 = vmatmul.mubr.msk.f32.gmra.mrb[60].mxu0 %vm1574_vm3, %v10767_v29 }
 0x83f   : > { %v7948_v18 = vpop.f32.mrb[22].mxu0 }
 0x840   : > { %v2672_v36 = vadd.f32 %v7948_v18, %v10936_v15  ;;  %v2666_v37 = vpop.f32.mrb[23].mxu0 }
 0x841   : > { %v2667_v3 = vadd.f32 %v2666_v37, %v10932_v4 }
 0x843   : > { %v7951_v26 = vpop.f32.mrb[48].mxu0 }
 0x844   : > { %v2682_v28 = vadd.f32 %v7951_v26, %v10934_v40  ;;  %v2676_v29 = vpop.f32.mrb[49].mxu0 }
 0x845   : > { %v2677_v60 = vadd.f32 %v10930_v41, %v2676_v29 }
 0x847   : > { %v7954_v52 = vpop.f32.mrb[50].mxu0 }
 0x848   : > { %v2692_v59 = vadd.f32 %v7954_v52, %v2588_v6  ;;  %v2686_v46 = vpop.f32.mrb[51].mxu0 }
 0x849   : > { %v2687_v43 = vadd.f32 %v2686_v46, %v10940_v30 }
 0x84b   : > { %v7957_v7 = vpop.f32.mrb[52].mxu0 }
 0x84c   : > { %v2702_v13 = vadd.f32 %v7957_v7, %v10942_v32  ;;  %v2696_v33 = vpop.f32.mrb[53].mxu0 }
 0x84d   : > { %v2697_v15 = vadd.f32 %v10938_v62, %v2696_v33 }
 0x84f   : > { %v7986_v22 = vpop.f32.mrb[54].mxu0 }
 0x850   : > { %v2885_v4 = vadd.f32 %v7986_v22, %v2672_v36  ;;  %v2845_v63 = vpop.f32.mrb[55].mxu0 }
 0x851   : > { %v2884_v58 = vadd.f32 %v2845_v63, %v2667_v3 }
 0x852   : > { %v2900_v40 = vadd.f32 %v7156_v45, %v2885_v4 }
 0x853   : > { %v2899_v24 = vadd.f32 %v7156_v45, %v2884_v58  ;;  %v7989_v41 = vpop.f32.mrb[56].mxu0 }
 0x854   : > { %v2908_v6 = vadd.f32 %v2900_v40, %v1951_v10  ;;  %v2887_v57 = vadd.f32 %v7989_v41, %v2682_v28  ;;  %v2855_v30 = vpop.f32.mrb[57].mxu0 }
 0x855   : > { %v2907_v32 = vadd.f32 %v2899_v24, %v1950_v38  ;;  %v2886_v44 = vadd.f32 %v2855_v30, %v2677_v60 }
 0x856   : > { %v2923_v62 = vmul.f32 %v7157_v11, %v2908_v6  ;;  %v2902_v35 = vadd.f32 %v7156_v45, %v2887_v57 }
 0x857   : > { %v2922_v0 = vmul.f32 %v7157_v11, %v2907_v32  ;;  %v10991_v54 = vpack.c.bf16 %v2908_v6, %v2907_v32  ;;  %v2901_v55 = vadd.f32 %v7156_v45, %v2886_v44  ;;  %v7992_v5 = vpop.f32.mrb[58].mxu0 }
 0x858   : > { %v2938_v12 = vadd.f32 %v7158_v56, %v2923_v62  ;;  %v2910_v18 = vadd.f32 %v2902_v35, %v1953_v25  ;;  %v2889_v8 = vadd.f32 %v7992_v5, %v2692_v59  ;;  %v2865_v10 = vpop.f32.mrb[59].mxu0 }
 0x859   : > { %v2937_v36 = vadd.f32 %v7158_v56, %v2922_v0  ;;  %v2909_v37 = vadd.f32 %v2901_v55, %v1952_v42  ;;  %v2888_v9 = vadd.f32 %v2865_v10, %v2687_v43 }
 0x85a   : > { %v2946_v38 = vmax.f32 %v2938_v12, 0.0  ;;  %v2925_v3 = vmul.f32 %v7157_v11, %v2910_v18  ;;  %v2904_v26 = vadd.f32 %v7156_v45, %v2889_v8 }
 0x85b   : > { %v2945_v28 = vmax.f32 %v2937_v36, 0.0  ;;  %v2924_v29 = vmul.f32 %v7157_v11, %v2909_v37  ;;  %v10997_v60 = vpack.c.bf16 %v2910_v18, %v2909_v37  ;;  %v2903_v52 = vadd.f32 %v7156_v45, %v2888_v9  ;;  %v7995_v46 = vpop.f32.mrb[60].mxu0 }
 0x85c   : > { %v2940_v7 = vadd.f32 %v7158_v56, %v2925_v3  ;;  %v2912_v25 = vadd.f32 %v2904_v26, %v11552_v14  ;;  %v2891_v59 = vadd.f32 %v7995_v46, %v2702_v13  ;;  %v2875_v33 = vpop.f32.mrb[61].mxu0  ;;  %v11554_v13 = vmax.f32 %v10828_v49, 0.0 }
 0x85d   : > { %v2939_v22 = vadd.f32 %v7158_v56, %v2924_v29  ;;  %v2911_v42 = vadd.f32 %v2903_v52, %v11553_v16  ;;  %v2890_v43 = vadd.f32 %v2875_v33, %v2697_v15  ;;  %v2953_v4 = vpack.c.bf16 %v2946_v38, %v2945_v28 }
 0x85e   : > { %v2948_v63 = vmax.f32 %v2940_v7, 0.0  ;;  %v2927_v58 = vmul.f32 %v7157_v11, %v2912_v25  ;;  %v2906_v40 = vadd.f32 %v7156_v45, %v2891_v59  ;;  %v11555_v15 = vmax.f32 %v10830_v51, 0.0 }
 0x85f   : > { %v2947_v24 = vmax.f32 %v2939_v22, 0.0  ;;  %v2926_v41 = vmul.f32 %v7157_v11, %v2911_v42  ;;  %v8619_v6 = vpack.c.bf16 %v2912_v25, %v2911_v42  ;;  %v2905_v57 = vadd.f32 %v7156_v45, %v2890_v43  ;;  %7998 = vmatprep.mubr.msk.bf16.mxu1 %vm1970_vm4, %v2953_v4  ;;  %8008 = vmatprep.mubr.msk.bf16.mxu0 %vm1970_vm4, %v2953_v4 }
 0x860   : > { %v2942_v48 = vadd.f32 %v7158_v56, %v2927_v58  ;;  %v2914_v30 = vadd.f32 %v2906_v40, %v11554_v13  ;;  %v11059_v9 = vmul.u32 2, %v10694_v50 }
 0x861   : > { %v2954_v32 = vpack.c.bf16 %v2948_v63, %v2947_v24  ;;  %v2941_v53 = vadd.f32 %v7158_v56, %v2926_v41  ;;  %v2913_v44 = vadd.f32 %v2905_v57, %v11555_v15 }
 0x862   : > { %v2950_v62 = vmax.f32 %v2942_v48, 0.0  ;;  %v2929_v35 = vmul.f32 %v7157_v11, %v2914_v30  ;;  %vm3049_vm9 = vcmp.eq.s32.totalorder %v10654_v20, %v11059_v9 }
 0x863   : > { %v2949_v0 = vmax.f32 %v2941_v53, 0.0  ;;  %v2928_v55 = vmul.f32 %v7157_v11, %v2913_v44  ;;  %v8623_v5 = vpack.c.bf16 %v2914_v30, %v2913_v44  ;;  %7999 = vmatmul.mubr.msk.bf16.vlgmr.msra.gmra.mrb[60].mxu1 %vm1970_vm4, %v2954_v32  ;;  %8009 = vmatmul.mubr.msk.bf16.vlgmr.msra.gmra.mrb[64].mxu0 %vm1970_vm4, %v2954_v32  ;;  %v11019_v11 = vmul.u32 2, %v10652_v19 }
 0x864   : > { %v2944_v45 = vadd.f32 %v7158_v56, %v2929_v35  ;;  %8061 = vmatpush3.bf16.msra.mxu0 %v10977_v17  ;;  %v11556_v17 = vmov 0.0   ;;  %v11032_v19 = vmul.u32 2, %v10681_v39 }
 0x865   : > { %v2943_v12 = vadd.f32 %v7158_v56, %v2928_v55  ;;  %8612 = vmatprep.subr.bf16.mxu0 %v10991_v54  ;;  %v2955_v49 = vpack.c.bf16 %v2950_v62, %v2949_v0  ;;  %vm3046_vm5 = vcmp.eq.s32.totalorder %v10654_v20, %v11019_v11  ;;  %v3128_v36 = vadd.s32 1, %v11019_v11 }
 0x866   : > { %v2952_v18 = vmax.f32 %v2944_v45, 0.0  ;;  %v11029_v56 = vsel %vm3046_vm5, 1.0, %v11556_v17  ;;  %vm3047_vm6 = vcmp.eq.s32.totalorder %v10654_v20, %v11032_v19  ;;  %v3129_v38 = vadd.s32 1, %v11032_v19 }
 0x867   : > { %v2951_v8 = vmax.f32 %v2943_v12, 0.0  ;;  %8002 = vmatprep.mubr.msk.bf16.mxu1 %vm1970_vm4, %v2955_v49  ;;  %8012 = vmatprep.mubr.msk.bf16.mxu0 %vm1970_vm4, %v2955_v49  ;;  %v11040_v10 = vsel %vm3047_vm6, 1.0, %v11556_v17  ;;  %vm3132_vm7 = vcmp.eq.s32.totalorder %v10654_v20, %v3128_v36  ;;  %v11071_v28 = vsel %vm3049_vm9, 1.0, %v11556_v17 }
 0x868   : > { %v11051_v37 = vsel %vm3132_vm7, 1.0, %v11556_v17  ;;  %vm3133_vm10 = vcmp.eq.s32.totalorder %v10654_v20, %v3129_v38 }
 0x869   : > { %v2956_v51 = vpack.c.bf16 %v2952_v18, %v2951_v8  ;;  %v11083_v50 = vsel %vm3133_vm10, 1.0, %v11556_v17 }
 0x86b   : > { %8003 = vmatmul.mubr.msk.bf16.gmra.mrb[64].mxu1 %vm1970_vm4, %v2956_v51  ;;  %8013 = vmatmul.mubr.msk.bf16.gmra.mrb[68].mxu0 %vm1970_vm4, %v2956_v51 }
 0x86c   : > { %8062 = vmatprep.mubr.msk.bf16.mxu0 %vm1970_vm4, %v2953_v4  ;;  %8032 = vmatprep.mubr.msk.f32.mxu1 %vm1574_vm3, %v11051_v37 }
 0x873   : > { %8063 = vmatmul.mubr.msk.bf16.vlgmr.msra.gmra.mrb[72].mxu0 %vm1970_vm4, %v2954_v32 }
 0x874   : > { %8614 = vmatpush3.bf16.msra.mxu0 %v10991_v54  ;;  %8066 = vmatprep.mubr.msk.bf16.mxu0 %vm1970_vm4, %v2955_v49 }
 0x875   : > { %8616 = vmatprep.subr.bf16.mxu0 %v10997_v60 }
 0x878   : > { %8618 = vmatpush3.bf16.msra.mxu0 %v10997_v60 }
 0x879   : > { %8620 = vmatprep.subr.bf16.mxu0 %v8619_v6 }
 0x87b   : > { %8067 = vmatmul.mubr.msk.bf16.gmra.mrb[76].mxu0 %vm1970_vm4, %v2956_v51  ;;  %v3408_v51 = vadd.s32 2, %v11019_v11  ;;  %v3409_v11 = vadd.s32 2, %v11032_v19 }
 0x87c   : > { %8622 = vmatpush3.bf16.msra.mxu0 %v8619_v6  ;;  %8108 = vmatprep.mubr.msk.f32.mxu0 %vm1574_vm3, %v11029_v56 }
 0x87d   : > { %8624 = vmatprep.subr.bf16.mxu0 %v8623_v5  ;;  %vm3412_vm13 = vcmp.eq.s32.totalorder %v10654_v20, %v3408_v51  ;;  %vm3413_vm14 = vcmp.eq.s32.totalorder %v10654_v20, %v3409_v11 }
 0x87e   : > { %v11105_v36 = vsel %vm3412_vm13, 1.0, %v11556_v17 }
 0x880   : > { %8626 = vmatpush3.bf16.msra.mxu0 %v8623_v5 }
 0x881   : > { %8628 = vmatprep.subr.bf16.mxu0 %v10991_v54 }
 0x883   : > { %8109 = vmatmul.mubr.msk.f32.vlgmr.msra.gmra.mrb[62].mxu0 %vm1574_vm3, %v11040_v10 }
 0x884   : > { %8630 = vmatpush3.bf16.msra.mxu0 %v10991_v54  ;;  %v11056_v54 = vmul.u32 2, %v10690_v47  ;;  %v3131_v47 = vadd.s32 1, %v11059_v9 }
 0x885   : > { %8632 = vmatprep.subr.bf16.mxu0 %v10997_v60 }
 0x886   : > { %v3130_v3 = vadd.s32 1, %v11056_v54  ;;  %vm3048_vm8 = vcmp.eq.s32.totalorder %v10654_v20, %v11056_v54  ;;  %vm3135_vm12 = vcmp.eq.s32.totalorder %v10654_v20, %v3131_v47  ;;  %v3410_v38 = vadd.s32 2, %v11056_v54  ;;  %v9126_v54 = vld [vmem:[%s11557_s22] sm:$0xff]   ;;  %v7190_v47 = vld [vmem:[#allocation13] ss:$0 sm:$0xff]  ;;  %s11564_s22 = sld [smem:[#allocation77_spill]] }
 0x887   : > { %v11068_v26 = vsel %vm3048_vm8, 1.0, %v11556_v17 }
 0x888   : > { %8634 = vmatpush3.bf16.msra.mxu0 %v10997_v60  ;;  %8111 = vmatprep.mubr.msk.f32.mxu0 %vm1574_vm3, %v11068_v26  ;;  %vm3134_vm11 = vcmp.eq.s32.totalorder %v10654_v20, %v3130_v3  ;;  %v3139_v60 = vsel %vm3135_vm12, 1.0, %v11556_v17  ;;  %v3411_v3 = vadd.s32 2, %v11059_v9  ;;  %vm3414_vm15 = vcmp.eq.s32.totalorder %v10654_v20, %v3410_v38  ;;  %v9127_v9 = vld [vmem:[%s11558_s3 + $0x8] sm:$0xff]  }
 0x889   : > { %8636 = vmatprep.subr.bf16.mxu0 %v8619_v6  ;;  %8112 = vmatmul.mubr.msk.f32.gmra.mrb[80].mxu0 %vm1574_vm3, %v11071_v28  ;;  %v3138_v29 = vsel %vm3134_vm11, 1.0, %v11556_v17 }
 0x88a   : > { %8130 = vmatprep.mubr.msk.f32.mxu0 %vm1574_vm3, %v11051_v37  ;;  %vm3415_vm0 = vcmp.eq.s32.totalorder %v10654_v20, %v3411_v3 }
 0x88b   : > { %v3419_v19 = vsel %vm3415_vm0, 1.0, %v11556_v17 }
 0x88c   : > { %8638 = vmatpush3.bf16.msra.mxu0 %v8619_v6 }
 0x88d   : > { %8640 = vmatprep.subr.bf16.mxu0 %v8623_v5 }
 0x890   : > { %8642 = vmatpush3.bf16.msra.mxu0 %v8623_v5 }
 0x893   : > { %8131 = vmatmul.mubr.msk.f32.vlgmr.msra.gmra.mrb[82].mxu0 %vm1574_vm3, %v11083_v50 }
 0x894   : > { %8133 = vmatprep.mubr.msk.f32.mxu0 %vm1574_vm3, %v3138_v29 }
 0x897   : > { %8134 = vmatmul.mubr.msk.f32.gmra.mrb[84].mxu0 %vm1574_vm3, %v3139_v60 }
 0x936   : > { %v8000_v52 = vpop.f32.mrb[60].mxu1  ;;  %v8010_v46 = vpop.f32.mrb[64].mxu0 }
 0x937   : > { %v3011_v7 = vpop.f32.mrb[61].mxu1  ;;  %v3097_v14 = vpop.f32.mrb[65].mxu0 }
 0x938   : > { %v8001_v25 = vpop.f32.mrb[62].mxu1  ;;  %v8011_v59 = vpop.f32.mrb[66].mxu0 }
 0x939   : > { %v8583_v33 = vpack.c.bf16 %v8001_v25, %v8000_v52  ;;  %v8567_v22 = vpack.c.bf16 %v8011_v59, %v8010_v46  ;;  %v3014_v16 = vpop.f32.mrb[63].mxu1  ;;  %v3100_v42 = vpop.f32.mrb[67].mxu0 }
 0x93a   : > { %v8579_v43 = vpack.c.bf16 %v3014_v16, %v3011_v7  ;;  %v8563_v4 = vpack.c.bf16 %v3100_v42, %v3097_v14 }
 0x93c   : > { %8564 = vmatprep.subr.bf16.mxu1 %v8563_v4 }
 0x93d   : > { %8566 = vmatpush3.bf16.msra.mxu1 %v8563_v4 }
 0x93e   : > { %v8004_v63 = vpop.f32.mrb[64].mxu1  ;;  %v8014_v58 = vpop.f32.mrb[68].mxu0  ;;  %8568 = vmatprep.subr.bf16.mxu1 %v8567_v22 }
 0x93f   : > { %v3027_v40 = vpop.f32.mrb[65].mxu1  ;;  %v3113_v24 = vpop.f32.mrb[69].mxu0 }
 0x940   : > { %v8005_v41 = vpop.f32.mrb[66].mxu1  ;;  %v8015_v6 = vpop.f32.mrb[70].mxu0 }
 0x941   : > { %v8591_v57 = vpack.c.bf16 %v8005_v41, %v8004_v63  ;;  %v8575_v48 = vpack.c.bf16 %v8015_v6, %v8014_v58  ;;  %v3030_v13 = vpop.f32.mrb[67].mxu1  ;;  %v3116_v30 = vpop.f32.mrb[71].mxu0  ;;  %8570 = vmatpush3.bf16.msra.mxu1 %v8567_v22  ;;  %v9128_v63 = vld [vmem:[%s11558_s3 + $0x10] sm:$0xff]  }
 0x942   : > { %v8587_v32 = vpack.c.bf16 %v3030_v13, %v3027_v40  ;;  %v8571_v53 = vpack.c.bf16 %v3116_v30, %v3113_v24 }
 0x944   : > { %8572 = vmatprep.subr.bf16.mxu1 %v8571_v53 }
 0x945   : > { %8574 = vmatpush3.bf16.msra.mxu1 %v8571_v53 }
 0x946   : > { %8576 = vmatprep.subr.bf16.mxu1 %v8575_v48  ;;  %v8064_v15 = vpop.f32.mrb[72].mxu0 }
 0x947   : > { %v3377_v44 = vpop.f32.mrb[73].mxu0 }
 0x948   : > { %v8065_v62 = vpop.f32.mrb[74].mxu0 }
 0x949   : > { %v8599_v35 = vpack.c.bf16 %v8065_v62, %v8064_v15  ;;  %8578 = vmatpush3.bf16.msra.mxu1 %v8575_v48  ;;  %v3380_v0 = vpop.f32.mrb[75].mxu0 }
 0x94a   : > { %v8595_v55 = vpack.c.bf16 %v3380_v0, %v3377_v44  ;;  %8580 = vmatprep.subr.bf16.mxu1 %v8579_v43 }
 0x94c   : > { %8033 = vmatmul.mubr.msk.f32.vlgmr.msra.gmra.mrb[42].mxu1 %vm1574_vm3, %v11083_v50 }
 0x94d   : > { %8582 = vmatpush3.bf16.msra.mxu1 %v8579_v43  ;;  %8035 = vmatprep.mubr.msk.f32.mxu1 %vm1574_vm3, %v3138_v29 }
 0x94e   : > { %8584 = vmatprep.subr.bf16.mxu1 %v8583_v33  ;;  %v8068_v5 = vpop.f32.mrb[76].mxu0 }
 0x94f   : > { %v3393_v45 = vpop.f32.mrb[77].mxu0 }
 0x950   : > { %v8069_v12 = vpop.f32.mrb[78].mxu0  ;;  %8036 = vmatmul.mubr.msk.f32.gmra.mrb[68].mxu1 %vm1574_vm3, %v3139_v60 }
 0x951   : > { %v8607_v49 = vpack.c.bf16 %v8069_v12, %v8068_v5  ;;  %8586 = vmatpush3.bf16.msra.mxu1 %v8583_v33  ;;  %v3396_v18 = vpop.f32.mrb[79].mxu0  ;;  %8054 = vmatprep.mubr.msk.f32.mxu1 %vm1574_vm3, %v11029_v56 }
 0x952   : > { %v8603_v8 = vpack.c.bf16 %v3396_v18, %v3393_v45  ;;  %8588 = vmatprep.subr.bf16.mxu1 %v8587_v32 }
 0x955   : > { %8590 = vmatpush3.bf16.msra.mxu1 %v8587_v32 }
 0x956   : > { %8592 = vmatprep.subr.bf16.mxu1 %v8591_v57  ;;  %v11137_v58 = vpop.f32.mrb[62].mxu0 }
 0x957   : > { %v11139_v40 = vpop.f32.mrb[63].mxu0 }
 0x959   : > { %8594 = vmatpush3.bf16.msra.mxu1 %v8591_v57 }
 0x95a   : > { %8596 = vmatprep.subr.bf16.mxu1 %v8595_v55 }
 0x95c   : > { %8055 = vmatmul.mubr.msk.f32.vlgmr.msra.gmra.mrb[42].mxu1 %vm1574_vm3, %v11040_v10  ;;  %v11141_v24 = vpop.f32.mrb[80].mxu0 }
 0x95d   : > { %8598 = vmatpush3.bf16.msra.mxu1 %v8595_v55  ;;  %8057 = vmatprep.mubr.msk.f32.mxu1 %vm1574_vm3, %v11068_v26  ;;  %v11117_v26 = vsel %vm3413_vm14, 1.0, %v11556_v17  ;;  %v11143_v41 = vpop.f32.mrb[81].mxu0 }
 0x95e   : > { %8600 = vmatprep.subr.bf16.mxu1 %v8599_v35 }
 0x960   : > { %8058 = vmatmul.mubr.msk.f32.gmra.mrb[68].mxu1 %vm1574_vm3, %v11071_v28  ;;  %v3418_v28 = vsel %vm3414_vm15, 1.0, %v11556_v17 }
 0x961   : > { %8602 = vmatpush3.bf16.msra.mxu1 %v8599_v35  ;;  %8086 = vmatprep.mubr.msk.f32.mxu1 %vm1574_vm3, %v11105_v36 }
 0x962   : > { %8604 = vmatprep.subr.bf16.mxu1 %v8603_v8 }
 0x965   : > { %8606 = vmatpush3.bf16.msra.mxu1 %v8603_v8 }
 0x966   : > { %8608 = vmatprep.subr.bf16.mxu1 %v8607_v49  ;;  %v11145_v6 = vpop.f32.mrb[82].mxu0 }
 0x967   : > { %v3707_v57 = vmax.f32 %v11137_v58, %v11145_v6  ;;  %v11149_v48 = vpop.f32.mrb[83].mxu0 }
 0x968   : > { %v3706_v13 = vmax.f32 %v11139_v40, %v11149_v48 }
 0x969   : > { %8610 = vmatpush3.bf16.msra.mxu1 %v8607_v49 }
 0x96a   : > { %8136 = vmatprep.subr.bf16.mxu1 %v9126_v54  ;;  %v11153_v30 = vpop.f32.mrb[84].mxu0 }
 0x96b   : > { %v3709_v32 = vmax.f32 %v11141_v24, %v11153_v30  ;;  %v11157_v53 = vpop.f32.mrb[85].mxu0 }
 0x96c   : > { %8087 = vmatmul.mubr.msk.f32.vlgmr.msra.gmra.mrb[42].mxu1 %vm1574_vm3, %v11117_v26  ;;  %v3708_v15 = vmax.f32 %v11143_v41, %v11157_v53 }
 0x96d   : > { %8089 = vmatprep.mubr.msk.f32.mxu1 %vm1574_vm3, %v3418_v28  ;;  %8137 = vmatpush3.bf16.msra.mxu1 %v9126_v54  ;;  %v9130_v54 = vld [vmem:[%s11559_s2 + $0x8] sm:$0xff]  }
 0x96e   : > { %8142 = vmatprep.subr.bf16.mxu1 %v9127_v9 }
 0x970   : > { %8090 = vmatmul.mubr.msk.f32.gmra.mrb[68].mxu1 %vm1574_vm3, %v3419_v19  ;;  %vm3833_vm3 = vcmask 261120   ;;  %v9129_v19 = vld [vmem:[%s11559_s2] sm:$0xff]  }
 0x971   : > { %8156 = vmatprep.mubr.msk.f32.mxu0 %vm3833_vm3, %v10659_v23 }
 0xa3f   : > { %v8088_v29 = vpop.f32.mrb[42].mxu1 }
 0xa40   : > { %v3529_v60 = vadd.f32 %v8088_v29, %v7190_v47  ;;  %v3498_v52 = vpop.f32.mrb[43].mxu1 }
 0xa41   : > { %v3528_v46 = vadd.f32 %v7190_v47, %v3498_v52 }
 0xa42   : > { %v3533_v7 = vmax.f32 %v3529_v60, 0.0 }
 0xa43   : > { %v3532_v14 = vmax.f32 %v3528_v46, 0.0  ;;  %v8091_v25 = vpop.f32.mrb[68].mxu1 }
 0xa44   : > { %v3531_v59 = vadd.f32 %v8091_v25, %v7190_v47  ;;  %v3508_v33 = vpop.f32.mrb[69].mxu1 }
 0xa45   : > { %v3710_v22 = vpack.c.bf16 %v3533_v7, %v3532_v14  ;;  %v3530_v16 = vadd.f32 %v7190_v47, %v3508_v33  ;;  %v7220_v33 = vld [vmem:[#allocation14] ss:$0 sm:$0xff] }
 0xa46   : > { %v3535_v42 = vmax.f32 %v3531_v59, 0.0 }
 0xa47   : > { %v3534_v43 = vmax.f32 %v3530_v16, 0.0  ;;  %8138 = vmatprep.mubr.msk.bf16.mxu1 %vm1970_vm4, %v3710_v22 }
 0xa49   : > { %v3711_v4 = vpack.c.bf16 %v3535_v42, %v3534_v43 }
 0xa4b   : > { %8139 = vmatmul.mubr.msk.bf16.vlgmr.msra.gmra.mrb[72].mxu1 %vm1970_vm4, %v3711_v4 }
 0xa4c   : > { %8144 = vmatprep.mubr.msk.bf16.mxu1 %vm1970_vm4, %v3710_v22  ;;  %8143 = vmatpush3.bf16.msra.mxu1 %v9127_v9  ;;  %v9131_v9 = vld [vmem:[%s11559_s2 + $0x10] sm:$0xff]  }
 0xa4d   : > { %8162 = vmatprep.subr.bf16.mxu1 %v9128_v63 }
 0xa53   : > { %8145 = vmatmul.mubr.msk.bf16.vlgmr.msra.gmra.mrb[76].mxu1 %vm1970_vm4, %v3711_v4 }
 0xa54   : > { %8164 = vmatprep.mubr.msk.bf16.mxu1 %vm1970_vm4, %v3710_v22  ;;  %8163 = vmatpush3.bf16.msra.mxu1 %v9128_v63 }
 0xa55   : > { %8182 = vmatprep.subr.bf16.mxu1 %v9129_v19 }
 0xa5b   : > { %8165 = vmatmul.mubr.msk.bf16.vlgmr.msra.gmra.mrb[80].mxu1 %vm1970_vm4, %v3711_v4  ;;  %v7221_v4 = vld [vmem:[#allocation16] ss:$0 sm:$0xff] }
 0xa5c   : > { %8183 = vmatpush3.bf16.msra.mxu1 %v9129_v19 }
 0xb1e   : > { %v8140_v44 = vpop.f32.mrb[72].mxu1 }
 0xb1f   : > { %v3760_v62 = vpop.f32.mrb[73].mxu1 }
 0xb20   : > { %v8141_v35 = vpop.f32.mrb[74].mxu1 }
 0xb21   : > { %v8647_v0 = vpack.c.bf16 %v8141_v35, %v8140_v44  ;;  %v3763_v55 = vpop.f32.mrb[75].mxu1 }
 0xb22   : > { %v8643_v5 = vpack.c.bf16 %v3763_v55, %v3760_v62  ;;  %v7222_v55 = vld [vmem:[#allocation17] ss:$0 sm:$0xff] }
 0xb24   : > { %8644 = vmatprep.subr.bf16.mxu0 %v8643_v5 }
 0xb25   : > { %8646 = vmatpush3.bf16.msra.mxu0 %v8643_v5 }
 0xb26   : > { %v8146_v45 = vpop.f32.mrb[76].mxu1  ;;  %8648 = vmatprep.subr.bf16.mxu0 %v8647_v0 }
 0xb27   : > { %v3818_v12 = vpop.f32.mrb[77].mxu1 }
 0xb28   : > { %v8147_v49 = vpop.f32.mrb[78].mxu1 }
 0xb29   : > { %v3821_v18 = vpop.f32.mrb[79].mxu1  ;;  %8650 = vmatpush3.bf16.msra.mxu0 %v8647_v0 }
 0xb2c   : > { %8157 = vmatmul.mubr.msk.f32.vlgmr.msra.gmra.mrb[86].mxu0 %vm3833_vm3, %v10707_v61 }
 0xb2d   : > { %8159 = vmatprep.mubr.msk.f32.mxu0 %vm3833_vm3, %v10717_v1 }
 0xb2e   : > { %v8166_v8 = vpop.f32.mrb[80].mxu1 }
 0xb2f   : > { %v3970_v51 = vpop.f32.mrb[81].mxu1 }
 0xb30   : > { %8160 = vmatmul.mubr.msk.f32.gmra.mrb[88].mxu0 %vm3833_vm3, %v10720_v2  ;;  %v8167_v11 = vpop.f32.mrb[82].mxu1 }
 0xb31   : > { %v8655_v38 = vpack.c.bf16 %v8167_v11, %v8166_v8  ;;  %v3973_v3 = vpop.f32.mrb[83].mxu1  ;;  %8176 = vmatprep.mubr.msk.f32.mxu0 %vm3833_vm3, %v10750_v21 }
 0xb32   : > { %v8651_v28 = vpack.c.bf16 %v3973_v3, %v3970_v51 }
 0xb34   : > { %8652 = vmatprep.subr.bf16.mxu0 %v8651_v28 }
 0xb35   : > { %8654 = vmatpush3.bf16.msra.mxu0 %v8651_v28 }
 0xb36   : > { %8656 = vmatprep.subr.bf16.mxu0 %v8655_v38 }
 0xb39   : > { %8658 = vmatpush3.bf16.msra.mxu0 %v8655_v38 }
 0xb3a   : > { %8188 = vmatprep.subr.bf16.mxu0 %v9130_v54 }
 0xb3c   : > { %8177 = vmatmul.mubr.msk.f32.vlgmr.msra.gmra.mrb[90].mxu0 %vm3833_vm3, %v10764_v27 }
 0xb3d   : > { %8179 = vmatprep.mubr.msk.f32.mxu0 %vm3833_vm3, %v10770_v31  ;;  %8189 = vmatpush3.bf16.msra.mxu0 %v9130_v54 }
 0xb3e   : > { %8208 = vmatprep.subr.bf16.mxu0 %v9131_v9 }
 0xb40   : > { %8180 = vmatmul.mubr.msk.f32.gmra.mrb[92].mxu0 %vm3833_vm3, %v10782_v34 }
 0xbff   : > { %v8158_v47 = vpop.f32.mrb[86].mxu0 }
 0xc00   : > { %v3914_v29 = vadd.f32 %v8158_v47, %v3821_v18  ;;  %v3908_v60 = vpop.f32.mrb[87].mxu0 }
 0xc01   : > { %v3909_v52 = vadd.f32 %v3908_v60, %v3818_v12 }
 0xc03   : > { %v8161_v46 = vpop.f32.mrb[88].mxu0 }
 0xc04   : > { %v3924_v7 = vadd.f32 %v8161_v46, %v8147_v49  ;;  %v3918_v14 = vpop.f32.mrb[89].mxu0 }
 0xc05   : > { %v3919_v25 = vadd.f32 %v8146_v45, %v3918_v14 }
 0xc0f   : > { %v8178_v59 = vpop.f32.mrb[90].mxu0 }
 0xc10   : > { %v4079_v22 = vadd.f32 %v8178_v59, %v3914_v29  ;;  %v4059_v16 = vpop.f32.mrb[91].mxu0 }
 0xc11   : > { %v4078_v42 = vadd.f32 %v4059_v16, %v3909_v52  ;;  %v9133_v16 = vld [vmem:[%s11561_s18 + $0x8] sm:$0xff]  }
 0xc12   : > { %v4090_v43 = vadd.f32 %v7220_v33, %v4079_v22  ;;  %v9132_v22 = vld [vmem:[%s11560_s0] sm:$0xff]   ;;  %s1366_s0 = sand.u32 1, %s9928_s23  }
 0xc13   : > { %v4089_v63 = vadd.f32 %v7220_v33, %v4078_v42  ;;  %v8181_v44 = vpop.f32.mrb[92].mxu0  ;;  %v9134_v42 = vld [vmem:[%s11561_s18 + $0x10] sm:$0xff]  }
 0xc14   : > { %v11181_v62 = vadd.f32 %v4090_v43, %v3707_v57  ;;  %v4081_v35 = vadd.f32 %v8181_v44, %v3924_v7  ;;  %v4069_v0 = vpop.f32.mrb[93].mxu0 }
 0xc15   : > { %v11186_v5 = vadd.f32 %v4089_v63, %v3706_v13  ;;  %v4080_v45 = vadd.f32 %v4069_v0, %v3919_v25 }
 0xc16   : > { %v4105_v12 = vmul.f32 %v7221_v4, %v11181_v62  ;;  %v4092_v49 = vadd.f32 %v7220_v33, %v4081_v35 }
 0xc17   : > { %v4104_v18 = vmul.f32 %v7221_v4, %v11186_v5  ;;  %v4091_v8 = vadd.f32 %v7220_v33, %v4080_v45 }
 0xc18   : > { %v4116_v51 = vadd.f32 %v7222_v55, %v4105_v12  ;;  %v11193_v58 = vadd.f32 %v4092_v49, %v3709_v32  ;;  %v7244_v49 = vld [vmem:[#allocation19] ss:$0 sm:$0xff] }
 0xc19   : > { %v4115_v6 = vadd.f32 %v7222_v55, %v4104_v18  ;;  %v11198_v40 = vadd.f32 %v4091_v8, %v3708_v15 }
 0xc1a   : > { %v4120_v57 = vmax.f32 %v4116_v51, 0.0  ;;  %v4107_v48 = vmul.f32 %v7221_v4, %v11193_v58 }
 0xc1b   : > { %v4119_v13 = vmax.f32 %v4115_v6, 0.0  ;;  %v4106_v11 = vmul.f32 %v7221_v4, %v11198_v40 }
 0xc1c   : > { %v4118_v38 = vadd.f32 %v7222_v55, %v4107_v48 }
 0xc1d   : > { %v4117_v3 = vadd.f32 %v7222_v55, %v4106_v11  ;;  %v4123_v28 = vpack.c.bf16 %v4120_v57, %v4119_v13 }
 0xc1e   : > { %v4122_v19 = vmax.f32 %v4118_v38, 0.0 }
 0xc1f   : > { %v4121_v54 = vmax.f32 %v4117_v3, 0.0  ;;  %8184 = vmatprep.mubr.msk.bf16.mxu1 %vm1970_vm4, %v4123_v28  ;;  %8190 = vmatprep.mubr.msk.bf16.mxu0 %vm1970_vm4, %v4123_v28 }
 0xc21   : > { %v4124_v24 = vpack.c.bf16 %v4122_v19, %v4121_v54 }
 0xc23   : > { %8185 = vmatmul.mubr.msk.bf16.vlgmr.msra.gmra.mrb[84].mxu1 %vm1970_vm4, %v4124_v24  ;;  %8191 = vmatmul.mubr.msk.bf16.vlgmr.msra.gmra.mrb[96].mxu0 %vm1970_vm4, %v4124_v24 }
 0xc24   : > { %8210 = vmatprep.mubr.msk.bf16.mxu0 %vm1970_vm4, %v4123_v28  ;;  %8209 = vmatpush3.bf16.msra.mxu0 %v9131_v9 }
 0xc25   : > { %8202 = vmatprep.mubr.msk.f32.mxu1 %vm3833_vm3, %v10659_v23  ;;  %8228 = vmatprep.subr.bf16.mxu0 %v9132_v22 }
 0xc2b   : > { %8211 = vmatmul.mubr.msk.bf16.vlgmr.msra.gmra.mrb[100].mxu0 %vm1970_vm4, %v4124_v24 }
 0xc2c   : > { %8229 = vmatpush3.bf16.msra.mxu0 %v9132_v22 }
 0xcf6   : > { %v8186_v41 = vpop.f32.mrb[84].mxu1  ;;  %v8192_v30 = vpop.f32.mrb[96].mxu0 }
 0xcf7   : > { %v4173_v32 = vpop.f32.mrb[85].mxu1  ;;  %v4231_v53 = vpop.f32.mrb[97].mxu0 }
 0xcf8   : > { %v8187_v15 = vpop.f32.mrb[86].mxu1  ;;  %v8193_v47 = vpop.f32.mrb[98].mxu0 }
 0xcf9   : > { %v8663_v29 = vpack.c.bf16 %v8187_v15, %v8186_v41  ;;  %v4176_v60 = vpop.f32.mrb[87].mxu1  ;;  %v4234_v52 = vpop.f32.mrb[99].mxu0 }
 0xcfa   : > { %v8659_v46 = vpack.c.bf16 %v4176_v60, %v4173_v32 }
 0xcfc   : > { %8660 = vmatprep.subr.bf16.mxu1 %v8659_v46 }
 0xcfd   : > { %8662 = vmatpush3.bf16.msra.mxu1 %v8659_v46 }
 0xcfe   : > { %8664 = vmatprep.subr.bf16.mxu1 %v8663_v29  ;;  %v8212_v7 = vpop.f32.mrb[100].mxu0 }
 0xcff   : > { %v4374_v9 = vpop.f32.mrb[101].mxu0 }
 0xd00   : > { %v8213_v14 = vpop.f32.mrb[102].mxu0 }
 0xd01   : > { %v8671_v25 = vpack.c.bf16 %v8213_v14, %v8212_v7  ;;  %8666 = vmatpush3.bf16.msra.mxu1 %v8663_v29  ;;  %v4377_v59 = vpop.f32.mrb[103].mxu0 }
 0xd02   : > { %v8667_v33 = vpack.c.bf16 %v4377_v59, %v4374_v9 }
 0xd04   : > { %8203 = vmatmul.mubr.msk.f32.vlgmr.msra.gmra.mrb[70].mxu1 %vm3833_vm3, %v10707_v61  ;;  %8668 = vmatprep.subr.bf16.mxu1 %v8667_v33 }
 0xd05   : > { %8670 = vmatpush3.bf16.msra.mxu1 %v8667_v33  ;;  %8205 = vmatprep.mubr.msk.f32.mxu1 %vm3833_vm3, %v10717_v1 }
 0xd06   : > { %8672 = vmatprep.subr.bf16.mxu1 %v8671_v25 }
 0xd08   : > { %8206 = vmatmul.mubr.msk.f32.gmra.mrb[88].mxu1 %vm3833_vm3, %v10720_v2 }
 0xd09   : > { %8674 = vmatpush3.bf16.msra.mxu1 %v8671_v25  ;;  %8222 = vmatprep.mubr.msk.f32.mxu1 %vm3833_vm3, %v10750_v21 }
 0xd0a   : > { %8234 = vmatprep.subr.bf16.mxu1 %v9133_v16 }
 0xd0c   : > { %8223 = vmatmul.mubr.msk.f32.vlgmr.msra.gmra.mrb[90].mxu1 %vm3833_vm3, %v10764_v27 }
 0xd0d   : > { %8225 = vmatprep.mubr.msk.f32.mxu1 %vm3833_vm3, %v10770_v31  ;;  %8235 = vmatpush3.bf16.msra.mxu1 %v9133_v16 }
 0xd0e   : > { %8254 = vmatprep.subr.bf16.mxu1 %v9134_v42 }
 0xd10   : > { %8226 = vmatmul.mubr.msk.f32.gmra.mrb[92].mxu1 %vm3833_vm3, %v10782_v34 }
 0xdd7   : > { %v8204_v43 = vpop.f32.mrb[70].mxu1 }
 0xdd8   : > { %v4318_v4 = vadd.f32 %v8204_v43, %v4234_v52  ;;  %v4312_v63 = vpop.f32.mrb[71].mxu1  ;;  %v9135_v43 = vld [vmem:[%s11562_s1 + $0x8] sm:$0xff]  }
 0xdd9   : > { %v4313_v44 = vadd.f32 %v4312_v63, %v4231_v53 }
 0xddb   : > { %v8207_v35 = vpop.f32.mrb[88].mxu1 }
 0xddc   : > { %v4328_v0 = vadd.f32 %v8207_v35, %v8193_v47  ;;  %v4322_v55 = vpop.f32.mrb[89].mxu1 }
 0xddd   : > { %v4323_v45 = vadd.f32 %v8192_v30, %v4322_v55 }
 0xddf   : > { %v8224_v12 = vpop.f32.mrb[90].mxu1 }
 0xde0   : > { %v4475_v18 = vadd.f32 %v8224_v12, %v4318_v4  ;;  %v4455_v8 = vpop.f32.mrb[91].mxu1  ;;  %v9136_v4 = vld [vmem:[%s11562_s1] sm:$0xff]  }
 0xde1   : > { %v4474_v51 = vadd.f32 %v4455_v8, %v4313_v44 }
 0xde2   : > { %v4486_v6 = vadd.f32 %v7244_v49, %v4475_v18 }
 0xde3   : > { %v4485_v57 = vadd.f32 %v7244_v49, %v4474_v51  ;;  %v8227_v48 = vpop.f32.mrb[92].mxu1 }
 0xde4   : > { %v4490_v13 = vmax.f32 %v4486_v6, 0.0  ;;  %v4477_v11 = vadd.f32 %v8227_v48, %v4328_v0  ;;  %v4465_v38 = vpop.f32.mrb[93].mxu1  ;;  %v7267_v6 = vld [vmem:[#allocation22] ss:$0 sm:$0xff] }
 0xde5   : > { %v4489_v3 = vmax.f32 %v4485_v57, 0.0  ;;  %v4476_v28 = vadd.f32 %v4465_v38, %v4323_v45 }
 0xde6   : > { %v4488_v19 = vadd.f32 %v7244_v49, %v4477_v11 }
 0xde7   : > { %v4493_v54 = vpack.c.bf16 %v4490_v13, %v4489_v3  ;;  %v4487_v24 = vadd.f32 %v7244_v49, %v4476_v28  ;;  %v7266_v49 = vld [vmem:[#allocation20] ss:$0 sm:$0xff]  ;;  %v7268_v3 = vld [vmem:[#allocation23] ss:$0 sm:$0xff] }
 0xde8   : > { %v4492_v41 = vmax.f32 %v4488_v19, 0.0 }
 0xde9   : > { %v4491_v32 = vmax.f32 %v4487_v24, 0.0  ;;  %8230 = vmatprep.mubr.msk.bf16.mxu0 %vm1970_vm4, %v4493_v54  ;;  %8236 = vmatprep.mubr.msk.bf16.mxu1 %vm1970_vm4, %v4493_v54 }
 0xdeb   : > { %v4494_v30 = vpack.c.bf16 %v4492_v41, %v4491_v32 }
 0xded   : > { %8231 = vmatmul.mubr.msk.bf16.vlgmr.msra.gmra.mrb[104].mxu0 %vm1970_vm4, %v4494_v30  ;;  %8237 = vmatmul.mubr.msk.bf16.vlgmr.msra.gmra.mrb[96].mxu1 %vm1970_vm4, %v4494_v30 }
 0xdee   : > { %8256 = vmatprep.mubr.msk.bf16.mxu1 %vm1970_vm4, %v4493_v54  ;;  %8255 = vmatpush3.bf16.msra.mxu1 %v9134_v42 }
 0xdef   : > { %8248 = vmatprep.mubr.msk.f32.mxu0 %vm3833_vm3, %v10659_v23  ;;  %8274 = vmatprep.subr.bf16.mxu1 %v9136_v4 }
 0xdf5   : > { %8257 = vmatmul.mubr.msk.bf16.vlgmr.msra.gmra.mrb[100].mxu1 %vm1970_vm4, %v4494_v30 }
 0xdf6   : > { %8275 = vmatpush3.bf16.msra.mxu1 %v9136_v4 }
 0xec0   : > { %v8232_v53 = vpop.f32.mrb[104].mxu0  ;;  %v8238_v15 = vpop.f32.mrb[96].mxu1 }
 0xec1   : > { %v4543_v47 = vpop.f32.mrb[105].mxu0  ;;  %v4601_v29 = vpop.f32.mrb[97].mxu1 }
 0xec2   : > { %v8233_v60 = vpop.f32.mrb[106].mxu0  ;;  %v8239_v52 = vpop.f32.mrb[98].mxu1 }
 0xec3   : > { %v8679_v46 = vpack.c.bf16 %v8233_v60, %v8232_v53  ;;  %v4546_v7 = vpop.f32.mrb[107].mxu0  ;;  %v4604_v9 = vpop.f32.mrb[99].mxu1 }
 0xec4   : > { %v8675_v14 = vpack.c.bf16 %v4546_v7, %v4543_v47 }
 0xec6   : > { %8676 = vmatprep.subr.bf16.mxu0 %v8675_v14 }
 0xec7   : > { %8678 = vmatpush3.bf16.msra.mxu0 %v8675_v14 }
 0xec8   : > { %8680 = vmatprep.subr.bf16.mxu0 %v8679_v46  ;;  %v8258_v25 = vpop.f32.mrb[100].mxu1 }
 0xec9   : > { %v4744_v59 = vpop.f32.mrb[101].mxu1 }
 0xeca   : > { %v8259_v33 = vpop.f32.mrb[102].mxu1 }
 0xecb   : > { %v8687_v22 = vpack.c.bf16 %v8259_v33, %v8258_v25  ;;  %8682 = vmatpush3.bf16.msra.mxu0 %v8679_v46  ;;  %v4747_v16 = vpop.f32.mrb[103].mxu1 }
 0xecc   : > { %v8683_v42 = vpack.c.bf16 %v4747_v16, %v4744_v59 }
 0xece   : > { %8249 = vmatmul.mubr.msk.f32.vlgmr.msra.gmra.mrb[94].mxu0 %vm3833_vm3, %v10707_v61  ;;  %8684 = vmatprep.subr.bf16.mxu0 %v8683_v42 }
 0xecf   : > { %8686 = vmatpush3.bf16.msra.mxu0 %v8683_v42  ;;  %8251 = vmatprep.mubr.msk.f32.mxu0 %vm3833_vm3, %v10717_v1  ;;  %v9137_v1 = vld [vmem:[%s11562_s1 + $0x10] sm:$0xff]   ;;  %s11565_s1 = smov %s11564_s22 }
 0xed0   : > { %8688 = vmatprep.subr.bf16.mxu0 %v8687_v22 }
 0xed2   : > { %8252 = vmatmul.mubr.msk.f32.gmra.mrb[108].mxu0 %vm3833_vm3, %v10720_v2 }
 0xed3   : > { %8690 = vmatpush3.bf16.msra.mxu0 %v8687_v22  ;;  %8268 = vmatprep.mubr.msk.f32.mxu0 %vm3833_vm3, %v10750_v21 }
 0xed4   : > { %8280 = vmatprep.subr.bf16.mxu0 %v9135_v43 }
 0xed6   : > { %8269 = vmatmul.mubr.msk.f32.vlgmr.msra.gmra.mrb[110].mxu0 %vm3833_vm3, %v10764_v27 }
 0xed7   : > { %8271 = vmatprep.mubr.msk.f32.mxu0 %vm3833_vm3, %v10770_v31  ;;  %8281 = vmatpush3.bf16.msra.mxu0 %v9135_v43 }
 0xed8   : > { %8308 = vmatprep.subr.bf16.mxu0 %v9137_v1 }
 0xeda   : > { %8272 = vmatmul.mubr.msk.f32.gmra.mrb[112].mxu0 %vm3833_vm3, %v10782_v34 }
 0xfa1   : > { %v8250_v2 = vpop.f32.mrb[94].mxu0 }
 0xfa2   : > { %v4688_v63 = vadd.f32 %v8250_v2, %v4604_v9  ;;  %v4682_v44 = vpop.f32.mrb[95].mxu0 }
 0xfa3   : > { %v4683_v35 = vadd.f32 %v4682_v44, %v4601_v29 }
 0xfa5   : > { %v8253_v0 = vpop.f32.mrb[108].mxu0 }
 0xfa6   : > { %v4698_v55 = vadd.f32 %v8253_v0, %v8239_v52  ;;  %v4692_v45 = vpop.f32.mrb[109].mxu0 }
 0xfa7   : > { %v4693_v12 = vadd.f32 %v8238_v15, %v4692_v45 }
 0xfa9   : > { %v8270_v31 = vpop.f32.mrb[110].mxu0 }
 0xfaa   : > { %v4845_v18 = vadd.f32 %v8270_v31, %v4688_v63  ;;  %v4825_v34 = vpop.f32.mrb[111].mxu0 }
 0xfab   : > { %v4844_v8 = vadd.f32 %v4825_v34, %v4683_v35 }
 0xfac   : > { %v4856_v51 = vadd.f32 %v7266_v49, %v4845_v18 }
 0xfad   : > { %v4855_v57 = vadd.f32 %v7266_v49, %v4844_v8  ;;  %v8273_v48 = vpop.f32.mrb[112].mxu0  ;;  %v7288_v8 = vld [vmem:[#allocation25] ss:$0 sm:$0xff] }
 0xfae   : > { %v4860_v13 = vadd.f32 %v4856_v51, %v11181_v62  ;;  %v4847_v11 = vadd.f32 %v8273_v48, %v4698_v55  ;;  %v4835_v38 = vpop.f32.mrb[113].mxu0 }
 0xfaf   : > { %v4859_v28 = vadd.f32 %v4855_v57, %v11186_v5  ;;  %v4846_v19 = vadd.f32 %v4835_v38, %v4693_v12 }
 0xfb0   : > { %v4871_v54 = vmul.f32 %v7267_v6, %v4860_v13  ;;  %v4858_v24 = vadd.f32 %v7266_v49, %v4847_v11 }
 0xfb1   : > { %v4870_v41 = vmul.f32 %v7267_v6, %v4859_v28  ;;  %v8715_v32 = vpack.c.bf16 %v4860_v13, %v4859_v28  ;;  %v4857_v30 = vadd.f32 %v7266_v49, %v4846_v19  ;;  %v9139_v49 = vld [vmem:[#allocation26 + $0x8] sm:$0xff]  }
 0xfb2   : > { %v4882_v53 = vadd.f32 %v7268_v3, %v4871_v54  ;;  %v4862_v15 = vadd.f32 %v4858_v24, %v11193_v58 }
 0xfb3   : > { %v4881_v47 = vadd.f32 %v7268_v3, %v4870_v41  ;;  %v4861_v29 = vadd.f32 %v4857_v30, %v11198_v40 }
 0xfb4   : > { %v4886_v60 = vmax.f32 %v4882_v53, 0.0  ;;  %v4873_v52 = vmul.f32 %v7267_v6, %v4862_v15 }
 0xfb5   : > { %v4885_v62 = vmax.f32 %v4881_v47, 0.0  ;;  %v4872_v46 = vmul.f32 %v7267_v6, %v4861_v29  ;;  %v8719_v7 = vpack.c.bf16 %v4862_v15, %v4861_v29  ;;  %v9140_v15 = vld [vmem:[#allocation26 + $0x10] sm:$0xff]  }
 0xfb6   : > { %v4884_v9 = vadd.f32 %v7268_v3, %v4873_v52 }
 0xfb7   : > { %v4883_v14 = vadd.f32 %v7268_v3, %v4872_v46  ;;  %v4889_v5 = vpack.c.bf16 %v4886_v60, %v4885_v62 }
 0xfb8   : > { %v4888_v25 = vmax.f32 %v4884_v9, 0.0 }
 0xfb9   : > { %v4887_v59 = vmax.f32 %v4883_v14, 0.0  ;;  %8276 = vmatprep.mubr.msk.bf16.mxu1 %vm1970_vm4, %v4889_v5  ;;  %8282 = vmatprep.mubr.msk.bf16.mxu0 %vm1970_vm4, %v4889_v5 }
 0xfbb   : > { %v4890_v33 = vpack.c.bf16 %v4888_v25, %v4887_v59  ;;  %v9142_v25 = vld [vmem:[%s11563_s4 + $0x8] sm:$0xff]  }
 0xfbd   : > { %8277 = vmatmul.mubr.msk.bf16.vlgmr.msra.gmra.mrb[104].mxu1 %vm1970_vm4, %v4890_v33  ;;  %8283 = vmatmul.mubr.msk.bf16.vlgmr.msra.gmra.mrb[116].mxu0 %vm1970_vm4, %v4890_v33 }
 0xfbe   : > { %8309 = vmatpush3.bf16.msra.mxu0 %v9137_v1  ;;  %8310 = vmatprep.mubr.msk.bf16.mxu0 %vm1970_vm4, %v4889_v5  ;;  %v9141_v5 = vld [vmem:[%s11563_s4] sm:$0xff]  }
 0xfbf   : > { %8716 = vmatprep.subr.bf16.mxu0 %v8715_v32  ;;  %8294 = vmatprep.mubr.msk.f32.mxu1 %vm3833_vm3, %v11051_v37 }
 0xfc5   : > { %8311 = vmatmul.mubr.msk.bf16.vlgmr.msra.gmra.mrb[120].mxu0 %vm1970_vm4, %v4890_v33  ;;  %v7303_v33 = vld [vmem:[#allocation28] ss:$0 sm:$0xff] }
 0xfc6   : > { %8718 = vmatpush3.bf16.msra.mxu0 %v8715_v32  ;;  %8333 = vmatprep.mubr.msk.f32.mxu0 %vm3833_vm3, %v11029_v56 }
 0xfc7   : > { %8720 = vmatprep.subr.bf16.mxu0 %v8719_v7 }
 0xfca   : > { %8722 = vmatpush3.bf16.msra.mxu0 %v8719_v7 }
 0xfcb   : > { %8724 = vmatprep.subr.bf16.mxu0 %v8715_v32 }
 0xfcd   : > { %8334 = vmatmul.mubr.msk.f32.vlgmr.msra.gmra.mrb[114].mxu0 %vm3833_vm3, %v11040_v10 }
 0xfce   : > { %8726 = vmatpush3.bf16.msra.mxu0 %v8715_v32  ;;  %8344 = vmatprep.mubr.msk.f32.mxu0 %vm3833_vm3, %v11051_v37 }
 0xfcf   : > { %8728 = vmatprep.subr.bf16.mxu0 %v8719_v7 }
 0xfd2   : > { %8730 = vmatpush3.bf16.msra.mxu0 %v8719_v7 }
 0xfd3   : > { %8353 = vmatprep.subr.bf16.mxu0 %v11556_v17 }
 0xfd5   : > { %8345 = vmatmul.mubr.msk.f32.vlgmr.msra.gmra.mrb[124].mxu0 %vm3833_vm3, %v11083_v50 }
 0xfd6   : > { %8354 = vmatpush3.bf16.msra.mxu0 %v9139_v49  ;;  %8355 = vmatprep.mubr.msk.bf16.mxu0 %vm10002_vm1, %v11556_v17 }
0x1090   : > { %v8278_v58 = vpop.f32.mrb[104].mxu1  ;;  %v8284_v40 = vpop.f32.mrb[116].mxu0 }
0x1091   : > { %v4939_v22 = vpop.f32.mrb[105].mxu1  ;;  %v4997_v16 = vpop.f32.mrb[117].mxu0 }
0x1092   : > { %v8279_v42 = vpop.f32.mrb[106].mxu1  ;;  %v8285_v43 = vpop.f32.mrb[118].mxu0 }
0x1093   : > { %v8703_v4 = vpack.c.bf16 %v8279_v42, %v8278_v58  ;;  %v8695_v1 = vpack.c.bf16 %v8285_v43, %v8284_v40  ;;  %v4942_v2 = vpop.f32.mrb[107].mxu1  ;;  %v5000_v63 = vpop.f32.mrb[119].mxu0  ;;  %v7304_v42 = vld [vmem:[#allocation29] ss:$0 sm:$0xff] }
0x1094   : > { %v8699_v44 = vpack.c.bf16 %v4942_v2, %v4939_v22  ;;  %v8691_v35 = vpack.c.bf16 %v5000_v63, %v4997_v16 }
0x1096   : > { %8692 = vmatprep.subr.bf16.mxu1 %v8691_v35 }
0x1097   : > { %8694 = vmatpush3.bf16.msra.mxu1 %v8691_v35 }
0x1098   : > { %8696 = vmatprep.subr.bf16.mxu1 %v8695_v1  ;;  %v8312_v37 = vpop.f32.mrb[120].mxu0 }
0x1099   : > { %v5213_v0 = vpop.f32.mrb[121].mxu0 }
0x109a   : > { %v8313_v55 = vpop.f32.mrb[122].mxu0 }
0x109b   : > { %v8711_v45 = vpack.c.bf16 %v8313_v55, %v8312_v37  ;;  %8698 = vmatpush3.bf16.msra.mxu1 %v8695_v1  ;;  %v5216_v12 = vpop.f32.mrb[123].mxu0  ;;  %v7305_v1 = vld [vmem:[#allocation31] ss:$0 sm:$0xff] }
0x109c   : > { %v8707_v31 = vpack.c.bf16 %v5216_v12, %v5213_v0  ;;  %8700 = vmatprep.subr.bf16.mxu1 %v8699_v44 }
0x109e   : > { %8295 = vmatmul.mubr.msk.f32.vlgmr.msra.gmra.mrb[94].mxu1 %vm3833_vm3, %v11083_v50  ;;  %v9138_v50 = vld [vmem:[#allocation26] sm:$0xff]  }
0x109f   : > { %8702 = vmatpush3.bf16.msra.mxu1 %v8699_v44  ;;  %8305 = vmatprep.mubr.msk.f32.mxu1 %vm3833_vm3, %v11029_v56 }
0x10a0   : > { %8704 = vmatprep.subr.bf16.mxu1 %v8703_v4  ;;  %v11288_v56 = vpop.f32.mrb[114].mxu0 }
0x10a3   : > { %8706 = vmatpush3.bf16.msra.mxu1 %v8703_v4 }
0x10a4   : > { %8708 = vmatprep.subr.bf16.mxu1 %v8707_v31 }
0x10a6   : > { %8306 = vmatmul.mubr.msk.f32.vlgmr.msra.gmra.mrb[94].mxu1 %vm3833_vm3, %v11040_v10  ;;  %v11290_v10 = vpop.f32.mrb[115].mxu0 }
0x10a7   : > { %8710 = vmatpush3.bf16.msra.mxu1 %v8707_v31  ;;  %8322 = vmatprep.mubr.msk.f32.mxu1 %vm3833_vm3, %v11105_v36 }
0x10a8   : > { %8712 = vmatprep.subr.bf16.mxu1 %v8711_v45  ;;  %v11292_v36 = vpop.f32.mrb[124].mxu0 }
0x10a9   : > { %v11296_v18 = vpop.f32.mrb[125].mxu0 }
0x10aa   : > { %v5470_v34 = vmax.f32 %v11290_v10, %v11296_v18 }
0x10ab   : > { %8714 = vmatpush3.bf16.msra.mxu1 %v8711_v45  ;;  %v9143_v45 = vld [vmem:[%s11563_s4 + $0x10] sm:$0xff]   ;;  %s6669_s4 = scalar_lea.sflag [#allocation4], %s1366_s0 }
0x10ac   : > { %8347 = vmatprep.subr.bf16.mxu1 %v11556_v17 }
0x10ae   : > { %8323 = vmatmul.mubr.msk.f32.vlgmr.msra.gmra.mrb[94].mxu1 %vm3833_vm3, %v11117_v26  ;;  %v5471_v26 = vmax.f32 %v11288_v56, %v11292_v36 }
0x10af   : > { %8348 = vmatpush3.bf16.msra.mxu1 %v9138_v50  ;;  %8349 = vmatprep.mubr.msk.bf16.mxu1 %vm10002_vm1, %v11556_v17 }
0x1181   : > { %v8324_v51 = vpop.f32.mrb[94].mxu1 }
0x1182   : > { %v5317_v6 = vadd.f32 %v8324_v51, %v7288_v8  ;;  %v5298_v57 = vpop.f32.mrb[95].mxu1 }
0x1183   : > { %v5316_v48 = vadd.f32 %v7288_v8, %v5298_v57  ;;  %v6132_v8 = vadd.s32 8, %v10681_v39  ;;  %v9145_v39 = vld [vmem:[%s11565_s1 + $0x10] sm:$0xff]  }
0x1184   : > { %v5319_v13 = vmax.f32 %v5317_v6, 0.0 }
0x1185   : > { %v5318_v11 = vmax.f32 %v5316_v48, 0.0  ;;  %vm6134_vm5 = vcmp.eq.s32.totalorder %v10654_v20, %v6132_v8  ;;  %v9144_v20 = vld [vmem:[%s11564_s22] sm:$0xff]   ;;  %s7350_s22 = sshll.u32 %s10212_s28, 4  ;;  %s10005_s28 = smov [#allocation40]  }
0x1186   : > { %vm8747_vm6 = vmpackc.low %vm6134_vm5, %vm6133_vm2  ;;  %s11384_s3 = scalar_lea.hbm %s10189_s19, %s7350_s22  ;;  %s9826_s6 = sshll.u32 %s10005_s28, 4  ;;  %s9827_s6 = int_to_ptr.vmem [resolvable:$false] %s9826_s6 }
0x1187   : > { %v5472_v38 = vpack.c.bf16 %v5319_v13, %v5318_v11  ;;  %v10003_v11 = vmov 1.0|1.0   ;;  %s9828_s7 = scalar_lea.vmem %s9827_s6, 32 }
0x1189   : > { %8350 = vmatmul.mubr.msk.bf16.vlgmr.msra.gmra.mrb[108].mxu1 %vm1970_vm4, %v5472_v38  ;;  %8356 = vmatmul.mubr.msk.bf16.vlgmr.msra.gmra.mrb[128].mxu0 %vm1970_vm4, %v5472_v38 }
0x118a   : > { %8363 = vmatprep.mubr.msk.f32.mxu1 %vm1970_vm4, %v10659_v23  ;;  %8376 = vmatprep.mubr.msk.f32.mxu0 %vm1970_vm4, %v10750_v21 }
0x125c   : > { %v5518_v3 = vpop.f32.mrb[108].mxu1  ;;  %v5568_v28 = vpop.f32.mrb[128].mxu0 }
0x125d   : > { %v8351_v19 = vpop.f32.mrb[109].mxu1  ;;  %v8357_v54 = vpop.f32.mrb[129].mxu0 }
0x125e   : > { %v5521_v24 = vpop.f32.mrb[110].mxu1  ;;  %v5571_v41 = vpop.f32.mrb[130].mxu0 }
0x125f   : > { %v8731_v32 = vpack.c.bf16 %v5521_v24, %v5518_v3  ;;  %v8352_v30 = vpop.f32.mrb[111].mxu1  ;;  %v8358_v53 = vpop.f32.mrb[131].mxu0  ;;  %v9147_v3 = vld [vmem:[%s11565_s1 + $0x18] sm:$0xff]  }
0x1261   : > { %8732 = vmatprep.subr.bf16.mxu1 %v8731_v32 }
0x1262   : > { %8734 = vmatpush3.bf16.msra.mxu1 %v8731_v32  ;;  %v7320_v32 = vld [vmem:[#allocation32] ss:$0 sm:$0xff] }
0x1263   : > { %8366 = vmatprep.subr.bf16.mxu1 %v11556_v17 }
0x1265   : > { %8364 = vmatmul.mubr.msk.f32.vlgmr.msra.gmra.mrb[112].mxu1 %vm1970_vm4, %v10707_v61 }
0x1266   : > { %8367 = vmatpush3.bf16.msra.mxu1 %v9140_v15  ;;  %8368 = vmatprep.mubr.msk.bf16.mxu1 %vm10002_vm1, %v11556_v17 }
0x1267   : > { %8385 = vmatprep.subr.bf16.mxu1 %v11556_v17 }
0x1269   : > { %8369 = vmatmul.mubr.msk.bf16.vlgmr.msra.gmra.mrb[116].mxu1 %vm1970_vm4, %v5472_v38  ;;  %v9146_v38 = vld [vmem:[%s11565_s1 + $0x8] sm:$0xff]  }
0x126a   : > { %8387 = vmatprep.mubr.msk.bf16.mxu1 %vm10002_vm1, %v11556_v17  ;;  %8386 = vmatpush3.bf16.msra.mxu1 %v9142_v25 }
0x126b   : > { %8398 = vmatprep.subr.bf16.mxu1 %v11556_v17 }
0x1338   : > { %v8365_v47 = vpop.f32.mrb[112].mxu1 }
0x1339   : > { %v5651_v29 = vadd.f32 %v8365_v47, %v5571_v41  ;;  %v5645_v60 = vpop.f32.mrb[113].mxu1 }
0x133a   : > { %v5646_v52 = vadd.f32 %v5645_v60, %v5568_v28 }
0x133c   : > { %v5697_v62 = vpop.f32.mrb[116].mxu1 }
0x133d   : > { %v8370_v46 = vpop.f32.mrb[117].mxu1 }
0x133e   : > { %v5700_v7 = vpop.f32.mrb[118].mxu1 }
0x133f   : > { %v8735_v9 = vpack.c.bf16 %v5700_v7, %v5697_v62  ;;  %v8371_v14 = vpop.f32.mrb[119].mxu1  ;;  %v9148_v62 = vld [vmem:[%s11565_s1 + $0x20] sm:$0xff]   ;;  %v9149_v7 = vld [vmem:[%s11565_s1 + $0x28] sm:$0xff]   ;;  %s1367_s1 = scalar_lea.vmem [#allocation40], %s1366_s0 }
0x1340   : > { %s6681_s2 = sshll.u32 %s1367_s1, 4  ;;  %s11386_s2 = int_to_ptr.vmem [resolvable:$true] %s6681_s2 }
0x1341   : > { %8736 = vmatprep.subr.bf16.mxu0 %v8735_v9  ;;  %s9822_s5 = scalar_lea.vmem %s11386_s2, 16  ;;  %p9829_p3 = scmp.lt.s32.totalorder %s11386_s2, %s9827_s6 }
0x1342   : > { %8738 = vmatpush3.bf16.msra.mxu0 %v8735_v9  ;;  %p9823_p13 = scmp.ne.s32.totalorder %s11386_s2, %s9822_s5  ;;  %p9830_p4 = scmp.lt.s32.totalorder %s9828_s7, %s9822_s5 }
0x1343   : > { %8379 = vmatprep.subr.bf16.mxu0 %v11556_v17 }
0x1344   : > { %p9824_p0 = pnand %p9823_p13, %p11566_p1  ;;  %p9831_p12 = por %p9830_p4, %p9829_p3 }
0x1345   : > { %8377 = vmatmul.mubr.msk.f32.vlgmr.msra.gmra.mrb[126].mxu0 %vm1970_vm4, %v10764_v27 }
0x1346   : > { %8381 = vmatprep.mubr.msk.bf16.mxu0 %vm10002_vm1, %v11556_v17  ;;  %8380 = vmatpush3.bf16.msra.mxu0 %v9141_v5  ;;  %p9825_p2 = pneg %p9824_p0 }
0x1348   : > { %p9832_p5 = pnand %p9831_p12, %p9825_p2 }
0x1418   : > { %v8378_v59 = vpop.f32.mrb[126].mxu0 }
0x1419   : > { %v5784_v58 = vadd.f32 %v8378_v59, %v5651_v29  ;;  %v5774_v40 = vpop.f32.mrb[127].mxu0 }
0x141a   : > { %v5783_v22 = vadd.f32 %v5774_v40, %v5646_v52 }
0x141b   : > { %v5793_v16 = vadd.f32 %v7303_v33, %v5784_v58 }
0x141c   : > { %v5792_v43 = vadd.f32 %v7303_v33, %v5783_v22 }
0x141d   : > { %v5795_v4 = vadd.f32 %v5793_v16, %v5471_v26 }
0x141e   : > { %v5794_v2 = vadd.f32 %v5792_v43, %v5470_v34 }
0x141f   : > { %v5804_v63 = vmul.f32 %v7304_v42, %v5795_v4 }
0x1420   : > { %v5803_v44 = vmul.f32 %v7304_v42, %v5794_v2 }
0x1421   : > { %v5813_v35 = vadd.f32 %v7305_v1, %v5804_v63  ;;  %v6590_v63 = vld [vmem:[%s10179_s27 + $0x10] sm:$0xff] }
0x1422   : > { %v5812_v37 = vadd.f32 %v7305_v1, %v5803_v44  ;;  %v6589_v1 = vld [vmem:[%s10179_s27 + $0x8] sm:$0xff]  ;;  %v6591_v44 = vld [vmem:[%s10179_s27 + $0x18] sm:$0xff] }
0x1423   : > { %v5815_v0 = vmax.f32 %v5813_v35, 0.0  ;;  %v10004_v35 = vmov 0.0|0.0  }
0x1424   : > { %v5814_v55 = vmax.f32 %v5812_v37, 0.0 }
0x1426   : > { %v5816_v12 = vpack.c.bf16 %v5815_v0, %v5814_v55 }
0x1428   : > { %8382 = vmatmul.mubr.msk.bf16.vlgmr.msra.gmra.mrb[132].mxu0 %vm1970_vm4, %v5816_v12  ;;  %8388 = vmatmul.mubr.msk.bf16.vlgmr.msra.gmra.mrb[120].mxu1 %vm1970_vm4, %v5816_v12 }
0x1429   : > { %8399 = vmatpush3.bf16.msra.mxu1 %v9143_v45  ;;  %8400 = vmatprep.mubr.msk.bf16.mxu1 %vm10002_vm1, %v11556_v17 }
0x142a   : > { %8395 = vmatprep.mubr.msk.f32.mxu0 %vm1970_vm4, %v10659_v23  ;;  %8418 = vmatprep.subr.bf16.mxu1 %v11556_v17 }
0x1430   : > { %8401 = vmatmul.mubr.msk.bf16.vlgmr.msra.gmra.mrb[124].mxu1 %vm1970_vm4, %v5816_v12  ;;  %v7346_v12 = vld [vmem:[#allocation34] ss:$0 sm:$0xff] }
0x1431   : > { %8422 = vmatprep.mubr.msk.bf16.mxu1 %vm10002_vm1, %v11556_v17  ;;  %8419 = vmatpush3.bf16.msra.mxu1 %v9144_v20 }
0x1432   : > { %8420 = vmatprep.subr.bf16.mxu1 %v11556_v17 }
0x1435   : > { %8421 = vmatpush3.bf16.msra.mxu1 %v9146_v38 }
0x14fb   : > { %v5862_v31 = vpop.f32.mrb[132].mxu0  ;;  %v5912_v50 = vpop.f32.mrb[120].mxu1 }
0x14fc   : > { %v8383_v49 = vpop.f32.mrb[133].mxu0  ;;  %v8389_v56 = vpop.f32.mrb[121].mxu1 }
0x14fd   : > { %v5865_v10 = vpop.f32.mrb[134].mxu0  ;;  %v5915_v36 = vpop.f32.mrb[122].mxu1 }
0x14fe   : > { %v8739_v26 = vpack.c.bf16 %v5865_v10, %v5862_v31  ;;  %v8384_v18 = vpop.f32.mrb[135].mxu0  ;;  %v8390_v34 = vpop.f32.mrb[123].mxu1  ;;  %v7348_v10 = vld [vmem:[#allocation37] ss:$0 sm:$0xff] }
0x1500   : > { %8740 = vmatprep.subr.bf16.mxu0 %v8739_v26 }
0x1501   : > { %8742 = vmatpush3.bf16.msra.mxu0 %v8739_v26 }
0x1503   : > { %v6037_v51 = vpop.f32.mrb[124].mxu1 }
0x1504   : > { %8396 = vmatmul.mubr.msk.f32.vlgmr.msra.gmra.mrb[136].mxu0 %vm1970_vm4, %v10707_v61  ;;  %v8402_v6 = vpop.f32.mrb[125].mxu1 }
0x1505   : > { %v6040_v57 = vpop.f32.mrb[126].mxu1  ;;  %8408 = vmatprep.mubr.msk.f32.mxu0 %vm1970_vm4, %v10750_v21 }
0x1506   : > { %v8743_v48 = vpack.c.bf16 %v6040_v57, %v6037_v51  ;;  %v8403_v13 = vpop.f32.mrb[127].mxu1 }
0x1508   : > { %8744 = vmatprep.subr.bf16.mxu0 %v8743_v48 }
0x1509   : > { %8746 = vmatpush3.bf16.msra.mxu0 %v8743_v48 }
0x150a   : > { %8748 = vmatprep.subr.msk.bf16.mxu0 %vm8747_vm6, %v10003_v11 }
0x150c   : > { %8409 = vmatmul.mubr.msk.f32.vlgmr.msra.gmra.mrb[138].mxu0 %vm1970_vm4, %v10764_v27 }
0x150d   : > { %8750 = vmatpush3.bf16.msk.msra.mxu0 %vm8747_vm6, %v10003_v11  ;;  %8415 = vmatprep.mubr.msk.f32.mxu0 %vm1970_vm4, %v5794_v2 }
0x150e   : > { %8426 = vmatprep.subr.bf16.mxu0 %v11556_v17 }
0x1510   : > { %8416 = vmatmul.mubr.msk.f32.vlgmr.msra.gmra.mrb[140].mxu0 %vm1970_vm4, %v5795_v4  ;;  %v6588_v4 = vld [vmem:[%s10179_s27] sm:$0xff] }
0x1511   : > { %8430 = vmatprep.mubr.msk.bf16.mxu0 %vm10002_vm1, %v11556_v17  ;;  %8427 = vmatpush3.bf16.msra.mxu0 %v9145_v39  ;;  %v8760_v2 = vpack.c.bf16 %v6589_v1, %v6588_v4 }
0x1512   : > { %8428 = vmatprep.subr.bf16.mxu0 %v11556_v17 }
0x1515   : > { %8429 = vmatpush3.bf16.msra.mxu0 %v9147_v3 }
0x1516   : > { %8441 = vmatprep.subr.bf16.mxu0 %v11556_v17 }
0x15d7   : > { %v8397_v28 = vpop.f32.mrb[136].mxu0 }
0x15d8   : > { %v5991_v19 = vadd.f32 %v8397_v28, %v5915_v36  ;;  %v5985_v54 = vpop.f32.mrb[137].mxu0 }
0x15d9   : > { %v5986_v24 = vadd.f32 %v5985_v54, %v5912_v50  ;;  %v6592_v54 = vld [vmem:[#allocation38] sm:$0x1] }
0x15df   : > { %v8410_v41 = vpop.f32.mrb[138].mxu0 }
0x15e0   : > { %v6120_v30 = vadd.f32 %v8410_v41, %v5991_v19  ;;  %v6110_v53 = vpop.f32.mrb[139].mxu0 }
0x15e1   : > { %v6119_v15 = vadd.f32 %v6110_v53, %v5986_v24 }
0x15e2   : > { %v6129_v47 = vadd.f32 %v7320_v32, %v6120_v30 }
0x15e3   : > { %v6128_v29 = vadd.f32 %v7320_v32, %v6119_v15 }
0x15e4   : > { %v6131_v60 = vmax.f32 %v6129_v47, 0.0 }
0x15e5   : > { %v6130_v52 = vmax.f32 %v6128_v29, 0.0 }
0x15e7   : > { %v6218_v46 = vpack.c.bf16 %v6131_v60, %v6130_v52 }
0x15e9   : > { %8423 = vmatmul.mubr.msk.bf16.vlgmr.msra.gmra.mrb[128].mxu1 %vm3833_vm3, %v6218_v46  ;;  %8431 = vmatmul.mubr.msk.bf16.vlgmr.msra.gmra.mrb[144].mxu0 %vm3833_vm3, %v6218_v46 }
0x15ea   : > { %8442 = vmatpush3.bf16.msra.mxu0 %v9148_v62  ;;  %8445 = vmatprep.mubr.msk.bf16.mxu0 %vm10002_vm1, %v11556_v17 }
0x15eb   : > { %8443 = vmatprep.subr.bf16.mxu0 %v11556_v17  ;;  %8438 = vmatprep.mubr.msk.f32.mxu1 %vm1970_vm4, %v10659_v23 }
0x15ee   : > { %8444 = vmatpush3.bf16.msra.mxu0 %v9149_v7 }
0x15f1   : > { %8446 = vmatmul.mubr.msk.bf16.vlgmr.msra.gmra.mrb[148].mxu0 %vm3833_vm3, %v6218_v46 }
0x15f2   : > { %8453 = vmatprep.mubr.msk.f32.mxu0 %vm1970_vm4, %v10750_v21 }
0x16bc   : > { %v6272_v9 = vpop.f32.mrb[128].mxu1  ;;  %v6330_v14 = vpop.f32.mrb[144].mxu0 }
0x16bd   : > { %v8424_v5 = vpop.f32.mrb[129].mxu1  ;;  %v8432_v25 = vpop.f32.mrb[145].mxu0 }
0x16be   : > { %v6275_v59 = vpop.f32.mrb[130].mxu1  ;;  %v6333_v33 = vpop.f32.mrb[146].mxu0 }
0x16bf   : > { %v8751_v58 = vpack.c.bf16 %v6275_v59, %v6272_v9  ;;  %v8425_v40 = vpop.f32.mrb[131].mxu1  ;;  %v8433_v22 = vpop.f32.mrb[147].mxu0 }
0x16c1   : > { %8752 = vmatprep.subr.bf16.mxu1 %v8751_v58 }
0x16c2   : > { %8754 = vmatpush3.bf16.msra.mxu1 %v8751_v58 }
0x16c3   : > { %8759 = vmatprep.subr.bf16.mxu1 %v10004_v35 }
0x16c4   : > { %v6463_v23 = vpop.f32.mrb[148].mxu0 }
0x16c5   : > { %8439 = vmatmul.mubr.msk.f32.vlgmr.msra.gmra.mrb[114].mxu1 %vm1970_vm4, %v10707_v61  ;;  %v8447_v21 = vpop.f32.mrb[149].mxu0  ;;  %v8763_v61 = vpack.c.bf16 %v6591_v44, %v6590_v63 }
0x16c6   : > { %v6466_v16 = vpop.f32.mrb[150].mxu0  ;;  %8464 = vmatprep.mubr.msk.f32.mxu1 %vm10002_vm1, %v11556_v17  ;;  %8761 = vmatpush3.bf16.msra.mxu1 %v8760_v2 }
0x16c7   : > { %v8755_v42 = vpack.c.bf16 %v6466_v16, %v6463_v23  ;;  %v8448_v43 = vpop.f32.mrb[151].mxu0  ;;  %8762 = vmatprep.subr.bf16.mxu1 %v10004_v35 }
0x16c9   : > { %8756 = vmatprep.subr.bf16.mxu0 %v8755_v42 }
0x16ca   : > { %8758 = vmatpush3.bf16.msra.mxu0 %v8755_v42  ;;  %8764 = vmatpush3.bf16.msra.mxu1 %v8763_v61 }
0x16cd   : > { %8454 = vmatmul.mubr.msk.f32.vlgmr.msra.gmra.mrb[140].mxu0 %vm1970_vm4, %v10764_v27  ;;  %v7347_v27 = vld [vmem:[#allocation35] ss:$0 sm:$0xff]  ;;  %vm6666_vm4 = vcmask 16384  }
0x1798   : > { %v8440_v37 = vpop.f32.mrb[114].mxu1 }
0x1799   : > { %v6409_v17 = vadd.f32 %v8440_v37, %v6333_v33  ;;  %v6403_v0 = vpop.f32.mrb[115].mxu1 }
0x179a   : > { %v6404_v55 = vadd.f32 %v6403_v0, %v6330_v14 }
0x17a0   : > { %v8455_v45 = vpop.f32.mrb[140].mxu0 }
0x17a1   : > { %v6546_v31 = vadd.f32 %v8455_v45, %v6409_v17  ;;  %v6536_v50 = vpop.f32.mrb[141].mxu0 }
0x17a2   : > { %v6545_v49 = vadd.f32 %v6536_v50, %v6404_v55 }
0x17a3   : > { %v6555_v56 = vadd.f32 %v7346_v12, %v6546_v31 }
0x17a4   : > { %v6554_v36 = vadd.f32 %v7346_v12, %v6545_v49 }
0x17a5   : > { %v6566_v26 = vmul.f32 %v7347_v27, %v6555_v56 }
0x17a6   : > { %v6565_v18 = vmul.f32 %v7347_v27, %v6554_v36 }
0x17a7   : > { %v6575_v34 = vadd.f32 %v7348_v10, %v6566_v26 }
0x17a8   : > { %v6574_v8 = vadd.f32 %v7348_v10, %v6565_v18 }
0x17a9   : > { %v6577_v51 = vmax.f32 %v6575_v34, 0.0 }
0x17aa   : > { %v6576_v6 = vmax.f32 %v6574_v8, 0.0 }
0x17ab   : > { %v6579_v57 = vsel %vm3833_vm3, %v6577_v51, 0.0 }
0x17ac   : > { %v6578_v48 = vsel %vm3833_vm3, %v6576_v6, 0.0 }
0x17ad   : > { %v6580_v13 = vadd.f32 %v6579_v57, %v6578_v48 }
0x17af   : > { %v6581_v11 = vrot.slane %v6580_v13, 4 }
0x17b1   : > { %v6582_v20 = vadd.f32 %v6581_v11, %v6580_v13 }
0x17b3   : > { %v6583_v39 = vrot.slane %v6582_v20, 2 }
0x17b5   : > { %v6584_v38 = vadd.f32 %v6583_v39, %v6582_v20 }
0x17b7   : > { %v6585_v3 = vrot.slane %v6584_v38, 1 }
0x17b9   : > { %v6586_v28 = vadd.f32 %v6585_v3, %v6584_v38 }
0x17bb   : > { %v6587_v19 = vmul.f32 0.0625, %v6586_v28 }
0x17bd   : > { %8465 = vmatmul.mubr.msk.f32.vlgmr.msra.gmra.mrb[132].mxu1 %vm3833_vm3, %v6587_v19 }
0x1890   : > { %v6662_v24 = vpop.f32.mrb[132].mxu1 }
0x1891   : > { %v6663_v41 = vadd.f32 %v6662_v24, %v6592_v54  ;;  %v8466_v32 = vpop.f32.mrb[133].mxu1 }
0x1893   : > { %6667 = vst.msk [vmem:[%s1367_s1] sm:$0x1] %vm6666_vm4, %v6663_v41 }
0x1894   : > { %9835 = shalt.err (!%p9832_p5)
}
0x1895   : > { %s9836_s1 = scalar_lea.hbm %s11384_s3, 16  ;;  %s9840_s0 = scalar_lea.hbm %s10189_s19, 32 }
0x1896   : > { %p9837_p6 = scmp.ne.s32.totalorder %s11384_s3, %s9836_s1  ;;  %p9841_p7 = scmp.lt.u32.totalorder %s11384_s3, %s10189_s19 }
0x1897   : > { %p9842_p8 = scmp.lt.u32.totalorder %s9840_s0, %s9836_s1  ;;  %p9844_p13 = scmp.lt.u32.totalorder %s9836_s1, %s11384_s3 }
0x1898   : > { %p9838_p9 = pnand %p9837_p6, %p11566_p1 }
0x1899   : > { %p9843_p11 = por %p9842_p8, %p9841_p7 }
0x189a   : > { %p9839_p10 = pneg %p9838_p9 }
0x189b   : > { %p9845_p0 = por %p9844_p13, %p9843_p11 }
0x189d   : > { %p9846_p2 = pnand %p9845_p0, %p9839_p10 }
0x189f   : > { %9849 = shalt.err (!%p9846_p2)
}
0x18a0   : > { %8890 = dma.vmem_to_hbm [thread:$0]  (%p11566_p1), %s11386_s2, 16, %s11384_s3, %s6669_s4  }
0x18a1 PF: > { %s11567_s6 = sld [smem:[#allocation80_spill]]  ;;  %s11568_s7 = sld [smem:[#allocation84_spill]] }
0x18a2   : > { %p9017_p3 = scmp.ge.s32.totalorder %s9936_s26, 2 }
0x18a7   : > { %s6693_s5 = sand.u32 1, %s11567_s6   ;;  %p11569_p4 = scmp.ne.s32.totalorder %s11568_s7, 0 }
0x18a8   : > { %s6694_s22 = scalar_lea.sflag [#allocation4], %s6693_s5 }
0x18a9   : > { %p8966_p12 = pnand %p9017_p3, %p11569_p4 }
0x18ab   : > { %9919 = dma.done.wait (!%p8966_p12), %s6694_s22, 16  }
0x18ac   : > { %9921 = vsyncadd (!%p8966_p12), %s6694_s22, 4294967280  ;;  %s11570_s26 = sld [smem:[#allocation82_spill]]  ;;  %s11571_s28 = sld [smem:[#allocation81_spill]] }
0x18ad   : > { %s11572_s0 = sld [smem:[#allocation83_spill]]  ;;  %s11573_s22 = smov %s9928_s23 }
0x18b2   : > { %p94_p5 = scmp.ge.s32.totalorder %s11570_s26, 4   ;;  %s11574_s23 = smov %s11571_s28 }
0x18b4   :  { %96 = sbr.rel (!%p94_p5) target bundleno = 80 (0x50), region = 349 }
0x18bb   :  { %6698 = vsyncpa [#allocation3], 1 }
0x18bc   :  { %6700 = vsyncpa [#allocation3 + $0x1], 1 }
0x18bd   :  { %6701 = vsyncpa [#allocation6], 1 }
0x18be   :  { %6702 = vsyncpa [#allocation9], 1 }
0x18bf   :  { %6703 = vsyncpa [#allocation12], 1 }
0x18c0   :  { %6704 = vsyncpa [#allocation15], 1 }
0x18c1   :  { %6705 = vsyncpa [#allocation18], 1 }
0x18c2   :  { %6706 = vsyncpa [#allocation21], 1 }
0x18c3   :  { %6707 = vsyncpa [#allocation24], 1 }
0x18c4   :  { %6708 = vsyncpa [#allocation27], 1 }
0x18c5   :  { %6709 = vsyncpa [#allocation30], 1 }
0x18c6   :  { %6710 = vsyncpa [#allocation33], 1 }
0x18c7   :  { %6711 = vsyncpa [#allocation36], 1 }
0x18c8   :  { %6712 = vsyncpa [#allocation39], 1 }
0x18c9   :  { %6713 = vsyncpa [#allocation4], 1 }
0x18ca   :  { %6715 = vsyncpa [#allocation4 + $0x1], 1 }

</bundles_post_ra>
